<compile_context>
chip_gen: v6e
topology: v6e:2x2x1
jax: 0.10.0
libtpu: 0.0.40
codegen_flags: <defaults>
</compile_context>

<pallas_src>
import functools

import jax
import jax.numpy as jnp
import numpy as np
from jax import lax
from jax.experimental import pallas as pl
from jax.experimental.pallas import tpu as pltpu

_MIB = 1024 * 1024


# ----------------------------------------------------------------------------
# Tile-size pickers (static Python on shapes).
# ----------------------------------------------------------------------------
def _pick_dw_rows(Ho, Wo, max_elems):
    """Output-row block for the depthwise kernel: multiple of 8 or == Ho."""
    if Ho * Wo <= max_elems:
        return Ho
    t = max(8, (max_elems // Wo) // 8 * 8)
    return min(t, Ho)


def _pick_fuse_rows(H, W, max_pixels):
    """Row block TR for the fused kernel: TR == H or a multiple of 64 so the
    low-res global-map block (TR//8 rows) stays a legal sublane block size."""
    t = max(64, (max_pixels // W) // 64 * 64)
    return min(t, H)


def _pick_fuse_subrows(TR, W, target_px):
    """In-kernel chunk rows: multiple of 8 dividing TR, ~target_px pixels."""
    best = 8
    for d in range(8, TR + 1, 8):
        if TR % d == 0 and d * W <= target_px:
            best = d
    return best


# ----------------------------------------------------------------------------
# Kernel 1: depthwise 3x3, stride 2, pad 1, groups=C (NCHW, pixels on lanes).
# Inputs are row/col deinterleaved so every load is contiguous:
#   ee/eo: even input rows (even / odd cols)    -> vertical tap di=1
#   oe/oo: odd  input rows (even / odd cols)    -> vertical taps di=2 and di=0
#   hoe/hoo: per-row-block top halo (odd row 2*r0-1; zeros for the first block)
# ----------------------------------------------------------------------------
def _dw3x3_s2_kernel(ee_ref, eo_ref, oe_ref, oo_ref, hoe_ref, hoo_ref,
                     w_ref, b_ref, o_ref):
    C, TRo, Wo = o_ref.shape
    dt = o_ref.dtype
    r = pl.program_id(1)
    w = w_ref[...]                                    # (C, 9, 1), taps 3*di+dj

    e1, o1 = ee_ref[...], eo_ref[...]                 # input rows 2y     (di=1)
    e2, o2 = oe_ref[...], oo_ref[...]                 # input rows 2y+1   (di=2)
    top_e = hoe_ref[:, pl.ds(r, 1), :]                # input row 2*r0-1  (di=0, k=0)
    top_o = hoo_ref[:, pl.ds(r, 1), :]
    if TRo > 1:
        e0 = jnp.concatenate([top_e, e2[:, : TRo - 1, :]], axis=1)
        o0 = jnp.concatenate([top_o, o2[:, : TRo - 1, :]], axis=1)
    else:
        e0, o0 = top_e, top_o

    zcol = jnp.zeros((C, TRo, 1), dt)

    def shift_right(v):          # v[..., x] -> v[..., x-1], zero at x == 0
        if Wo > 1:
            return jnp.concatenate([zcol, v[:, :, : Wo - 1]], axis=-1)
        return zcol

    # Horizontal taps: col 2x-1 = shifted odd, 2x = even, 2x+1 = odd.
    acc = jnp.zeros((C, TRo, Wo), jnp.float32)
    for di, (e, o) in enumerate(((e0, o0), (e1, o1), (e2, o2))):
        acc = acc + w[:, 3 * di + 0: 3 * di + 1, :] * shift_right(o)
        acc = acc + w[:, 3 * di + 1: 3 * di + 2, :] * e
        acc = acc + w[:, 3 * di + 2: 3 * di + 3, :] * o
    o_ref[...] = (acc + b_ref[...]).astype(dt)


def depthwise3x3_s2(xs, w_c33, b_c, *, max_elems=32768):
    """nn.Conv2d(C, C, k=3, s=2, p=1, groups=C) on the (virtual) channel concat
    of the NCHW tensors in `xs` (H, W even). One pallas_call per stage."""
    N, _, H, W = xs[0].shape
    C = sum(x.shape[1] for x in xs)
    assert H % 2 == 0 and W % 2 == 0
    Ho, Wo = H // 2, W // 2
    TRo = _pick_dw_rows(Ho, Wo, max_elems)
    nb = pl.cdiv(Ho, TRo)

    def deint(ri, ci):
        parts = [x[:, :, ri::2, ci::2] for x in xs]
        return parts[0] if len(parts) == 1 else jnp.concatenate(parts, axis=1)

    x_ee, x_eo = deint(0, 0), deint(0, 1)
    x_oe, x_oo = deint(1, 0), deint(1, 1)

    # Top halo per row block: odd row (r*TRo - 1); zeros for block 0.
    zero = jnp.zeros((N, C, 1, Wo), xs[0].dtype)
    if nb > 1:
        sel_e = x_oe[:, :, TRo - 1::TRo, :][:, :, : nb - 1, :]
        sel_o = x_oo[:, :, TRo - 1::TRo, :][:, :, : nb - 1, :]
        halo_oe = jnp.concatenate([zero, sel_e], axis=2)
        halo_oo = jnp.concatenate([zero, sel_o], axis=2)
    else:
        halo_oe, halo_oo = zero, zero

    w_flat = w_c33.reshape(C, 9, 1)
    b3 = b_c.reshape(C, 1, 1)

    row_spec = lambda: pl.BlockSpec((None, C, TRo, Wo), lambda n, r: (n, 0, r, 0))
    halo_spec = lambda: pl.BlockSpec((None, C, nb, Wo), lambda n, r: (n, 0, 0, 0))
    return pl.pallas_call(
        _dw3x3_s2_kernel,
        out_shape=jax.ShapeDtypeStruct((N, C, Ho, Wo), xs[0].dtype),
        grid=(N, nb),
        in_specs=[
            row_spec(), row_spec(), row_spec(), row_spec(),
            halo_spec(), halo_spec(),
            pl.BlockSpec((C, 9, 1), lambda n, r: (0, 0, 0)),
            pl.BlockSpec((C, 1, 1), lambda n, r: (0, 0, 0)),
        ],
        out_specs=pl.BlockSpec((None, C, TRo, Wo), lambda n, r: (n, 0, r, 0)),
        compiler_params=pltpu.CompilerParams(
            dimension_semantics=("parallel", "parallel"),
            vmem_limit_bytes=40 * _MIB),
    )(x_ee, x_eo, x_oe, x_oo, halo_oe, halo_oo, w_flat, b3)


# ----------------------------------------------------------------------------
# Kernel 2: separable-tail 1x1 conv (6 -> 3) at 1/64 resolution.
#   g: (C, Pg)   w: (3, C)   b: (3, 1)   o: (3, Pg)
# ----------------------------------------------------------------------------
def _seppw_kernel(g_ref, w_ref, b_ref, o_ref):
    g, w = g_ref[...], w_ref[...]
    acc = jnp.zeros(o_ref.shape, jnp.float32) + b_ref[...]
    for c in range(g.shape[0]):
        acc = acc + w[:, c: c + 1] * g[c: c + 1, :]
    o_ref[...] = acc.astype(o_ref.dtype)


# ----------------------------------------------------------------------------
# Kernel 3: fused detail branch + x8-upsampled global skip + x3 + sigmoid.
# Pixels on lanes; matmuls are (Cout, Cin) @ (Cin, npx).  The tile is processed
# in static chunks of `sub_rows` full-resolution rows to bound the (F, npx)
# hidden activations; the low-res global map is expanded x8 in both axes
# in-kernel (exact 0/1 matmul or broadcast-concat along lanes; lane concat for
# the 8-row replication) and each chunk gets a single full-width store.
# ----------------------------------------------------------------------------
def _fuse_kernel(x1_ref, x3_ref, g_ref, e_ref, w1a_ref, w1b_ref, b1_ref,
                 w2_ref, b2_ref, w3_ref, b3_ref, o_ref, *, W, sub_rows,
                 wg_dot_min):
    TP = o_ref.shape[-1]
    TR = TP // W
    Wg = g_ref.shape[-1]
    w1a, w1b, b1 = w1a_ref[...], w1b_ref[...], b1_ref[...]
    w2, b2 = w2_ref[...], b2_ref[...]
    w3, b3 = w3_ref[...], b3_ref[...]
    e_mat = e_ref[...] if Wg > wg_dot_min else None

    def expand_w8(gj):
        # (3, Wg) -> (3, 8*Wg) nearest-neighbour x8 replication along lanes.
        if e_mat is not None:                      # exact: E is a 0/1 matrix
            return jnp.dot(gj, e_mat, preferred_element_type=jnp.float32)
        pieces = [jnp.broadcast_to(gj[:, k: k + 1], (3, 8)) for k in range(Wg)]
        return pieces[0] if len(pieces) == 1 else jnp.concatenate(pieces, -1)

    for start in range(0, TR, sub_rows):
        rows = min(sub_rows, TR - start)
        npx = rows * W
        sl = slice(start * W, start * W + npx)
        x1c = x1_ref[:, sl]
        x3c = x3_ref[:, sl]

        # dnet: three pointwise convs + ReLU (layer 1 split over x1/x3).
        h = jnp.dot(w1a, x1c, preferred_element_type=jnp.float32)
        h = h + jnp.dot(w1b, x3c, preferred_element_type=jnp.float32)
        h = jnp.maximum(h + b1, 0.0)
        h = jnp.dot(w2, h, preferred_element_type=jnp.float32)
        h = jnp.maximum(h + b2, 0.0)
        d = jnp.dot(w3, h, preferred_element_type=jnp.float32)
        d = jnp.maximum(d + b3, 0.0)                       # (3, npx)

        # Global branch: one W-expanded low-res row per 8 full-res rows,
        # row-replicated via lane concatenation -> (3, npx).
        gparts = []
        for j in range(rows // 8):
            gw = expand_w8(g_ref[:, start // 8 + j, :])    # (3, 8*Wg) == (3, W)
            gparts.append(jnp.concatenate([gw] * 8, axis=-1))
        gchunk = gparts[0] if len(gparts) == 1 else jnp.concatenate(gparts, -1)

        o_ref[:, sl] = jax.nn.sigmoid(d + gchunk + x3c).astype(o_ref.dtype)


# ----------------------------------------------------------------------------
# Full forward pass (mirrors LIGHTFUSE_sigmoid_skip_long.forward; x2 unused).
# ----------------------------------------------------------------------------
def lightfuse_forward(x1, x2, x3, params, *, dw_max_elems=32768,
                      fuse_max_pixels=65536, fuse_chunk_px=16384,
                      wg_dot_min=32):
    del x2  # unused by the reference forward as well
    N, c1, H, W = x1.shape
    c3 = x3.shape[1]
    assert c3 == 3, "x3 must have 3 channels (skip connection / output)"
    assert H % 8 == 0 and W % 8 == 0, "H, W must be multiples of 8"
    nC = c1 + c3
    F_ = params["pw1_b"].shape[0]

    # ---- gnet: 3 depthwise stages, one pallas_call per stage, channels of
    # cat(x1, x3) concatenated inside the deinterleave glue (no full-res concat).
    g = depthwise3x3_s2([x1, x3], params["dw1_w"], params["dw1_b"],
                        max_elems=dw_max_elems)
    g = depthwise3x3_s2([g], params["dw2_w"], params["dw2_b"],
                        max_elems=dw_max_elems)
    g = depthwise3x3_s2([g], params["dw3_w"], params["dw3_b"],
                        max_elems=dw_max_elems)
    Hg, Wg = H // 8, W // 8
    Pg = Hg * Wg

    sep_t = jnp.transpose(params["sep_pw_w"], (1, 0))      # (3, nC)
    g3 = pl.pallas_call(
        _seppw_kernel,
        out_shape=jax.ShapeDtypeStruct((N, 3, Pg), x1.dtype),
        grid=(N,),
        in_specs=[
            pl.BlockSpec((None, nC, Pg), lambda n: (n, 0, 0)),
            pl.BlockSpec((3, nC), lambda n: (0, 0)),
            pl.BlockSpec((3, 1), lambda n: (0, 0)),
        ],
        out_specs=pl.BlockSpec((None, 3, Pg), lambda n: (n, 0, 0)),
        compiler_params=pltpu.CompilerParams(
            dimension_semantics=("parallel",),
            vmem_limit_bytes=32 * _MIB),
    )(g.reshape(N, nC, Pg), sep_t, params["sep_pw_b"].reshape(3, 1))
    g3 = g3.reshape(N, 3, Hg, Wg)                          # stays at 1/64 res

    # ---- dnet + x8-upsampled global skip + x3 skip + sigmoid: one fused kernel.
    TR = _pick_fuse_rows(H, W, fuse_max_pixels)
    TRlo = TR // 8
    TP = TR * W
    nr = pl.cdiv(H, TR)
    sub_rows = _pick_fuse_subrows(TR, W, fuse_chunk_px)
    # Exact nearest-upsample-along-W expansion matrix (0/1), resident in VMEM.
    e_mat = (jnp.arange(W, dtype=jnp.int32)[None, :] // 8
             == jnp.arange(Wg, dtype=jnp.int32)[:, None]).astype(x1.dtype)

    w1t = jnp.transpose(params["pw1_w"], (1, 0))           # (F, nC)
    w2t = jnp.transpose(params["pw2_w"], (1, 0))           # (F, F)
    w3t = jnp.transpose(params["pw3_w"], (1, 0))           # (3, F)
    out = pl.pallas_call(
        functools.partial(_fuse_kernel, W=W, sub_rows=sub_rows,
                          wg_dot_min=wg_dot_min),
        out_shape=jax.ShapeDtypeStruct((N, 3, H * W), x1.dtype),
        grid=(N, nr),
        in_specs=[
            pl.BlockSpec((None, c1, TP), lambda n, r: (n, 0, r)),
            pl.BlockSpec((None, c3, TP), lambda n, r: (n, 0, r)),
            pl.BlockSpec((None, 3, TRlo, Wg), lambda n, r: (n, 0, r, 0)),
            pl.BlockSpec((Wg, W), lambda n, r: (0, 0)),
            pl.BlockSpec((F_, c1), lambda n, r: (0, 0)),
            pl.BlockSpec((F_, c3), lambda n, r: (0, 0)),
            pl.BlockSpec((F_, 1), lambda n, r: (0, 0)),
            pl.BlockSpec((F_, F_), lambda n, r: (0, 0)),
            pl.BlockSpec((F_, 1), lambda n, r: (0, 0)),
            pl.BlockSpec((3, F_), lambda n, r: (0, 0)),
            pl.BlockSpec((3, 1), lambda n, r: (0, 0)),
        ],
        out_specs=pl.BlockSpec((None, 3, TP), lambda n, r: (n, 0, r)),
        compiler_params=pltpu.CompilerParams(
            dimension_semantics=("parallel", "parallel"),
            vmem_limit_bytes=56 * _MIB),
    )(x1.reshape(N, c1, H * W), x3.reshape(N, c3, H * W), g3, e_mat,
      w1t[:, :c1], w1t[:, c1:], params["pw1_b"].reshape(F_, 1),
      w2t, params["pw2_b"].reshape(F_, 1),
      w3t, params["pw3_b"].reshape(3, 1))
    return out.reshape(N, 3, H, W)


# ----------------------------------------------------------------------------
# Deterministic parameter init (shapes follow the module's __init__).
# Pointwise weights stored as (Cin, Cout); depthwise weights as (C, 3, 3).
# ----------------------------------------------------------------------------
def init_params(key, nChannel=6, nFeat=32):
    ks = jax.random.split(key, 14)
    s = 0.1
    n = lambda k, shape: s * jax.random.normal(k, shape, jnp.float32)
    return {
        "pw1_w": n(ks[0], (nChannel, nFeat)), "pw1_b": n(ks[1], (nFeat,)),
        "pw2_w": n(ks[2], (nFeat, nFeat)),    "pw2_b": n(ks[3], (nFeat,)),
        "pw3_w": n(ks[4], (nFeat, 3)),        "pw3_b": n(ks[5], (3,)),
        "dw1_w": n(ks[6], (nChannel, 3, 3)),  "dw1_b": n(ks[7], (nChannel,)),
        "dw2_w": n(ks[8], (nChannel, 3, 3)),  "dw2_b": n(ks[9], (nChannel,)),
        "dw3_w": n(ks[10], (nChannel, 3, 3)), "dw3_b": n(ks[11], (nChannel,)),
        "sep_pw_w": n(ks[12], (nChannel, 3)), "sep_pw_b": n(ks[13], (3,)),
    }


# ----------------------------------------------------------------------------
# Pure-JAX (lax.conv) reference for correctness checking.
# ----------------------------------------------------------------------------
def ref_forward(x1, x2, x3, p):
    del x2
    x = jnp.concatenate([x1, x3], axis=1)

    def pw(v, w, b):
        y = lax.conv_general_dilated(
            v, jnp.transpose(w, (1, 0))[:, :, None, None], (1, 1),
            ((0, 0), (0, 0)), dimension_numbers=("NCHW", "OIHW", "NCHW"))
        return y + b[None, :, None, None]

    def dw(v, w, b):
        C = v.shape[1]
        y = lax.conv_general_dilated(
            v, w[:, None, :, :], (2, 2), ((1, 1), (1, 1)),
            feature_group_count=C,
            dimension_numbers=("NCHW", "OIHW", "NCHW"))
        return y + b[None, :, None, None]

    relu = lambda v: jnp.maximum(v, 0.0)
    d = relu(pw(x, p["pw1_w"], p["pw1_b"]))
    d = relu(pw(d, p["pw2_w"], p["pw2_b"]))
    d = relu(pw(d, p["pw3_w"], p["pw3_b"]))
    g = dw(x, p["dw1_w"], p["dw1_b"])
    g = dw(g, p["dw2_w"], p["dw2_b"])
    g = dw(g, p["dw3_w"], p["dw3_b"])
    g = pw(g, p["sep_pw_w"], p["sep_pw_b"])
    g = jnp.repeat(jnp.repeat(g, 8, axis=2), 8, axis=3)
    return jax.nn.sigmoid(d + g + x3)


if __name__ == "__main__":
    key = jax.random.PRNGKey(0)
    kp, k1, k2, k3, k4, k5, k6 = jax.random.split(key, 7)
    params = init_params(kp, nChannel=6, nFeat=32)

    # Test A: small default-path shapes (single tile everywhere).
    N, H, W = 2, 16, 16
    x1 = jax.random.uniform(k1, (N, 3, H, W), jnp.float32)
    x2 = jax.random.uniform(k2, (N, 3, H, W), jnp.float32)
    x3 = jax.random.uniform(k3, (N, 3, H, W), jnp.float32)
    fwd = jax.jit(lightfuse_forward)
    out = jax.block_until_ready(fwd(x1, x2, x3, params))
    ref = ref_forward(x1, x2, x3, params)
    np.testing.assert_allclose(np.asarray(out), np.asarray(ref),
                               atol=1e-4, rtol=1e-4)

    # Test B: small tiling overrides that exercise the row-tiled depthwise
    # (halo + partial last blocks), multi-block / multi-chunk fuse tiles and
    # the matmul-based x8 lane expansion — the paths realistic frame sizes use.
    N2, H2, W2 = 1, 136, 64
    y1 = jax.random.uniform(k4, (N2, 3, H2, W2), jnp.float32)
    y2 = jax.random.uniform(k5, (N2, 3, H2, W2), jnp.float32)
    y3 = jax.random.uniform(k6, (N2, 3, H2, W2), jnp.float32)
    fwd_b = jax.jit(functools.partial(
        lightfuse_forward, dw_max_elems=512, fuse_max_pixels=4096,
        fuse_chunk_px=1024, wg_dot_min=4))
    out_b = jax.block_until_ready(fwd_b(y1, y2, y3, params))
    ref_b = ref_forward(y1, y2, y3, params)
    np.testing.assert_allclose(np.asarray(out_b), np.asarray(ref_b),
                               atol=1e-4, rtol=1e-4)

    print("KERNEL_OK")
</pallas_src>

<mosaic_0001>
module attributes {stable_mosaic.version = 11 : i64} {
  func.func @_dw3x3_s2_kernel(%arg0: i32, %arg1: i32, %arg2: memref<1x6x8x8xf32, #tpu.memory_space<vmem>>, %arg3: memref<1x6x8x8xf32, #tpu.memory_space<vmem>>, %arg4: memref<1x6x8x8xf32, #tpu.memory_space<vmem>>, %arg5: memref<1x6x8x8xf32, #tpu.memory_space<vmem>>, %arg6: memref<1x6x1x8xf32, #tpu.memory_space<vmem>>, %arg7: memref<1x6x1x8xf32, #tpu.memory_space<vmem>>, %arg8: memref<6x9x1xf32, #tpu.memory_space<vmem>>, %arg9: memref<6x1x1xf32, #tpu.memory_space<vmem>>, %arg10: memref<1x6x8x8xf32, #tpu.memory_space<vmem>>) attributes {dimension_semantics = [#tpu.dimension_semantics<parallel>, #tpu.dimension_semantics<parallel>], iteration_bounds = array<i64: 2, 1>, scalar_prefetch = 0 : i64, scratch_operands = 0 : i64, tpu.core_type = #tpu.core_type<tc>, window_params = [{transform_indices = @transform_0, window_bounds = array<i64: 1, 6, 8, 8>}, {transform_indices = @transform_1, window_bounds = array<i64: 1, 6, 8, 8>}, {transform_indices = @transform_2, window_bounds = array<i64: 1, 6, 8, 8>}, {transform_indices = @transform_3, window_bounds = array<i64: 1, 6, 8, 8>}, {transform_indices = @transform_4, window_bounds = array<i64: 1, 6, 1, 8>}, {transform_indices = @transform_5, window_bounds = array<i64: 1, 6, 1, 8>}, {pipeline_mode = #tpu.pipeline_mode<synchronous>, transform_indices = @transform_6, window_bounds = array<i64: 6, 9, 1>}, {pipeline_mode = #tpu.pipeline_mode<synchronous>, transform_indices = @transform_7, window_bounds = array<i64: 6, 1, 1>}, {transform_indices = @transform_8, window_bounds = array<i64: 1, 6, 8, 8>}]} {
    %c0 = arith.constant 0 : index
    %c0_0 = arith.constant 0 : index
    %c0_1 = arith.constant 0 : index
    %0 = vector.load %arg8[%c0, %c0_0, %c0_1] : memref<6x9x1xf32, #tpu.memory_space<vmem>>, vector<6x9x1xf32>
    %c0_2 = arith.constant 0 : index
    %c0_3 = arith.constant 0 : index
    %c0_4 = arith.constant 0 : index
    %c0_5 = arith.constant 0 : index
    %1 = vector.load %arg2[%c0_2, %c0_3, %c0_4, %c0_5] : memref<1x6x8x8xf32, #tpu.memory_space<vmem>>, vector<1x6x8x8xf32>
    %2 = vector.shape_cast %1 : vector<1x6x8x8xf32> to vector<6x8x8xf32>
    %c0_6 = arith.constant 0 : index
    %c0_7 = arith.constant 0 : index
    %c0_8 = arith.constant 0 : index
    %c0_9 = arith.constant 0 : index
    %3 = vector.load %arg3[%c0_6, %c0_7, %c0_8, %c0_9] : memref<1x6x8x8xf32, #tpu.memory_space<vmem>>, vector<1x6x8x8xf32>
    %4 = vector.shape_cast %3 : vector<1x6x8x8xf32> to vector<6x8x8xf32>
    %c0_10 = arith.constant 0 : index
    %c0_11 = arith.constant 0 : index
    %c0_12 = arith.constant 0 : index
    %c0_13 = arith.constant 0 : index
    %5 = vector.load %arg4[%c0_10, %c0_11, %c0_12, %c0_13] : memref<1x6x8x8xf32, #tpu.memory_space<vmem>>, vector<1x6x8x8xf32>
    %6 = vector.shape_cast %5 : vector<1x6x8x8xf32> to vector<6x8x8xf32>
    %c0_14 = arith.constant 0 : index
    %c0_15 = arith.constant 0 : index
    %c0_16 = arith.constant 0 : index
    %c0_17 = arith.constant 0 : index
    %7 = vector.load %arg5[%c0_14, %c0_15, %c0_16, %c0_17] : memref<1x6x8x8xf32, #tpu.memory_space<vmem>>, vector<1x6x8x8xf32>
    %8 = vector.shape_cast %7 : vector<1x6x8x8xf32> to vector<6x8x8xf32>
    %c0_18 = arith.constant 0 : index
    %c0_19 = arith.constant 0 : index
    %9 = arith.index_cast %arg1 : i32 to index
    %c0_20 = arith.constant 0 : index
    %10 = vector.load %arg6[%c0_18, %c0_19, %9, %c0_20] : memref<1x6x1x8xf32, #tpu.memory_space<vmem>>, vector<1x6x1x8xf32>
    %11 = vector.shape_cast %10 : vector<1x6x1x8xf32> to vector<6x1x8xf32>
    %c0_21 = arith.constant 0 : index
    %c0_22 = arith.constant 0 : index
    %12 = arith.index_cast %arg1 : i32 to index
    %c0_23 = arith.constant 0 : index
    %13 = vector.load %arg7[%c0_21, %c0_22, %12, %c0_23] : memref<1x6x1x8xf32, #tpu.memory_space<vmem>>, vector<1x6x1x8xf32>
    %14 = vector.shape_cast %13 : vector<1x6x1x8xf32> to vector<6x1x8xf32>
    %15 = vector.extract_strided_slice %6 {offsets = [0, 0, 0], sizes = [6, 7, 8], strides = [1, 1, 1]} : vector<6x8x8xf32> to vector<6x7x8xf32>
    %16 = tpu.concatenate %11, %15 in 1 : vector<6x1x8xf32>, vector<6x7x8xf32> -> vector<6x8x8xf32>
    %17 = vector.extract_strided_slice %8 {offsets = [0, 0, 0], sizes = [6, 7, 8], strides = [1, 1, 1]} : vector<6x8x8xf32> to vector<6x7x8xf32>
    %18 = tpu.concatenate %14, %17 in 1 : vector<6x1x8xf32>, vector<6x7x8xf32> -> vector<6x8x8xf32>
    %cst = arith.constant 0.000000e+00 : f32
    %19 = vector.broadcast %cst : f32 to vector<6x8x1xf32>
    %cst_24 = arith.constant 0.000000e+00 : f32
    %20 = vector.broadcast %cst_24 : f32 to vector<6x8x8xf32>
    %21 = vector.extract_strided_slice %0 {offsets = [0, 0, 0], sizes = [6, 1, 1], strides = [1, 1, 1]} : vector<6x9x1xf32> to vector<6x1x1xf32>
    %22 = vector.extract_strided_slice %18 {offsets = [0, 0, 0], sizes = [6, 8, 7], strides = [1, 1, 1]} : vector<6x8x8xf32> to vector<6x8x7xf32>
    %23 = tpu.concatenate %19, %22 in 2 : vector<6x8x1xf32>, vector<6x8x7xf32> -> vector<6x8x8xf32>
    %24 = vector.broadcast %21 : vector<6x1x1xf32> to vector<6x8x8xf32>
    %25 = arith.mulf %24, %23 : vector<6x8x8xf32>
    %26 = arith.addf %20, %25 : vector<6x8x8xf32>
    %27 = vector.extract_strided_slice %0 {offsets = [0, 1, 0], sizes = [6, 1, 1], strides = [1, 1, 1]} : vector<6x9x1xf32> to vector<6x1x1xf32>
    %28 = vector.broadcast %27 : vector<6x1x1xf32> to vector<6x8x8xf32>
    %29 = arith.mulf %28, %16 : vector<6x8x8xf32>
    %30 = arith.addf %26, %29 : vector<6x8x8xf32>
    %31 = vector.extract_strided_slice %0 {offsets = [0, 2, 0], sizes = [6, 1, 1], strides = [1, 1, 1]} : vector<6x9x1xf32> to vector<6x1x1xf32>
    %32 = vector.broadcast %31 : vector<6x1x1xf32> to vector<6x8x8xf32>
    %33 = arith.mulf %32, %18 : vector<6x8x8xf32>
    %34 = arith.addf %30, %33 : vector<6x8x8xf32>
    %35 = vector.extract_strided_slice %0 {offsets = [0, 3, 0], sizes = [6, 1, 1], strides = [1, 1, 1]} : vector<6x9x1xf32> to vector<6x1x1xf32>
    %36 = vector.extract_strided_slice %4 {offsets = [0, 0, 0], sizes = [6, 8, 7], strides = [1, 1, 1]} : vector<6x8x8xf32> to vector<6x8x7xf32>
    %37 = tpu.concatenate %19, %36 in 2 : vector<6x8x1xf32>, vector<6x8x7xf32> -> vector<6x8x8xf32>
    %38 = vector.broadcast %35 : vector<6x1x1xf32> to vector<6x8x8xf32>
    %39 = arith.mulf %38, %37 : vector<6x8x8xf32>
    %40 = arith.addf %34, %39 : vector<6x8x8xf32>
    %41 = vector.extract_strided_slice %0 {offsets = [0, 4, 0], sizes = [6, 1, 1], strides = [1, 1, 1]} : vector<6x9x1xf32> to vector<6x1x1xf32>
    %42 = vector.broadcast %41 : vector<6x1x1xf32> to vector<6x8x8xf32>
    %43 = arith.mulf %42, %2 : vector<6x8x8xf32>
    %44 = arith.addf %40, %43 : vector<6x8x8xf32>
    %45 = vector.extract_strided_slice %0 {offsets = [0, 5, 0], sizes = [6, 1, 1], strides = [1, 1, 1]} : vector<6x9x1xf32> to vector<6x1x1xf32>
    %46 = vector.broadcast %45 : vector<6x1x1xf32> to vector<6x8x8xf32>
    %47 = arith.mulf %46, %4 : vector<6x8x8xf32>
    %48 = arith.addf %44, %47 : vector<6x8x8xf32>
    %49 = vector.extract_strided_slice %0 {offsets = [0, 6, 0], sizes = [6, 1, 1], strides = [1, 1, 1]} : vector<6x9x1xf32> to vector<6x1x1xf32>
    %50 = vector.extract_strided_slice %8 {offsets = [0, 0, 0], sizes = [6, 8, 7], strides = [1, 1, 1]} : vector<6x8x8xf32> to vector<6x8x7xf32>
    %51 = tpu.concatenate %19, %50 in 2 : vector<6x8x1xf32>, vector<6x8x7xf32> -> vector<6x8x8xf32>
    %52 = vector.broadcast %49 : vector<6x1x1xf32> to vector<6x8x8xf32>
    %53 = arith.mulf %52, %51 : vector<6x8x8xf32>
    %54 = arith.addf %48, %53 : vector<6x8x8xf32>
    %55 = vector.extract_strided_slice %0 {offsets = [0, 7, 0], sizes = [6, 1, 1], strides = [1, 1, 1]} : vector<6x9x1xf32> to vector<6x1x1xf32>
    %56 = vector.broadcast %55 : vector<6x1x1xf32> to vector<6x8x8xf32>
    %57 = arith.mulf %56, %6 : vector<6x8x8xf32>
    %58 = arith.addf %54, %57 : vector<6x8x8xf32>
    %59 = vector.extract_strided_slice %0 {offsets = [0, 8, 0], sizes = [6, 1, 1], strides = [1, 1, 1]} : vector<6x9x1xf32> to vector<6x1x1xf32>
    %60 = vector.broadcast %59 : vector<6x1x1xf32> to vector<6x8x8xf32>
    %61 = arith.mulf %60, %8 : vector<6x8x8xf32>
    %62 = arith.addf %58, %61 : vector<6x8x8xf32>
    %c0_25 = arith.constant 0 : index
    %c0_26 = arith.constant 0 : index
    %c0_27 = arith.constant 0 : index
    %63 = vector.load %arg9[%c0_25, %c0_26, %c0_27] : memref<6x1x1xf32, #tpu.memory_space<vmem>>, vector<6x1x1xf32>
    %64 = vector.broadcast %63 : vector<6x1x1xf32> to vector<6x8x8xf32>
    %65 = arith.addf %62, %64 : vector<6x8x8xf32>
    %c0_28 = arith.constant 0 : index
    %c0_29 = arith.constant 0 : index
    %c0_30 = arith.constant 0 : index
    %c0_31 = arith.constant 0 : index
    %66 = vector.load %arg10[%c0_28, %c0_29, %c0_30, %c0_31] : memref<1x6x8x8xf32, #tpu.memory_space<vmem>>, vector<1x6x8x8xf32>
    %67 = vector.shape_cast %66 : vector<1x6x8x8xf32> to vector<6x8x8xf32>
    %68 = vector.shape_cast %65 : vector<6x8x8xf32> to vector<1x6x8x8xf32>
    tpu.vector_store %arg10[%c0_28, %c0_29, %c0_30, %c0_31], %68 {strides = array<i32>} : memref<1x6x8x8xf32, #tpu.memory_space<vmem>>, vector<1x6x8x8xf32>,
    return
  }
  func.func @transform_0(%arg0: i32, %arg1: i32) -> (i32, i32, i32, i32) {
    %c0_i32 = arith.constant 0 : i32
    %c0_i32_0 = arith.constant 0 : i32
    %c0_i32_1 = arith.constant 0 : i32
    return %arg0, %c0_i32, %arg1, %c0_i32_0 : i32, i32, i32, i32
  }
  func.func @transform_1(%arg0: i32, %arg1: i32) -> (i32, i32, i32, i32) {
    %c0_i32 = arith.constant 0 : i32
    %c0_i32_0 = arith.constant 0 : i32
    %c0_i32_1 = arith.constant 0 : i32
    return %arg0, %c0_i32, %arg1, %c0_i32_0 : i32, i32, i32, i32
  }
  func.func @transform_2(%arg0: i32, %arg1: i32) -> (i32, i32, i32, i32) {
    %c0_i32 = arith.constant 0 : i32
    %c0_i32_0 = arith.constant 0 : i32
    %c0_i32_1 = arith.constant 0 : i32
    return %arg0, %c0_i32, %arg1, %c0_i32_0 : i32, i32, i32, i32
  }
  func.func @transform_3(%arg0: i32, %arg1: i32) -> (i32, i32, i32, i32) {
    %c0_i32 = arith.constant 0 : i32
    %c0_i32_0 = arith.constant 0 : i32
    %c0_i32_1 = arith.constant 0 : i32
    return %arg0, %c0_i32, %arg1, %c0_i32_0 : i32, i32, i32, i32
  }
  func.func @transform_4(%arg0: i32, %arg1: i32) -> (i32, i32, i32, i32) {
    %c0_i32 = arith.constant 0 : i32
    %c0_i32_0 = arith.constant 0 : i32
    %c0_i32_1 = arith.constant 0 : i32
    %c0_i32_2 = arith.constant 0 : i32
    return %arg0, %c0_i32, %c0_i32_0, %c0_i32_1 : i32, i32, i32, i32
  }
  func.func @transform_5(%arg0: i32, %arg1: i32) -> (i32, i32, i32, i32) {
    %c0_i32 = arith.constant 0 : i32
    %c0_i32_0 = arith.constant 0 : i32
    %c0_i32_1 = arith.constant 0 : i32
    %c0_i32_2 = arith.constant 0 : i32
    return %arg0, %c0_i32, %c0_i32_0, %c0_i32_1 : i32, i32, i32, i32
  }
  func.func @transform_6(%arg0: i32, %arg1: i32) -> (i32, i32, i32) {
    %c0_i32 = arith.constant 0 : i32
    %c0_i32_0 = arith.constant 0 : i32
    %c0_i32_1 = arith.constant 0 : i32
    %c0_i32_2 = arith.constant 0 : i32
    return %c0_i32, %c0_i32_0, %c0_i32_1 : i32, i32, i32
  }
  func.func @transform_7(%arg0: i32, %arg1: i32) -> (i32, i32, i32) {
    %c0_i32 = arith.constant 0 : i32
    %c0_i32_0 = arith.constant 0 : i32
    %c0_i32_1 = arith.constant 0 : i32
    %c0_i32_2 = arith.constant 0 : i32
    return %c0_i32, %c0_i32_0, %c0_i32_1 : i32, i32, i32
  }
  func.func @transform_8(%arg0: i32, %arg1: i32) -> (i32, i32, i32, i32) {
    %c0_i32 = arith.constant 0 : i32
    %c0_i32_0 = arith.constant 0 : i32
    %c0_i32_1 = arith.constant 0 : i32
    return %arg0, %c0_i32, %arg1, %c0_i32_0 : i32, i32, i32, i32
  }
}

module attributes {stable_mosaic.version = 11 : i64} {
  func.func @_dw3x3_s2_kernel(%arg0: i32, %arg1: i32, %arg2: memref<1x6x4x4xf32, #tpu.memory_space<vmem>>, %arg3: memref<1x6x4x4xf32, #tpu.memory_space<vmem>>, %arg4: memref<1x6x4x4xf32, #tpu.memory_space<vmem>>, %arg5: memref<1x6x4x4xf32, #tpu.memory_space<vmem>>, %arg6: memref<1x6x1x4xf32, #tpu.memory_space<vmem>>, %arg7: memref<1x6x1x4xf32, #tpu.memory_space<vmem>>, %arg8: memref<6x9x1xf32, #tpu.memory_space<vmem>>, %arg9: memref<6x1x1xf32, #tpu.memory_space<vmem>>, %arg10: memref<1x6x4x4xf32, #tpu.memory_space<vmem>>) attributes {dimension_semantics = [#tpu.dimension_semantics<parallel>, #tpu.dimension_semantics<parallel>], iteration_bounds = array<i64: 2, 1>, scalar_prefetch = 0 : i64, scratch_operands = 0 : i64, tpu.core_type = #tpu.core_type<tc>, window_params = [{transform_indices = @transform_0, window_bounds = array<i64: 1, 6, 4, 4>}, {transform_indices = @transform_1, window_bounds = array<i64: 1, 6, 4, 4>}, {transform_indices = @transform_2, window_bounds = array<i64: 1, 6, 4, 4>}, {transform_indices = @transform_3, window_bounds = array<i64: 1, 6, 4, 4>}, {transform_indices = @transform_4, window_bounds = array<i64: 1, 6, 1, 4>}, {transform_indices = @transform_5, window_bounds = array<i64: 1, 6, 1, 4>}, {pipeline_mode = #tpu.pipeline_mode<synchronous>, transform_indices = @transform_6, window_bounds = array<i64: 6, 9, 1>}, {pipeline_mode = #tpu.pipeline_mode<synchronous>, transform_indices = @transform_7, window_bounds = array<i64: 6, 1, 1>}, {transform_indices = @transform_8, window_bounds = array<i64: 1, 6, 4, 4>}]} {
    %c0 = arith.constant 0 : index
    %c0_0 = arith.constant 0 : index
    %c0_1 = arith.constant 0 : index
    %0 = vector.load %arg8[%c0, %c0_0, %c0_1] : memref<6x9x1xf32, #tpu.memory_space<vmem>>, vector<6x9x1xf32>
    %c0_2 = arith.constant 0 : index
    %c0_3 = arith.constant 0 : index
    %c0_4 = arith.constant 0 : index
    %c0_5 = arith.constant 0 : index
    %1 = vector.load %arg2[%c0_2, %c0_3, %c0_4, %c0_5] : memref<1x6x4x4xf32, #tpu.memory_space<vmem>>, vector<1x6x4x4xf32>
    %2 = vector.shape_cast %1 : vector<1x6x4x4xf32> to vector<6x4x4xf32>
    %c0_6 = arith.constant 0 : index
    %c0_7 = arith.constant 0 : index
    %c0_8 = arith.constant 0 : index
    %c0_9 = arith.constant 0 : index
    %3 = vector.load %arg3[%c0_6, %c0_7, %c0_8, %c0_9] : memref<1x6x4x4xf32, #tpu.memory_space<vmem>>, vector<1x6x4x4xf32>
    %4 = vector.shape_cast %3 : vector<1x6x4x4xf32> to vector<6x4x4xf32>
    %c0_10 = arith.constant 0 : index
    %c0_11 = arith.constant 0 : index
    %c0_12 = arith.constant 0 : index
    %c0_13 = arith.constant 0 : index
    %5 = vector.load %arg4[%c0_10, %c0_11, %c0_12, %c0_13] : memref<1x6x4x4xf32, #tpu.memory_space<vmem>>, vector<1x6x4x4xf32>
    %6 = vector.shape_cast %5 : vector<1x6x4x4xf32> to vector<6x4x4xf32>
    %c0_14 = arith.constant 0 : index
    %c0_15 = arith.constant 0 : index
    %c0_16 = arith.constant 0 : index
    %c0_17 = arith.constant 0 : index
    %7 = vector.load %arg5[%c0_14, %c0_15, %c0_16, %c0_17] : memref<1x6x4x4xf32, #tpu.memory_space<vmem>>, vector<1x6x4x4xf32>
    %8 = vector.shape_cast %7 : vector<1x6x4x4xf32> to vector<6x4x4xf32>
    %c0_18 = arith.constant 0 : index
    %c0_19 = arith.constant 0 : index
    %9 = arith.index_cast %arg1 : i32 to index
    %c0_20 = arith.constant 0 : index
    %10 = vector.load %arg6[%c0_18, %c0_19, %9, %c0_20] : memref<1x6x1x4xf32, #tpu.memory_space<vmem>>, vector<1x6x1x4xf32>
    %11 = vector.shape_cast %10 : vector<1x6x1x4xf32> to vector<6x1x4xf32>
    %c0_21 = arith.constant 0 : index
    %c0_22 = arith.constant 0 : index
    %12 = arith.index_cast %arg1 : i32 to index
    %c0_23 = arith.constant 0 : index
    %13 = vector.load %arg7[%c0_21, %c0_22, %12, %c0_23] : memref<1x6x1x4xf32, #tpu.memory_space<vmem>>, vector<1x6x1x4xf32>
    %14 = vector.shape_cast %13 : vector<1x6x1x4xf32> to vector<6x1x4xf32>
    %15 = vector.extract_strided_slice %6 {offsets = [0, 0, 0], sizes = [6, 3, 4], strides = [1, 1, 1]} : vector<6x4x4xf32> to vector<6x3x4xf32>
    %16 = tpu.concatenate %11, %15 in 1 : vector<6x1x4xf32>, vector<6x3x4xf32> -> vector<6x4x4xf32>
    %17 = vector.extract_strided_slice %8 {offsets = [0, 0, 0], sizes = [6, 3, 4], strides = [1, 1, 1]} : vector<6x4x4xf32> to vector<6x3x4xf32>
    %18 = tpu.concatenate %14, %17 in 1 : vector<6x1x4xf32>, vector<6x3x4xf32> -> vector<6x4x4xf32>
    %cst = arith.constant 0.000000e+00 : f32
    %19 = vector.broadcast %cst : f32 to vector<6x4x1xf32>
    %cst_24 = arith.constant 0.000000e+00 : f32
    %20 = vector.broadcast %cst_24 : f32 to vector<6x4x4xf32>
    %21 = vector.extract_strided_slice %0 {offsets = [0, 0, 0], sizes = [6, 1, 1], strides = [1, 1, 1]} : vector<6x9x1xf32> to vector<6x1x1xf32>
    %22 = vector.extract_strided_slice %18 {offsets = [0, 0, 0], sizes = [6, 4, 3], strides = [1, 1, 1]} : vector<6x4x4xf32> to vector<6x4x3xf32>
    %23 = tpu.concatenate %19, %22 in 2 : vector<6x4x1xf32>, vector<6x4x3xf32> -> vector<6x4x4xf32>
    %24 = vector.broadcast %21 : vector<6x1x1xf32> to vector<6x4x4xf32>
    %25 = arith.mulf %24, %23 : vector<6x4x4xf32>
    %26 = arith.addf %20, %25 : vector<6x4x4xf32>
    %27 = vector.extract_strided_slice %0 {offsets = [0, 1, 0], sizes = [6, 1, 1], strides = [1, 1, 1]} : vector<6x9x1xf32> to vector<6x1x1xf32>
    %28 = vector.broadcast %27 : vector<6x1x1xf32> to vector<6x4x4xf32>
    %29 = arith.mulf %28, %16 : vector<6x4x4xf32>
    %30 = arith.addf %26, %29 : vector<6x4x4xf32>
    %31 = vector.extract_strided_slice %0 {offsets = [0, 2, 0], sizes = [6, 1, 1], strides = [1, 1, 1]} : vector<6x9x1xf32> to vector<6x1x1xf32>
    %32 = vector.broadcast %31 : vector<6x1x1xf32> to vector<6x4x4xf32>
    %33 = arith.mulf %32, %18 : vector<6x4x4xf32>
    %34 = arith.addf %30, %33 : vector<6x4x4xf32>
    %35 = vector.extract_strided_slice %0 {offsets = [0, 3, 0], sizes = [6, 1, 1], strides = [1, 1, 1]} : vector<6x9x1xf32> to vector<6x1x1xf32>
    %36 = vector.extract_strided_slice %4 {offsets = [0, 0, 0], sizes = [6, 4, 3], strides = [1, 1, 1]} : vector<6x4x4xf32> to vector<6x4x3xf32>
    %37 = tpu.concatenate %19, %36 in 2 : vector<6x4x1xf32>, vector<6x4x3xf32> -> vector<6x4x4xf32>
    %38 = vector.broadcast %35 : vector<6x1x1xf32> to vector<6x4x4xf32>
    %39 = arith.mulf %38, %37 : vector<6x4x4xf32>
    %40 = arith.addf %34, %39 : vector<6x4x4xf32>
    %41 = vector.extract_strided_slice %0 {offsets = [0, 4, 0], sizes = [6, 1, 1], strides = [1, 1, 1]} : vector<6x9x1xf32> to vector<6x1x1xf32>
    %42 = vector.broadcast %41 : vector<6x1x1xf32> to vector<6x4x4xf32>
    %43 = arith.mulf %42, %2 : vector<6x4x4xf32>
    %44 = arith.addf %40, %43 : vector<6x4x4xf32>
    %45 = vector.extract_strided_slice %0 {offsets = [0, 5, 0], sizes = [6, 1, 1], strides = [1, 1, 1]} : vector<6x9x1xf32> to vector<6x1x1xf32>
    %46 = vector.broadcast %45 : vector<6x1x1xf32> to vector<6x4x4xf32>
    %47 = arith.mulf %46, %4 : vector<6x4x4xf32>
    %48 = arith.addf %44, %47 : vector<6x4x4xf32>
    %49 = vector.extract_strided_slice %0 {offsets = [0, 6, 0], sizes = [6, 1, 1], strides = [1, 1, 1]} : vector<6x9x1xf32> to vector<6x1x1xf32>
    %50 = vector.extract_strided_slice %8 {offsets = [0, 0, 0], sizes = [6, 4, 3], strides = [1, 1, 1]} : vector<6x4x4xf32> to vector<6x4x3xf32>
    %51 = tpu.concatenate %19, %50 in 2 : vector<6x4x1xf32>, vector<6x4x3xf32> -> vector<6x4x4xf32>
    %52 = vector.broadcast %49 : vector<6x1x1xf32> to vector<6x4x4xf32>
    %53 = arith.mulf %52, %51 : vector<6x4x4xf32>
    %54 = arith.addf %48, %53 : vector<6x4x4xf32>
    %55 = vector.extract_strided_slice %0 {offsets = [0, 7, 0], sizes = [6, 1, 1], strides = [1, 1, 1]} : vector<6x9x1xf32> to vector<6x1x1xf32>
    %56 = vector.broadcast %55 : vector<6x1x1xf32> to vector<6x4x4xf32>
    %57 = arith.mulf %56, %6 : vector<6x4x4xf32>
    %58 = arith.addf %54, %57 : vector<6x4x4xf32>
    %59 = vector.extract_strided_slice %0 {offsets = [0, 8, 0], sizes = [6, 1, 1], strides = [1, 1, 1]} : vector<6x9x1xf32> to vector<6x1x1xf32>
    %60 = vector.broadcast %59 : vector<6x1x1xf32> to vector<6x4x4xf32>
    %61 = arith.mulf %60, %8 : vector<6x4x4xf32>
    %62 = arith.addf %58, %61 : vector<6x4x4xf32>
    %c0_25 = arith.constant 0 : index
    %c0_26 = arith.constant 0 : index
    %c0_27 = arith.constant 0 : index
    %63 = vector.load %arg9[%c0_25, %c0_26, %c0_27] : memref<6x1x1xf32, #tpu.memory_space<vmem>>, vector<6x1x1xf32>
    %64 = vector.broadcast %63 : vector<6x1x1xf32> to vector<6x4x4xf32>
    %65 = arith.addf %62, %64 : vector<6x4x4xf32>
    %c0_28 = arith.constant 0 : index
    %c0_29 = arith.constant 0 : index
    %c0_30 = arith.constant 0 : index
    %c0_31 = arith.constant 0 : index
    %66 = vector.load %arg10[%c0_28, %c0_29, %c0_30, %c0_31] : memref<1x6x4x4xf32, #tpu.memory_space<vmem>>, vector<1x6x4x4xf32>
    %67 = vector.shape_cast %66 : vector<1x6x4x4xf32> to vector<6x4x4xf32>
    %68 = vector.shape_cast %65 : vector<6x4x4xf32> to vector<1x6x4x4xf32>
    tpu.vector_store %arg10[%c0_28, %c0_29, %c0_30, %c0_31], %68 {strides = array<i32>} : memref<1x6x4x4xf32, #tpu.memory_space<vmem>>, vector<1x6x4x4xf32>,
    return
  }
  func.func @transform_0(%arg0: i32, %arg1: i32) -> (i32, i32, i32, i32) {
    %c0_i32 = arith.constant 0 : i32
    %c0_i32_0 = arith.constant 0 : i32
    %c0_i32_1 = arith.constant 0 : i32
    return %arg0, %c0_i32, %arg1, %c0_i32_0 : i32, i32, i32, i32
  }
  func.func @transform_1(%arg0: i32, %arg1: i32) -> (i32, i32, i32, i32) {
    %c0_i32 = arith.constant 0 : i32
    %c0_i32_0 = arith.constant 0 : i32
    %c0_i32_1 = arith.constant 0 : i32
    return %arg0, %c0_i32, %arg1, %c0_i32_0 : i32, i32, i32, i32
  }
  func.func @transform_2(%arg0: i32, %arg1: i32) -> (i32, i32, i32, i32) {
    %c0_i32 = arith.constant 0 : i32
    %c0_i32_0 = arith.constant 0 : i32
    %c0_i32_1 = arith.constant 0 : i32
    return %arg0, %c0_i32, %arg1, %c0_i32_0 : i32, i32, i32, i32
  }
  func.func @transform_3(%arg0: i32, %arg1: i32) -> (i32, i32, i32, i32) {
    %c0_i32 = arith.constant 0 : i32
    %c0_i32_0 = arith.constant 0 : i32
    %c0_i32_1 = arith.constant 0 : i32
    return %arg0, %c0_i32, %arg1, %c0_i32_0 : i32, i32, i32, i32
  }
  func.func @transform_4(%arg0: i32, %arg1: i32) -> (i32, i32, i32, i32) {
    %c0_i32 = arith.constant 0 : i32
    %c0_i32_0 = arith.constant 0 : i32
    %c0_i32_1 = arith.constant 0 : i32
    %c0_i32_2 = arith.constant 0 : i32
    return %arg0, %c0_i32, %c0_i32_0, %c0_i32_1 : i32, i32, i32, i32
  }
  func.func @transform_5(%arg0: i32, %arg1: i32) -> (i32, i32, i32, i32) {
    %c0_i32 = arith.constant 0 : i32
    %c0_i32_0 = arith.constant 0 : i32
    %c0_i32_1 = arith.constant 0 : i32
    %c0_i32_2 = arith.constant 0 : i32
    return %arg0, %c0_i32, %c0_i32_0, %c0_i32_1 : i32, i32, i32, i32
  }
  func.func @transform_6(%arg0: i32, %arg1: i32) -> (i32, i32, i32) {
    %c0_i32 = arith.constant 0 : i32
    %c0_i32_0 = arith.constant 0 : i32
    %c0_i32_1 = arith.constant 0 : i32
    %c0_i32_2 = arith.constant 0 : i32
    return %c0_i32, %c0_i32_0, %c0_i32_1 : i32, i32, i32
  }
  func.func @transform_7(%arg0: i32, %arg1: i32) -> (i32, i32, i32) {
    %c0_i32 = arith.constant 0 : i32
    %c0_i32_0 = arith.constant 0 : i32
    %c0_i32_1 = arith.constant 0 : i32
    %c0_i32_2 = arith.constant 0 : i32
    return %c0_i32, %c0_i32_0, %c0_i32_1 : i32, i32, i32
  }
  func.func @transform_8(%arg0: i32, %arg1: i32) -> (i32, i32, i32, i32) {
    %c0_i32 = arith.constant 0 : i32
    %c0_i32_0 = arith.constant 0 : i32
    %c0_i32_1 = arith.constant 0 : i32
    return %arg0, %c0_i32, %arg1, %c0_i32_0 : i32, i32, i32, i32
  }
}

module attributes {stable_mosaic.version = 11 : i64} {
  func.func @_dw3x3_s2_kernel(%arg0: i32, %arg1: i32, %arg2: memref<1x6x2x2xf32, #tpu.memory_space<vmem>>, %arg3: memref<1x6x2x2xf32, #tpu.memory_space<vmem>>, %arg4: memref<1x6x2x2xf32, #tpu.memory_space<vmem>>, %arg5: memref<1x6x2x2xf32, #tpu.memory_space<vmem>>, %arg6: memref<1x6x1x2xf32, #tpu.memory_space<vmem>>, %arg7: memref<1x6x1x2xf32, #tpu.memory_space<vmem>>, %arg8: memref<6x9x1xf32, #tpu.memory_space<vmem>>, %arg9: memref<6x1x1xf32, #tpu.memory_space<vmem>>, %arg10: memref<1x6x2x2xf32, #tpu.memory_space<vmem>>) attributes {dimension_semantics = [#tpu.dimension_semantics<parallel>, #tpu.dimension_semantics<parallel>], iteration_bounds = array<i64: 2, 1>, scalar_prefetch = 0 : i64, scratch_operands = 0 : i64, tpu.core_type = #tpu.core_type<tc>, window_params = [{transform_indices = @transform_0, window_bounds = array<i64: 1, 6, 2, 2>}, {transform_indices = @transform_1, window_bounds = array<i64: 1, 6, 2, 2>}, {transform_indices = @transform_2, window_bounds = array<i64: 1, 6, 2, 2>}, {transform_indices = @transform_3, window_bounds = array<i64: 1, 6, 2, 2>}, {transform_indices = @transform_4, window_bounds = array<i64: 1, 6, 1, 2>}, {transform_indices = @transform_5, window_bounds = array<i64: 1, 6, 1, 2>}, {pipeline_mode = #tpu.pipeline_mode<synchronous>, transform_indices = @transform_6, window_bounds = array<i64: 6, 9, 1>}, {pipeline_mode = #tpu.pipeline_mode<synchronous>, transform_indices = @transform_7, window_bounds = array<i64: 6, 1, 1>}, {transform_indices = @transform_8, window_bounds = array<i64: 1, 6, 2, 2>}]} {
    %c0 = arith.constant 0 : index
    %c0_0 = arith.constant 0 : index
    %c0_1 = arith.constant 0 : index
    %0 = vector.load %arg8[%c0, %c0_0, %c0_1] : memref<6x9x1xf32, #tpu.memory_space<vmem>>, vector<6x9x1xf32>
    %c0_2 = arith.constant 0 : index
    %c0_3 = arith.constant 0 : index
    %c0_4 = arith.constant 0 : index
    %c0_5 = arith.constant 0 : index
    %1 = vector.load %arg2[%c0_2, %c0_3, %c0_4, %c0_5] : memref<1x6x2x2xf32, #tpu.memory_space<vmem>>, vector<1x6x2x2xf32>
    %2 = vector.shape_cast %1 : vector<1x6x2x2xf32> to vector<6x2x2xf32>
    %c0_6 = arith.constant 0 : index
    %c0_7 = arith.constant 0 : index
    %c0_8 = arith.constant 0 : index
    %c0_9 = arith.constant 0 : index
    %3 = vector.load %arg3[%c0_6, %c0_7, %c0_8, %c0_9] : memref<1x6x2x2xf32, #tpu.memory_space<vmem>>, vector<1x6x2x2xf32>
    %4 = vector.shape_cast %3 : vector<1x6x2x2xf32> to vector<6x2x2xf32>
    %c0_10 = arith.constant 0 : index
    %c0_11 = arith.constant 0 : index
    %c0_12 = arith.constant 0 : index
    %c0_13 = arith.constant 0 : index
    %5 = vector.load %arg4[%c0_10, %c0_11, %c0_12, %c0_13] : memref<1x6x2x2xf32, #tpu.memory_space<vmem>>, vector<1x6x2x2xf32>
    %6 = vector.shape_cast %5 : vector<1x6x2x2xf32> to vector<6x2x2xf32>
    %c0_14 = arith.constant 0 : index
    %c0_15 = arith.constant 0 : index
    %c0_16 = arith.constant 0 : index
    %c0_17 = arith.constant 0 : index
    %7 = vector.load %arg5[%c0_14, %c0_15, %c0_16, %c0_17] : memref<1x6x2x2xf32, #tpu.memory_space<vmem>>, vector<1x6x2x2xf32>
    %8 = vector.shape_cast %7 : vector<1x6x2x2xf32> to vector<6x2x2xf32>
    %c0_18 = arith.constant 0 : index
    %c0_19 = arith.constant 0 : index
    %9 = arith.index_cast %arg1 : i32 to index
    %c0_20 = arith.constant 0 : index
    %10 = vector.load %arg6[%c0_18, %c0_19, %9, %c0_20] : memref<1x6x1x2xf32, #tpu.memory_space<vmem>>, vector<1x6x1x2xf32>
    %11 = vector.shape_cast %10 : vector<1x6x1x2xf32> to vector<6x1x2xf32>
    %c0_21 = arith.constant 0 : index
    %c0_22 = arith.constant 0 : index
    %12 = arith.index_cast %arg1 : i32 to index
    %c0_23 = arith.constant 0 : index
    %13 = vector.load %arg7[%c0_21, %c0_22, %12, %c0_23] : memref<1x6x1x2xf32, #tpu.memory_space<vmem>>, vector<1x6x1x2xf32>
    %14 = vector.shape_cast %13 : vector<1x6x1x2xf32> to vector<6x1x2xf32>
    %15 = vector.extract_strided_slice %6 {offsets = [0, 0, 0], sizes = [6, 1, 2], strides = [1, 1, 1]} : vector<6x2x2xf32> to vector<6x1x2xf32>
    %16 = tpu.concatenate %11, %15 in 1 : vector<6x1x2xf32>, vector<6x1x2xf32> -> vector<6x2x2xf32>
    %17 = vector.extract_strided_slice %8 {offsets = [0, 0, 0], sizes = [6, 1, 2], strides = [1, 1, 1]} : vector<6x2x2xf32> to vector<6x1x2xf32>
    %18 = tpu.concatenate %14, %17 in 1 : vector<6x1x2xf32>, vector<6x1x2xf32> -> vector<6x2x2xf32>
    %cst = arith.constant 0.000000e+00 : f32
    %19 = vector.broadcast %cst : f32 to vector<6x2x1xf32>
    %cst_24 = arith.constant 0.000000e+00 : f32
    %20 = vector.broadcast %cst_24 : f32 to vector<6x2x2xf32>
    %21 = vector.extract_strided_slice %0 {offsets = [0, 0, 0], sizes = [6, 1, 1], strides = [1, 1, 1]} : vector<6x9x1xf32> to vector<6x1x1xf32>
    %22 = vector.extract_strided_slice %18 {offsets = [0, 0, 0], sizes = [6, 2, 1], strides = [1, 1, 1]} : vector<6x2x2xf32> to vector<6x2x1xf32>
    %23 = tpu.concatenate %19, %22 in 2 : vector<6x2x1xf32>, vector<6x2x1xf32> -> vector<6x2x2xf32>
    %24 = vector.broadcast %21 : vector<6x1x1xf32> to vector<6x2x2xf32>
    %25 = arith.mulf %24, %23 : vector<6x2x2xf32>
    %26 = arith.addf %20, %25 : vector<6x2x2xf32>
    %27 = vector.extract_strided_slice %0 {offsets = [0, 1, 0], sizes = [6, 1, 1], strides = [1, 1, 1]} : vector<6x9x1xf32> to vector<6x1x1xf32>
    %28 = vector.broadcast %27 : vector<6x1x1xf32> to vector<6x2x2xf32>
    %29 = arith.mulf %28, %16 : vector<6x2x2xf32>
    %30 = arith.addf %26, %29 : vector<6x2x2xf32>
    %31 = vector.extract_strided_slice %0 {offsets = [0, 2, 0], sizes = [6, 1, 1], strides = [1, 1, 1]} : vector<6x9x1xf32> to vector<6x1x1xf32>
    %32 = vector.broadcast %31 : vector<6x1x1xf32> to vector<6x2x2xf32>
    %33 = arith.mulf %32, %18 : vector<6x2x2xf32>
    %34 = arith.addf %30, %33 : vector<6x2x2xf32>
    %35 = vector.extract_strided_slice %0 {offsets = [0, 3, 0], sizes = [6, 1, 1], strides = [1, 1, 1]} : vector<6x9x1xf32> to vector<6x1x1xf32>
    %36 = vector.extract_strided_slice %4 {offsets = [0, 0, 0], sizes = [6, 2, 1], strides = [1, 1, 1]} : vector<6x2x2xf32> to vector<6x2x1xf32>
    %37 = tpu.concatenate %19, %36 in 2 : vector<6x2x1xf32>, vector<6x2x1xf32> -> vector<6x2x2xf32>
    %38 = vector.broadcast %35 : vector<6x1x1xf32> to vector<6x2x2xf32>
    %39 = arith.mulf %38, %37 : vector<6x2x2xf32>
    %40 = arith.addf %34, %39 : vector<6x2x2xf32>
    %41 = vector.extract_strided_slice %0 {offsets = [0, 4, 0], sizes = [6, 1, 1], strides = [1, 1, 1]} : vector<6x9x1xf32> to vector<6x1x1xf32>
    %42 = vector.broadcast %41 : vector<6x1x1xf32> to vector<6x2x2xf32>
    %43 = arith.mulf %42, %2 : vector<6x2x2xf32>
    %44 = arith.addf %40, %43 : vector<6x2x2xf32>
    %45 = vector.extract_strided_slice %0 {offsets = [0, 5, 0], sizes = [6, 1, 1], strides = [1, 1, 1]} : vector<6x9x1xf32> to vector<6x1x1xf32>
    %46 = vector.broadcast %45 : vector<6x1x1xf32> to vector<6x2x2xf32>
    %47 = arith.mulf %46, %4 : vector<6x2x2xf32>
    %48 = arith.addf %44, %47 : vector<6x2x2xf32>
    %49 = vector.extract_strided_slice %0 {offsets = [0, 6, 0], sizes = [6, 1, 1], strides = [1, 1, 1]} : vector<6x9x1xf32> to vector<6x1x1xf32>
    %50 = vector.extract_strided_slice %8 {offsets = [0, 0, 0], sizes = [6, 2, 1], strides = [1, 1, 1]} : vector<6x2x2xf32> to vector<6x2x1xf32>
    %51 = tpu.concatenate %19, %50 in 2 : vector<6x2x1xf32>, vector<6x2x1xf32> -> vector<6x2x2xf32>
    %52 = vector.broadcast %49 : vector<6x1x1xf32> to vector<6x2x2xf32>
    %53 = arith.mulf %52, %51 : vector<6x2x2xf32>
    %54 = arith.addf %48, %53 : vector<6x2x2xf32>
    %55 = vector.extract_strided_slice %0 {offsets = [0, 7, 0], sizes = [6, 1, 1], strides = [1, 1, 1]} : vector<6x9x1xf32> to vector<6x1x1xf32>
    %56 = vector.broadcast %55 : vector<6x1x1xf32> to vector<6x2x2xf32>
    %57 = arith.mulf %56, %6 : vector<6x2x2xf32>
    %58 = arith.addf %54, %57 : vector<6x2x2xf32>
    %59 = vector.extract_strided_slice %0 {offsets = [0, 8, 0], sizes = [6, 1, 1], strides = [1, 1, 1]} : vector<6x9x1xf32> to vector<6x1x1xf32>
    %60 = vector.broadcast %59 : vector<6x1x1xf32> to vector<6x2x2xf32>
    %61 = arith.mulf %60, %8 : vector<6x2x2xf32>
    %62 = arith.addf %58, %61 : vector<6x2x2xf32>
    %c0_25 = arith.constant 0 : index
    %c0_26 = arith.constant 0 : index
    %c0_27 = arith.constant 0 : index
    %63 = vector.load %arg9[%c0_25, %c0_26, %c0_27] : memref<6x1x1xf32, #tpu.memory_space<vmem>>, vector<6x1x1xf32>
    %64 = vector.broadcast %63 : vector<6x1x1xf32> to vector<6x2x2xf32>
    %65 = arith.addf %62, %64 : vector<6x2x2xf32>
    %c0_28 = arith.constant 0 : index
    %c0_29 = arith.constant 0 : index
    %c0_30 = arith.constant 0 : index
    %c0_31 = arith.constant 0 : index
    %66 = vector.load %arg10[%c0_28, %c0_29, %c0_30, %c0_31] : memref<1x6x2x2xf32, #tpu.memory_space<vmem>>, vector<1x6x2x2xf32>
    %67 = vector.shape_cast %66 : vector<1x6x2x2xf32> to vector<6x2x2xf32>
    %68 = vector.shape_cast %65 : vector<6x2x2xf32> to vector<1x6x2x2xf32>
    tpu.vector_store %arg10[%c0_28, %c0_29, %c0_30, %c0_31], %68 {strides = array<i32>} : memref<1x6x2x2xf32, #tpu.memory_space<vmem>>, vector<1x6x2x2xf32>,
    return
  }
  func.func @transform_0(%arg0: i32, %arg1: i32) -> (i32, i32, i32, i32) {
    %c0_i32 = arith.constant 0 : i32
    %c0_i32_0 = arith.constant 0 : i32
    %c0_i32_1 = arith.constant 0 : i32
    return %arg0, %c0_i32, %arg1, %c0_i32_0 : i32, i32, i32, i32
  }
  func.func @transform_1(%arg0: i32, %arg1: i32) -> (i32, i32, i32, i32) {
    %c0_i32 = arith.constant 0 : i32
    %c0_i32_0 = arith.constant 0 : i32
    %c0_i32_1 = arith.constant 0 : i32
    return %arg0, %c0_i32, %arg1, %c0_i32_0 : i32, i32, i32, i32
  }
  func.func @transform_2(%arg0: i32, %arg1: i32) -> (i32, i32, i32, i32) {
    %c0_i32 = arith.constant 0 : i32
    %c0_i32_0 = arith.constant 0 : i32
    %c0_i32_1 = arith.constant 0 : i32
    return %arg0, %c0_i32, %arg1, %c0_i32_0 : i32, i32, i32, i32
  }
  func.func @transform_3(%arg0: i32, %arg1: i32) -> (i32, i32, i32, i32) {
    %c0_i32 = arith.constant 0 : i32
    %c0_i32_0 = arith.constant 0 : i32
    %c0_i32_1 = arith.constant 0 : i32
    return %arg0, %c0_i32, %arg1, %c0_i32_0 : i32, i32, i32, i32
  }
  func.func @transform_4(%arg0: i32, %arg1: i32) -> (i32, i32, i32, i32) {
    %c0_i32 = arith.constant 0 : i32
    %c0_i32_0 = arith.constant 0 : i32
    %c0_i32_1 = arith.constant 0 : i32
    %c0_i32_2 = arith.constant 0 : i32
    return %arg0, %c0_i32, %c0_i32_0, %c0_i32_1 : i32, i32, i32, i32
  }
  func.func @transform_5(%arg0: i32, %arg1: i32) -> (i32, i32, i32, i32) {
    %c0_i32 = arith.constant 0 : i32
    %c0_i32_0 = arith.constant 0 : i32
    %c0_i32_1 = arith.constant 0 : i32
    %c0_i32_2 = arith.constant 0 : i32
    return %arg0, %c0_i32, %c0_i32_0, %c0_i32_1 : i32, i32, i32, i32
  }
  func.func @transform_6(%arg0: i32, %arg1: i32) -> (i32, i32, i32) {
    %c0_i32 = arith.constant 0 : i32
    %c0_i32_0 = arith.constant 0 : i32
    %c0_i32_1 = arith.constant 0 : i32
    %c0_i32_2 = arith.constant 0 : i32
    return %c0_i32, %c0_i32_0, %c0_i32_1 : i32, i32, i32
  }
  func.func @transform_7(%arg0: i32, %arg1: i32) -> (i32, i32, i32) {
    %c0_i32 = arith.constant 0 : i32
    %c0_i32_0 = arith.constant 0 : i32
    %c0_i32_1 = arith.constant 0 : i32
    %c0_i32_2 = arith.constant 0 : i32
    return %c0_i32, %c0_i32_0, %c0_i32_1 : i32, i32, i32
  }
  func.func @transform_8(%arg0: i32, %arg1: i32) -> (i32, i32, i32, i32) {
    %c0_i32 = arith.constant 0 : i32
    %c0_i32_0 = arith.constant 0 : i32
    %c0_i32_1 = arith.constant 0 : i32
    return %arg0, %c0_i32, %arg1, %c0_i32_0 : i32, i32, i32, i32
  }
}

module attributes {stable_mosaic.version = 11 : i64} {
  func.func @_seppw_kernel(%arg0: i32, %arg1: memref<1x6x4xf32, #tpu.memory_space<vmem>>, %arg2: memref<3x6xf32, #tpu.memory_space<vmem>>, %arg3: memref<3x1xf32, #tpu.memory_space<vmem>>, %arg4: memref<1x3x4xf32, #tpu.memory_space<vmem>>) attributes {dimension_semantics = [#tpu.dimension_semantics<parallel>], iteration_bounds = array<i64: 2>, scalar_prefetch = 0 : i64, scratch_operands = 0 : i64, tpu.core_type = #tpu.core_type<tc>, window_params = [{transform_indices = @transform_0, window_bounds = array<i64: 1, 6, 4>}, {pipeline_mode = #tpu.pipeline_mode<synchronous>, transform_indices = @transform_1, window_bounds = array<i64: 3, 6>}, {pipeline_mode = #tpu.pipeline_mode<synchronous>, transform_indices = @transform_2, window_bounds = array<i64: 3, 1>}, {transform_indices = @transform_3, window_bounds = array<i64: 1, 3, 4>}]} {
    %c0 = arith.constant 0 : index
    %c0_0 = arith.constant 0 : index
    %c0_1 = arith.constant 0 : index
    %0 = vector.load %arg1[%c0, %c0_0, %c0_1] : memref<1x6x4xf32, #tpu.memory_space<vmem>>, vector<1x6x4xf32>
    %1 = vector.shape_cast %0 : vector<1x6x4xf32> to vector<6x4xf32>
    %c0_2 = arith.constant 0 : index
    %c0_3 = arith.constant 0 : index
    %2 = vector.load %arg2[%c0_2, %c0_3] : memref<3x6xf32, #tpu.memory_space<vmem>>, vector<3x6xf32>
    %cst = arith.constant 0.000000e+00 : f32
    %3 = vector.broadcast %cst : f32 to vector<3x4xf32>
    %c0_4 = arith.constant 0 : index
    %c0_5 = arith.constant 0 : index
    %4 = vector.load %arg3[%c0_4, %c0_5] : memref<3x1xf32, #tpu.memory_space<vmem>>, vector<3x1xf32>
    %5 = vector.broadcast %4 : vector<3x1xf32> to vector<3x4xf32>
    %6 = arith.addf %3, %5 : vector<3x4xf32>
    %7 = vector.extract_strided_slice %2 {offsets = [0, 0], sizes = [3, 1], strides = [1, 1]} : vector<3x6xf32> to vector<3x1xf32>
    %8 = vector.extract_strided_slice %1 {offsets = [0, 0], sizes = [1, 4], strides = [1, 1]} : vector<6x4xf32> to vector<1x4xf32>
    %9 = vector.broadcast %7 : vector<3x1xf32> to vector<3x4xf32>
    %10 = vector.broadcast %8 : vector<1x4xf32> to vector<3x4xf32>
    %11 = arith.mulf %9, %10 : vector<3x4xf32>
    %12 = arith.addf %6, %11 : vector<3x4xf32>
    %13 = vector.extract_strided_slice %2 {offsets = [0, 1], sizes = [3, 1], strides = [1, 1]} : vector<3x6xf32> to vector<3x1xf32>
    %14 = vector.extract_strided_slice %1 {offsets = [1, 0], sizes = [1, 4], strides = [1, 1]} : vector<6x4xf32> to vector<1x4xf32>
    %15 = vector.broadcast %13 : vector<3x1xf32> to vector<3x4xf32>
    %16 = vector.broadcast %14 : vector<1x4xf32> to vector<3x4xf32>
    %17 = arith.mulf %15, %16 : vector<3x4xf32>
    %18 = arith.addf %12, %17 : vector<3x4xf32>
    %19 = vector.extract_strided_slice %2 {offsets = [0, 2], sizes = [3, 1], strides = [1, 1]} : vector<3x6xf32> to vector<3x1xf32>
    %20 = vector.extract_strided_slice %1 {offsets = [2, 0], sizes = [1, 4], strides = [1, 1]} : vector<6x4xf32> to vector<1x4xf32>
    %21 = vector.broadcast %19 : vector<3x1xf32> to vector<3x4xf32>
    %22 = vector.broadcast %20 : vector<1x4xf32> to vector<3x4xf32>
    %23 = arith.mulf %21, %22 : vector<3x4xf32>
    %24 = arith.addf %18, %23 : vector<3x4xf32>
    %25 = vector.extract_strided_slice %2 {offsets = [0, 3], sizes = [3, 1], strides = [1, 1]} : vector<3x6xf32> to vector<3x1xf32>
    %26 = vector.extract_strided_slice %1 {offsets = [3, 0], sizes = [1, 4], strides = [1, 1]} : vector<6x4xf32> to vector<1x4xf32>
    %27 = vector.broadcast %25 : vector<3x1xf32> to vector<3x4xf32>
    %28 = vector.broadcast %26 : vector<1x4xf32> to vector<3x4xf32>
    %29 = arith.mulf %27, %28 : vector<3x4xf32>
    %30 = arith.addf %24, %29 : vector<3x4xf32>
    %31 = vector.extract_strided_slice %2 {offsets = [0, 4], sizes = [3, 1], strides = [1, 1]} : vector<3x6xf32> to vector<3x1xf32>
    %32 = vector.extract_strided_slice %1 {offsets = [4, 0], sizes = [1, 4], strides = [1, 1]} : vector<6x4xf32> to vector<1x4xf32>
    %33 = vector.broadcast %31 : vector<3x1xf32> to vector<3x4xf32>
    %34 = vector.broadcast %32 : vector<1x4xf32> to vector<3x4xf32>
    %35 = arith.mulf %33, %34 : vector<3x4xf32>
    %36 = arith.addf %30, %35 : vector<3x4xf32>
    %37 = vector.extract_strided_slice %2 {offsets = [0, 5], sizes = [3, 1], strides = [1, 1]} : vector<3x6xf32> to vector<3x1xf32>
    %38 = vector.extract_strided_slice %1 {offsets = [5, 0], sizes = [1, 4], strides = [1, 1]} : vector<6x4xf32> to vector<1x4xf32>
    %39 = vector.broadcast %37 : vector<3x1xf32> to vector<3x4xf32>
    %40 = vector.broadcast %38 : vector<1x4xf32> to vector<3x4xf32>
    %41 = arith.mulf %39, %40 : vector<3x4xf32>
    %42 = arith.addf %36, %41 : vector<3x4xf32>
    %c0_6 = arith.constant 0 : index
    %c0_7 = arith.constant 0 : index
    %c0_8 = arith.constant 0 : index
    %43 = vector.load %arg4[%c0_6, %c0_7, %c0_8] : memref<1x3x4xf32, #tpu.memory_space<vmem>>, vector<1x3x4xf32>
    %44 = vector.shape_cast %43 : vector<1x3x4xf32> to vector<3x4xf32>
    %45 = vector.shape_cast %42 : vector<3x4xf32> to vector<1x3x4xf32>
    tpu.vector_store %arg4[%c0_6, %c0_7, %c0_8], %45 {strides = array<i32>} : memref<1x3x4xf32, #tpu.memory_space<vmem>>, vector<1x3x4xf32>,
    return
  }
  func.func @transform_0(%arg0: i32) -> (i32, i32, i32) {
    %c0_i32 = arith.constant 0 : i32
    %c0_i32_0 = arith.constant 0 : i32
    %c0_i32_1 = arith.constant 0 : i32
    return %arg0, %c0_i32, %c0_i32_0 : i32, i32, i32
  }
  func.func @transform_1(%arg0: i32) -> (i32, i32) {
    %c0_i32 = arith.constant 0 : i32
    %c0_i32_0 = arith.constant 0 : i32
    %c0_i32_1 = arith.constant 0 : i32
    return %c0_i32, %c0_i32_0 : i32, i32
  }
  func.func @transform_2(%arg0: i32) -> (i32, i32) {
    %c0_i32 = arith.constant 0 : i32
    %c0_i32_0 = arith.constant 0 : i32
    %c0_i32_1 = arith.constant 0 : i32
    return %c0_i32, %c0_i32_0 : i32, i32
  }
  func.func @transform_3(%arg0: i32) -> (i32, i32, i32) {
    %c0_i32 = arith.constant 0 : i32
    %c0_i32_0 = arith.constant 0 : i32
    %c0_i32_1 = arith.constant 0 : i32
    return %arg0, %c0_i32, %c0_i32_0 : i32, i32, i32
  }
}

module attributes {stable_mosaic.version = 11 : i64} {
  func.func @_fuse_kernel(%arg0: i32, %arg1: i32, %arg2: memref<1x3x256xf32, #tpu.memory_space<vmem>>, %arg3: memref<1x3x256xf32, #tpu.memory_space<vmem>>, %arg4: memref<1x3x2x2xf32, #tpu.memory_space<vmem>>, %arg5: memref<2x16xf32, #tpu.memory_space<vmem>>, %arg6: memref<32x3xf32, #tpu.memory_space<vmem>>, %arg7: memref<32x3xf32, #tpu.memory_space<vmem>>, %arg8: memref<32x1xf32, #tpu.memory_space<vmem>>, %arg9: memref<32x32xf32, #tpu.memory_space<vmem>>, %arg10: memref<32x1xf32, #tpu.memory_space<vmem>>, %arg11: memref<3x32xf32, #tpu.memory_space<vmem>>, %arg12: memref<3x1xf32, #tpu.memory_space<vmem>>, %arg13: memref<1x3x256xf32, #tpu.memory_space<vmem>>) attributes {dimension_semantics = [#tpu.dimension_semantics<parallel>, #tpu.dimension_semantics<parallel>], iteration_bounds = array<i64: 2, 1>, scalar_prefetch = 0 : i64, scratch_operands = 0 : i64, tpu.core_type = #tpu.core_type<tc>, window_params = [{transform_indices = @transform_0, window_bounds = array<i64: 1, 3, 256>}, {transform_indices = @transform_1, window_bounds = array<i64: 1, 3, 256>}, {transform_indices = @transform_2, window_bounds = array<i64: 1, 3, 2, 2>}, {pipeline_mode = #tpu.pipeline_mode<synchronous>, transform_indices = @transform_3, window_bounds = array<i64: 2, 16>}, {pipeline_mode = #tpu.pipeline_mode<synchronous>, transform_indices = @transform_4, window_bounds = array<i64: 32, 3>}, {pipeline_mode = #tpu.pipeline_mode<synchronous>, transform_indices = @transform_5, window_bounds = array<i64: 32, 3>}, {pipeline_mode = #tpu.pipeline_mode<synchronous>, transform_indices = @transform_6, window_bounds = array<i64: 32, 1>}, {pipeline_mode = #tpu.pipeline_mode<synchronous>, transform_indices = @transform_7, window_bounds = array<i64: 32, 32>}, {pipeline_mode = #tpu.pipeline_mode<synchronous>, transform_indices = @transform_8, window_bounds = array<i64: 32, 1>}, {pipeline_mode = #tpu.pipeline_mode<synchronous>, transform_indices = @transform_9, window_bounds = array<i64: 3, 32>}, {pipeline_mode = #tpu.pipeline_mode<synchronous>, transform_indices = @transform_10, window_bounds = array<i64: 3, 1>}, {transform_indices = @transform_11, window_bounds = array<i64: 1, 3, 256>}]} {
    %c0 = arith.constant 0 : index
    %c0_0 = arith.constant 0 : index
    %0 = vector.load %arg6[%c0, %c0_0] : memref<32x3xf32, #tpu.memory_space<vmem>>, vector<32x3xf32>
    %c0_1 = arith.constant 0 : index
    %c0_2 = arith.constant 0 : index
    %1 = vector.load %arg7[%c0_1, %c0_2] : memref<32x3xf32, #tpu.memory_space<vmem>>, vector<32x3xf32>
    %c0_3 = arith.constant 0 : index
    %c0_4 = arith.constant 0 : index
    %2 = vector.load %arg8[%c0_3, %c0_4] : memref<32x1xf32, #tpu.memory_space<vmem>>, vector<32x1xf32>
    %c0_5 = arith.constant 0 : index
    %c0_6 = arith.constant 0 : index
    %3 = vector.load %arg9[%c0_5, %c0_6] : memref<32x32xf32, #tpu.memory_space<vmem>>, vector<32x32xf32>
    %c0_7 = arith.constant 0 : index
    %c0_8 = arith.constant 0 : index
    %4 = vector.load %arg10[%c0_7, %c0_8] : memref<32x1xf32, #tpu.memory_space<vmem>>, vector<32x1xf32>
    %c0_9 = arith.constant 0 : index
    %c0_10 = arith.constant 0 : index
    %5 = vector.load %arg11[%c0_9, %c0_10] : memref<3x32xf32, #tpu.memory_space<vmem>>, vector<3x32xf32>
    %c0_11 = arith.constant 0 : index
    %c0_12 = arith.constant 0 : index
    %6 = vector.load %arg12[%c0_11, %c0_12] : memref<3x1xf32, #tpu.memory_space<vmem>>, vector<3x1xf32>
    %c0_13 = arith.constant 0 : index
    %c0_14 = arith.constant 0 : index
    %c0_15 = arith.constant 0 : index
    %7 = vector.load %arg2[%c0_13, %c0_14, %c0_15] : memref<1x3x256xf32, #tpu.memory_space<vmem>>, vector<1x3x256xf32>
    %8 = vector.shape_cast %7 : vector<1x3x256xf32> to vector<3x256xf32>
    %c0_16 = arith.constant 0 : index
    %c0_17 = arith.constant 0 : index
    %c0_18 = arith.constant 0 : index
    %9 = vector.load %arg3[%c0_16, %c0_17, %c0_18] : memref<1x3x256xf32, #tpu.memory_space<vmem>>, vector<1x3x256xf32>
    %10 = vector.shape_cast %9 : vector<1x3x256xf32> to vector<3x256xf32>
    %cst = arith.constant dense<0.000000e+00> : vector<32x256xf32>
    %11 = tpu.matmul %0, %8, %cst {dimension_numbers = #tpu.dot_dimension_numbers<[1], [0], [0], [1], [0, 0, 1, 1], [], []>} : vector<32x3xf32>, vector<3x256xf32>, vector<32x256xf32> -> vector<32x256xf32>
    %cst_19 = arith.constant dense<0.000000e+00> : vector<32x256xf32>
    %12 = tpu.matmul %1, %10, %cst_19 {dimension_numbers = #tpu.dot_dimension_numbers<[1], [0], [0], [1], [0, 0, 1, 1], [], []>} : vector<32x3xf32>, vector<3x256xf32>, vector<32x256xf32> -> vector<32x256xf32>
    %13 = arith.addf %11, %12 : vector<32x256xf32>
    %14 = vector.broadcast %2 : vector<32x1xf32> to vector<32x256xf32>
    %15 = arith.addf %13, %14 : vector<32x256xf32>
    %cst_20 = arith.constant 0.000000e+00 : f32
    %16 = vector.broadcast %cst_20 : f32 to vector<32x256xf32>
    %17 = arith.maximumf %15, %16 : vector<32x256xf32>
    %cst_21 = arith.constant dense<0.000000e+00> : vector<32x256xf32>
    %18 = tpu.matmul %3, %17, %cst_21 {dimension_numbers = #tpu.dot_dimension_numbers<[1], [0], [0], [1], [0, 0, 1, 1], [], []>} : vector<32x32xf32>, vector<32x256xf32>, vector<32x256xf32> -> vector<32x256xf32>
    %19 = vector.broadcast %4 : vector<32x1xf32> to vector<32x256xf32>
    %20 = arith.addf %18, %19 : vector<32x256xf32>
    %cst_22 = arith.constant 0.000000e+00 : f32
    %21 = vector.broadcast %cst_22 : f32 to vector<32x256xf32>
    %22 = arith.maximumf %20, %21 : vector<32x256xf32>
    %cst_23 = arith.constant dense<0.000000e+00> : vector<3x256xf32>
    %23 = tpu.matmul %5, %22, %cst_23 {dimension_numbers = #tpu.dot_dimension_numbers<[1], [0], [0], [1], [0, 0, 1, 1], [], []>} : vector<3x32xf32>, vector<32x256xf32>, vector<3x256xf32> -> vector<3x256xf32>
    %24 = vector.broadcast %6 : vector<3x1xf32> to vector<3x256xf32>
    %25 = arith.addf %23, %24 : vector<3x256xf32>
    %cst_24 = arith.constant 0.000000e+00 : f32
    %26 = vector.broadcast %cst_24 : f32 to vector<3x256xf32>
    %27 = arith.maximumf %25, %26 : vector<3x256xf32>
    %c0_25 = arith.constant 0 : index
    %c0_26 = arith.constant 0 : index
    %c0_27 = arith.constant 0 : index
    %c0_28 = arith.constant 0 : index
    %28 = vector.load %arg4[%c0_25, %c0_26, %c0_27, %c0_28] : memref<1x3x2x2xf32, #tpu.memory_space<vmem>>, vector<1x3x1x2xf32>
    %29 = vector.shape_cast %28 : vector<1x3x1x2xf32> to vector<3x2xf32>
    %30 = vector.extract_strided_slice %29 {offsets = [0, 0], sizes = [3, 1], strides = [1, 1]} : vector<3x2xf32> to vector<3x1xf32>
    %31 = vector.shape_cast %30 : vector<3x1xf32> to vector<3x1xf32>
    %32 = vector.broadcast %31 : vector<3x1xf32> to vector<3x8xf32>
    %33 = vector.extract_strided_slice %29 {offsets = [0, 1], sizes = [3, 1], strides = [1, 1]} : vector<3x2xf32> to vector<3x1xf32>
    %34 = vector.shape_cast %33 : vector<3x1xf32> to vector<3x1xf32>
    %35 = vector.broadcast %34 : vector<3x1xf32> to vector<3x8xf32>
    %36 = tpu.concatenate %32, %35 in 1 : vector<3x8xf32>, vector<3x8xf32> -> vector<3x16xf32>
    %37 = tpu.concatenate %36, %36, %36, %36, %36, %36, %36, %36 in 1 : vector<3x16xf32>, vector<3x16xf32>, vector<3x16xf32>, vector<3x16xf32>, vector<3x16xf32>, vector<3x16xf32>, vector<3x16xf32>, vector<3x16xf32> -> vector<3x128xf32>
    %c0_29 = arith.constant 0 : index
    %c0_30 = arith.constant 0 : index
    %c1 = arith.constant 1 : index
    %c0_31 = arith.constant 0 : index
    %38 = vector.load %arg4[%c0_29, %c0_30, %c1, %c0_31] : memref<1x3x2x2xf32, #tpu.memory_space<vmem>>, vector<1x3x1x2xf32>
    %39 = vector.shape_cast %38 : vector<1x3x1x2xf32> to vector<3x2xf32>
    %40 = vector.extract_strided_slice %39 {offsets = [0, 0], sizes = [3, 1], strides = [1, 1]} : vector<3x2xf32> to vector<3x1xf32>
    %41 = vector.shape_cast %40 : vector<3x1xf32> to vector<3x1xf32>
    %42 = vector.broadcast %41 : vector<3x1xf32> to vector<3x8xf32>
    %43 = vector.extract_strided_slice %39 {offsets = [0, 1], sizes = [3, 1], strides = [1, 1]} : vector<3x2xf32> to vector<3x1xf32>
    %44 = vector.shape_cast %43 : vector<3x1xf32> to vector<3x1xf32>
    %45 = vector.broadcast %44 : vector<3x1xf32> to vector<3x8xf32>
    %46 = tpu.concatenate %42, %45 in 1 : vector<3x8xf32>, vector<3x8xf32> -> vector<3x16xf32>
    %47 = tpu.concatenate %46, %46, %46, %46, %46, %46, %46, %46 in 1 : vector<3x16xf32>, vector<3x16xf32>, vector<3x16xf32>, vector<3x16xf32>, vector<3x16xf32>, vector<3x16xf32>, vector<3x16xf32>, vector<3x16xf32> -> vector<3x128xf32>
    %48 = tpu.concatenate %37, %47 in 1 : vector<3x128xf32>, vector<3x128xf32> -> vector<3x256xf32>
    %49 = arith.addf %27, %48 : vector<3x256xf32>
    %50 = arith.addf %49, %10 : vector<3x256xf32>
    %51 = arith.negf %50 : vector<3x256xf32>
    %52 = math.exp %51 : vector<3x256xf32>
    %cst_32 = arith.constant 1.000000e+00 : f32
    %53 = vector.broadcast %cst_32 : f32 to vector<3x256xf32>
    %54 = arith.addf %53, %52 : vector<3x256xf32>
    %55 = arith.divf %53, %54 : vector<3x256xf32>
    %c0_33 = arith.constant 0 : index
    %c0_34 = arith.constant 0 : index
    %c0_35 = arith.constant 0 : index
    %56 = vector.load %arg13[%c0_33, %c0_34, %c0_35] : memref<1x3x256xf32, #tpu.memory_space<vmem>>, vector<1x3x256xf32>
    %57 = vector.shape_cast %56 : vector<1x3x256xf32> to vector<3x256xf32>
    %58 = vector.shape_cast %55 : vector<3x256xf32> to vector<1x3x256xf32>
    tpu.vector_store %arg13[%c0_33, %c0_34, %c0_35], %58 {strides = array<i32>} : memref<1x3x256xf32, #tpu.memory_space<vmem>>, vector<1x3x256xf32>,
    return
  }
  func.func @transform_0(%arg0: i32, %arg1: i32) -> (i32, i32, i32) {
    %c0_i32 = arith.constant 0 : i32
    %c0_i32_0 = arith.constant 0 : i32
    return %arg0, %c0_i32, %arg1 : i32, i32, i32
  }
  func.func @transform_1(%arg0: i32, %arg1: i32) -> (i32, i32, i32) {
    %c0_i32 = arith.constant 0 : i32
    %c0_i32_0 = arith.constant 0 : i32
    return %arg0, %c0_i32, %arg1 : i32, i32, i32
  }
  func.func @transform_2(%arg0: i32, %arg1: i32) -> (i32, i32, i32, i32) {
    %c0_i32 = arith.constant 0 : i32
    %c0_i32_0 = arith.constant 0 : i32
    %c0_i32_1 = arith.constant 0 : i32
    return %arg0, %c0_i32, %arg1, %c0_i32_0 : i32, i32, i32, i32
  }
  func.func @transform_3(%arg0: i32, %arg1: i32) -> (i32, i32) {
    %c0_i32 = arith.constant 0 : i32
    %c0_i32_0 = arith.constant 0 : i32
    %c0_i32_1 = arith.constant 0 : i32
    return %c0_i32, %c0_i32_0 : i32, i32
  }
  func.func @transform_4(%arg0: i32, %arg1: i32) -> (i32, i32) {
    %c0_i32 = arith.constant 0 : i32
    %c0_i32_0 = arith.constant 0 : i32
    %c0_i32_1 = arith.constant 0 : i32
    return %c0_i32, %c0_i32_0 : i32, i32
  }
  func.func @transform_5(%arg0: i32, %arg1: i32) -> (i32, i32) {
    %c0_i32 = arith.constant 0 : i32
    %c0_i32_0 = arith.constant 0 : i32
    %c0_i32_1 = arith.constant 0 : i32
    return %c0_i32, %c0_i32_0 : i32, i32
  }
  func.func @transform_6(%arg0: i32, %arg1: i32) -> (i32, i32) {
    %c0_i32 = arith.constant 0 : i32
    %c0_i32_0 = arith.constant 0 : i32
    %c0_i32_1 = arith.constant 0 : i32
    return %c0_i32, %c0_i32_0 : i32, i32
  }
  func.func @transform_7(%arg0: i32, %arg1: i32) -> (i32, i32) {
    %c0_i32 = arith.constant 0 : i32
    %c0_i32_0 = arith.constant 0 : i32
    %c0_i32_1 = arith.constant 0 : i32
    return %c0_i32, %c0_i32_0 : i32, i32
  }
  func.func @transform_8(%arg0: i32, %arg1: i32) -> (i32, i32) {
    %c0_i32 = arith.constant 0 : i32
    %c0_i32_0 = arith.constant 0 : i32
    %c0_i32_1 = arith.constant 0 : i32
    return %c0_i32, %c0_i32_0 : i32, i32
  }
  func.func @transform_9(%arg0: i32, %arg1: i32) -> (i32, i32) {
    %c0_i32 = arith.constant 0 : i32
    %c0_i32_0 = arith.constant 0 : i32
    %c0_i32_1 = arith.constant 0 : i32
    return %c0_i32, %c0_i32_0 : i32, i32
  }
  func.func @transform_10(%arg0: i32, %arg1: i32) -> (i32, i32) {
    %c0_i32 = arith.constant 0 : i32
    %c0_i32_0 = arith.constant 0 : i32
    %c0_i32_1 = arith.constant 0 : i32
    return %c0_i32, %c0_i32_0 : i32, i32
  }
  func.func @transform_11(%arg0: i32, %arg1: i32) -> (i32, i32, i32) {
    %c0_i32 = arith.constant 0 : i32
    %c0_i32_0 = arith.constant 0 : i32
    return %arg0, %c0_i32, %arg1 : i32, i32, i32
  }
}

</mosaic_0001>

<bundles_post_ra>
// kernel: lightfuse_forward.6
= control target key start
LH: loop header
LB: loop body
LE: loop exit
PB: predicated region body
PF: predicated region fallthrough
CT: control target
= control target key end

     0   :  { %s1435_s27 = smov 0   ;;  %s1437_s28 = smov 0   ;;  %s1982_s0 = inlined_call_operand.vmem [shape: f32[2,6,4,4], index: 0, kind: input, shape index: {}]   ;;  %s1983_s1 = inlined_call_operand.vmem [shape: f32[2,6,4,4], index: 1, kind: input, shape index: {}]   ;;  %s1984_s2 = inlined_call_operand.vmem [shape: f32[2,6,4,4], index: 2, kind: input, shape index: {}]   ;;  %s1985_s3 = inlined_call_operand.vmem [shape: f32[2,6,4,4], index: 3, kind: input, shape index: {}]   ;;  %s1986_s4 = inlined_call_operand.vmem [shape: f32[2,6,1,4], index: 4, kind: input, shape index: {}, may-alias: {4,5}]   ;;  %s1987_s5 = inlined_call_operand.vmem [shape: f32[2,6,1,4], index: 5, kind: input, shape index: {}, may-alias: {4,5}]   ;;  %s1988_s6 = inlined_call_operand.vmem [shape: f32[6,9,1], index: 6, kind: input, shape index: {}]   ;;  %s1989_s7 = inlined_call_operand.vmem [shape: f32[6,1,1], index: 7, kind: input, shape index: {}]   ;;  %s1990_s8 = inlined_call_operand.vmem [shape: f32[2,6,4,4], index: 8, kind: output, shape index: {}]  }
   0x1   :  { %1994 = sst [smem:[#allocation8_spill]] %s1983_s1  ;;  %s1439_s29 = smov 0  }
   0x2   :  { %1995 = sst [smem:[#allocation9_spill]] %s1984_s2 }
   0x3   :  { %1996 = sst [smem:[#allocation10_spill]] %s1985_s3 }
   0x4   :  { %1997 = sst [smem:[#allocation11_spill]] %s1986_s4 }
   0x5   :  { %1998 = sst [smem:[#allocation12_spill]] %s1987_s5 }
   0x6   :  { %1999 = sst [smem:[#allocation13_spill]] %s1988_s6 }
   0x7   :  { %2000 = sst [smem:[#allocation14_spill]] %s1989_s7 }
   0x8   :  { %2001 = sst [smem:[#allocation15_spill]] %s1990_s8 }
   0x9 LB: > { %2002 = sst [smem:[#allocation2_spill]] %s1382_s28  ;;  %s30_s30 = sadd.s32 1, %s1382_s28  ;;  %s1386_s29 = sphi %s1439_s29, %s18_s29   ;;  %s1382_s28 = sphi %s1437_s28, %s2021_s28   ;;  %s1378_s27 = sphi %s1435_s27, %s2020_s27  }
   0xa   : > { %2003 = sst [smem:[#allocation3_spill]] %s1386_s29  ;;  %p1212_p0 = scmp.ge.s32.totalorder %s1386_s29, 1 }
   0xb   : > { %p32_p1 = scmp.ge.s32.totalorder %s30_s30, 2  ;;  %p344_p2 = scmp.lt.s32.totalorder %s1386_s29, 3 }
   0xd   : > { %s2023_s30 = smov (%p32_p1, %s30_s30), 0  ;;  %p345_p3 = pnand %p1212_p0, %p344_p2 }
   0xe   : > { %2004 = sst [smem:[#allocation4_spill]] %s2023_s30 }
   0xf   : > { %348 = sbr.rel (%p345_p3) target bundleno = 204 (0xcc), region = 52 }
  0x14   : > { %p416_p4 = scmp.lt.s32.totalorder %s1378_s27, 1  ;;  %v1388_v0 = vmov 0   ;;  %s2005_s6 = sld [smem:[#allocation13_spill]]  ;;  %vm532_vm0 = vcmask 1040384   ;;  %vm587_vm1 = vcmask 7168   ;;  %vm1038_vm2 = vcmask 27648  }
  0x15   : > { %1363 = vset.pattern.permute.xlu1 %v1388_v0  ;;  %1362 = vset.pattern.permute.xlu0 %v1388_v0  ;;  %s2006_s3 = sld [smem:[#allocation10_spill]]  ;;  %s1389_s11 = smov 1  }
  0x16   : > { %s2025_s27 = smov (!%p416_p4, %s1378_s27), 1  ;;  %s2007_s5 = sld [smem:[#allocation12_spill]] }
  0x17   : > { %s1477_s17 = smul.u32 24, %s2025_s27  ;;  %s2008_s1 = sld [smem:[#allocation8_spill]] }
  0x18   : > { %s1227_s20 = smul.u32 6, %s2025_s27  ;;  %s2009_s2 = sld [smem:[#allocation9_spill]] }
  0x19   : > { %s2010_s4 = sld [smem:[#allocation11_spill]] }
  0x1a   : > { %v1458_v1 = vld [vmem:[%s2005_s6] sm:$0xff]  ;;  %v1464_v2 = vld [vmem:[%s2005_s6 + $0x10] sm:$0xff]  ;;  %s2011_s7 = sld [smem:[#allocation14_spill]] }
  0x1b   : > { %1228 = vpush %v1458_v1  ;;  %v1469_v3 = vld [vmem:[%s2005_s6 + $0x20] sm:$0xff]  ;;  %v1474_v4 = vld [vmem:[%s2005_s6 + $0x30] sm:$0xff]  ;;  %v630_v7 = vrot.slane %v1458_v1, 1  ;;  %s1497_s25 = scalar_lea.vmem %s2006_s3, %s1477_s17  ;;  %v631_v8 = vrot.slane %v1464_v2, 1  ;;  %v666_v29 = vrot.slane %v1458_v1, 2  ;;  %v667_v30 = vrot.slane %v1464_v2, 2 }
  0x1c   : > { %1230 = vpush %v1464_v2  ;;  %v1483_v5 = vld [vmem:[%s2005_s6 + $0x40] sm:$0xff]  ;;  %v1490_v6 = vld [vmem:[%s2005_s6 + $0x50] sm:$0xff]  ;;  %v632_v9 = vrot.slane %v1469_v3, 1  ;;  %v633_v10 = vrot.slane %v1474_v4, 1  ;;  %s1508_s10 = scalar_lea.vmem %s2007_s5, %s1227_s20  ;;  %v1511_v11 = vld [vmem:[%s1497_s25 + $0x8] sm:$0xf] }
  0x1d   : > { %1232 = vpush %v1469_v3  ;;  %v1514_v12 = vld [vmem:[%s1497_s25] sm:$0xf]  ;;  %v1517_v13 = vld [vmem:[%s1497_s25 + $0xc] sm:$0xf]  ;;  %v547_v15 = vrot.slane %v1511_v11, 7  ;;  %v634_v21 = vrot.slane %v1483_v5, 1  ;;  %s1579_s14 = scalar_lea.vmem %s2008_s1, %s1477_s17 }
  0x1e   : > { %1234 = vpush %v1474_v4  ;;  %v510_v14 = vld [vmem:[%s1508_s10 + $0x2] sm:$0x1]  ;;  %v508_v16 = vld [vmem:[%s1508_s10] sm:$0x1]  ;;  %v545_v17 = vrot.slane %v1514_v12, 7  ;;  %v548_v19 = vrot.slane %v1517_v13, 7  ;;  %s1587_s18 = scalar_lea.vmem %s2009_s2, %s1477_s17 }
  0x1f   : > { %1236 = vpush %v1483_v5  ;;  %v511_v18 = vld [vmem:[%s1508_s10 + $0x3] sm:$0x1]  ;;  %v1528_v20 = vld [vmem:[%s1497_s25 + $0x4] sm:$0xf]  ;;  %v1532_v22 = vsel %vm532_vm0, %v510_v14, %v547_v15  ;;  %v509_v24 = vld [vmem:[%s1508_s10 + $0x1] sm:$0x1]  ;;  %s1594_s22 = scalar_lea.vmem %s2010_s4, %s1227_s20 }
  0x20   : > { %1238 = vpush %v1490_v6  ;;  %v1535_v23 = vsel %vm532_vm0, %v508_v16, %v545_v17  ;;  %v546_v25 = vrot.slane %v1528_v20, 7  ;;  %v1540_v26 = vld [vmem:[%s1497_s25 + $0x14] sm:$0xf]  ;;  %v635_v27 = vrot.slane %v1490_v6, 1  ;;  %573 = vrot.lane.b32.xlu1 %v1532_v22, %s1389_s11  ;;  %v1548_v28 = vld [vmem:[%s1497_s25 + $0x10] sm:$0xf]  ;;  %v1553_v31 = vsel %vm532_vm0, %v511_v18, %v548_v19 }
  0x21   : > { %1240 = vpush %v630_v7  ;;  %569 = vrot.lane.b32.xlu0 %v1535_v23, %s1389_s11  ;;  %v550_v33 = vrot.slane %v1540_v26, 7  ;;  %v549_v34 = vrot.slane %v1548_v28, 7  ;;  %v513_v35 = vld [vmem:[%s1508_s10 + $0x5] sm:$0x1]  ;;  %v512_v36 = vld [vmem:[%s1508_s10 + $0x4] sm:$0x1] }
  0x22   : > { %1242 = vpush %v631_v8  ;;  %v1556_v32 = vsel %vm532_vm0, %v509_v24, %v546_v25  ;;  %v668_v37 = vrot.slane %v1469_v3, 2  ;;  %v669_v38 = vrot.slane %v1474_v4, 2  ;;  %v670_v39 = vrot.slane %v1483_v5, 2  ;;  %v1602_v45 = vld [vmem:[%s1579_s14 + $0x4] sm:$0xf] }
  0x23   : > { %1244 = vpush %v632_v9  ;;  %v1570_v40 = vsel %vm532_vm0, %v513_v35, %v550_v33  ;;  %v1573_v41 = vsel %vm532_vm0, %v512_v36, %v549_v34  ;;  %v671_v42 = vrot.slane %v1490_v6, 2  ;;  %v732_v43 = vrot.slane %v1458_v1, 3  ;;  %v1607_v48 = vld [vmem:[%s1579_s14] sm:$0xf]  ;;  %v1616_v53 = vld [vmem:[%s1587_s18 + $0x4] sm:$0xf] }
  0x24   : > { %1246 = vpush %v633_v10  ;;  %575 = vrot.lane.b32.xlu1 %v1553_v31, %s1389_s11  ;;  %v733_v44 = vrot.slane %v1464_v2, 3  ;;  %v734_v46 = vrot.slane %v1469_v3, 3  ;;  %v735_v47 = vrot.slane %v1474_v4, 3  ;;  %v1610_v49 = vld [vmem:[%s1587_s18] sm:$0xf]  ;;  %v736_v51 = vrot.slane %v1483_v5, 3 }
  0x25   : > { %1248 = vpush %v634_v21  ;;  %571 = vrot.lane.b32.xlu0 %v1556_v32, %s1389_s11  ;;  %v501_v50 = vld [vmem:[%s1594_s22] sm:$0x1]  ;;  %v520_v52 = vrot.slane %v1610_v49, 7  ;;  %v502_v54 = vld [vmem:[%s1594_s22 + $0x1] sm:$0x1]  ;;  %v737_v57 = vrot.slane %v1490_v6, 3 }
  0x26   : > { %1250 = vpush %v635_v27  ;;  %v1620_v55 = vld [vmem:[%s1579_s14 + $0xc] sm:$0xf]  ;;  %v1623_v56 = vld [vmem:[%s1579_s14 + $0x8] sm:$0xf]  ;;  %v521_v58 = vrot.slane %v1616_v53, 7  ;;  %v768_v61 = vrot.slane %v1458_v1, 4 }
  0x27   : > { %1252 = vpush %v666_v29  ;;  %v1628_v59 = vld [vmem:[%s1587_s18 + $0x8] sm:$0xf]  ;;  %v503_v60 = vld [vmem:[%s1594_s22 + $0x2] sm:$0x1]  ;;  %v1637_v62 = vsel %vm532_vm0, %v501_v50, %v520_v52  ;;  %v1641_v0 = vld [vmem:[%s1587_s18 + $0xc] sm:$0xf] }
  0x28   : > { %1254 = vpush %v667_v30  ;;  %579 = vrot.lane.b32.xlu1 %v1570_v40, %s1389_s11  ;;  %v522_v63 = vrot.slane %v1628_v59, 7  ;;  %v504_v7 = vld [vmem:[%s1594_s22 + $0x3] sm:$0x1]  ;;  %v769_v8 = vrot.slane %v1464_v2, 4  ;;  %v1646_v9 = vsel %vm532_vm0, %v502_v54, %v521_v58  ;;  %v523_v10 = vrot.slane %v1641_v0, 7 }
  0x29   : > { %1256 = vpush %v668_v37  ;;  %577 = vrot.lane.b32.xlu0 %v1573_v41, %s1389_s11  ;;  %v1650_v14 = vld [vmem:[%s1587_s18 + $0x10] sm:$0xf]  ;;  %v505_v15 = vld [vmem:[%s1594_s22 + $0x4] sm:$0x1]  ;;  %v770_v16 = vrot.slane %v1469_v3, 4  ;;  %v771_v24 = vrot.slane %v1474_v4, 4 }
  0x2a   : > { %1258 = vpush %v669_v38  ;;  %v1655_v17 = vsel %vm532_vm0, %v503_v60, %v522_v63  ;;  %v524_v18 = vrot.slane %v1650_v14, 7  ;;  %v1659_v19 = vld [vmem:[%s1587_s18 + $0x14] sm:$0xf]  ;;  %v506_v21 = vld [vmem:[%s1594_s22 + $0x5] sm:$0x1]  ;;  %v1664_v25 = vsel %vm532_vm0, %v504_v7, %v523_v10  ;;  %v772_v29 = vrot.slane %v1483_v5, 4 }
  0x2b   : > { %1260 = vpush %v670_v39  ;;  %v525_v27 = vrot.slane %v1659_v19, 7  ;;  %v1676_v33 = vld [vmem:[%s1579_s14 + $0x14] sm:$0xf]  ;;  %v1679_v34 = vld [vmem:[%s1579_s14 + $0x10] sm:$0xf]  ;;  %v773_v35 = vrot.slane %v1490_v6, 4 }
  0x2c   : > { %1262 = vpush %v671_v42  ;;  %710 = vrot.lane.b32.xlu1 %v1602_v45, %s1389_s11  ;;  %v1673_v30 = vsel %vm532_vm0, %v505_v15, %v524_v18  ;;  %v804_v37 = vrot.slane %v1458_v1, 5  ;;  %v805_v38 = vrot.slane %v1464_v2, 5  ;;  %v806_v39 = vrot.slane %v1469_v3, 5  ;;  %v471_v10 = vld [vmem:[%s2005_s6 + $0x38] sm:$0x1] }
  0x2d   : > { %1264 = vpush %v732_v43  ;;  %708 = vrot.lane.b32.xlu0 %v1607_v48, %s1389_s11  ;;  %v1683_v36 = vsel %vm532_vm0, %v506_v21, %v525_v27  ;;  %v807_v42 = vrot.slane %v1474_v4, 5  ;;  %v808_v43 = vrot.slane %v1483_v5, 5  ;;  %v866_v50 = vrot.slane %v1469_v3, 6  ;;  %v1222_v15 = vld [vmem:[%s2011_s7 + $0x4] ss:$0 sm:$0xff] }
  0x2e   : > { %1266 = vpush %v733_v44  ;;  %v809_v44 = vrot.slane %v1490_v6, 5  ;;  %v868_v52 = vrot.slane %v1483_v5, 6  ;;  %v869_v54 = vrot.slane %v1490_v6, 6  ;;  %v901_v58 = vrot.slane %v1464_v2, 7  ;;  %v473_v18 = vld [vmem:[%s2005_s6 + $0x48] sm:$0x1] }
  0x2f   : > { %1268 = vpush %v734_v46  ;;  %v864_v46 = vrot.slane %v1458_v1, 6  ;;  %v902_v60 = vrot.slane %v1469_v3, 7  ;;  %v904_v63 = vrot.slane %v1483_v5, 7  ;;  %v905_v7 = vrot.slane %v1490_v6, 7  ;;  %v1220_v3 = vld [vmem:[%s2011_s7 + $0x2] ss:$0 sm:$0xff] }
  0x30   : > { %1270 = vpush %v735_v47  ;;  %714 = vrot.lane.b32.xlu1 %v1620_v55, %s1389_s11  ;;  %v865_v47 = vrot.slane %v1464_v2, 6  ;;  %v903_v2 = vrot.slane %v1474_v4, 7  ;;  %v467_v5 = vld [vmem:[%s2005_s6 + $0x18] sm:$0x1]  ;;  %v469_v6 = vld [vmem:[%s2005_s6 + $0x28] sm:$0x1] }
  0x31   : > { %1272 = vpush %v736_v51  ;;  %712 = vrot.lane.b32.xlu0 %v1623_v56, %s1389_s11  ;;  %v867_v51 = vrot.slane %v1474_v4, 6  ;;  %v465_v4 = vld [vmem:[%s2005_s6 + $0x8] sm:$0x1]  ;;  %v475_v21 = vld [vmem:[%s2005_s6 + $0x58] sm:$0x1] }
  0x32   : > { %1274 = vpush %v737_v57  ;;  %v900_v57 = vrot.slane %v1458_v1, 7  ;;  %v1218_v1 = vld [vmem:[%s2011_s7] ss:$0 sm:$0xff] }
  0x33   : > { %1276 = vpush %v768_v61  ;;  %v1219_v61 = vld [vmem:[%s2011_s7 + $0x1] ss:$0 sm:$0xff] }
  0x34   : > { %1278 = vpush %v769_v8  ;;  %718 = vrot.lane.b32.xlu1 %v1676_v33, %s1389_s11  ;;  %v1221_v8 = vld [vmem:[%s2011_s7 + $0x3] ss:$0 sm:$0xff] }
  0x35   : > { %1280 = vpush %v770_v16  ;;  %716 = vrot.lane.b32.xlu0 %v1679_v34, %s1389_s11  ;;  %v1223_v16 = vld [vmem:[%s2011_s7 + $0x5] ss:$0 sm:$0xff] }
  0x36   : > { %1282 = vpush %v771_v24 }
  0x37   : > { %1284 = vpush %v772_v29 }
  0x38   : > { %1286 = vpush %v773_v35  ;;  %842 = vrot.lane.b32.xlu1 %v1528_v20, %s1389_s11 }
  0x39   : > { %1288 = vpush %v804_v37  ;;  %840 = vrot.lane.b32.xlu0 %v1514_v12, %s1389_s11 }
  0x3a   : > { %1290 = vpush %v805_v38 }
  0x3b   : > { %1292 = vpush %v806_v39 }
  0x3c   : > { %1294 = vpush %v807_v42  ;;  %846 = vrot.lane.b32.xlu1 %v1517_v13, %s1389_s11 }
  0x3d   : > { %1296 = vpush %v808_v43  ;;  %844 = vrot.lane.b32.xlu0 %v1511_v11, %s1389_s11 }
  0x3e   : > { %1298 = vpush %v809_v44 }
  0x3f   : > { %1300 = vpush %v864_v46 }
  0x40   : > { %1302 = vpush %v865_v47  ;;  %850 = vrot.lane.b32.xlu1 %v1540_v26, %s1389_s11 }
  0x41   : > { %1304 = vpush %v866_v50  ;;  %848 = vrot.lane.b32.xlu0 %v1548_v28, %s1389_s11 }
  0x42   : > { %1306 = vpush %v867_v51 }
  0x43   : > { %1308 = vpush %v868_v52 }
  0x44   : > { %1310 = vpush %v869_v54  ;;  %1013 = vperm.xlu1 %1363, %v1219_v61  }
  0x45   : > { %1312 = vpush %v900_v57  ;;  %1009 = vperm.xlu0 %1362, %v1218_v1  }
  0x46   : > { %1314 = vpush %v901_v58 }
  0x47   : > { %1316 = vpush %v902_v60 }
  0x48   : > { %1318 = vpush %v903_v2  ;;  %1017 = vperm.xlu1 %1363, %v1220_v3  }
  0x49   : > { %1320 = vpush %v904_v63  ;;  %1021 = vperm.xlu0 %1362, %v1221_v8  }
  0x4a   : > { %1322 = vpush %v905_v7 }
  0x4b   : > { %1324 = vpush %v465_v4 }
  0x4c   : > { %1326 = vpush %v467_v5  ;;  %1025 = vperm.xlu1 %1363, %v1222_v15   ;;  %s1755_s9 = spop %1228 }
  0x4d   : > { %1328 = vpush %v469_v6  ;;  %1029 = vperm.xlu0 %1362, %v1223_v16   ;;  %s1757_s10 = spop %1230  ;;  %v596_v37 = vstv %s1755_s9 }
  0x4e   : > { %1330 = vpush %v471_v10  ;;  %s1759_s11 = spop %1232  ;;  %v600_v38 = vstv %s1757_s10 }
  0x4f   : > { %1332 = vpush %v473_v18  ;;  %s1761_s12 = spop %1234  ;;  %v604_v39 = vstv %s1759_s11 }
  0x50   : > { %1334 = vpush %v475_v21  ;;  %s1763_s13 = spop %1236  ;;  %v608_v42 = vstv %s1761_s12 }
  0x51   : > { %s1765_s14 = spop %1238  ;;  %v612_v43 = vstv %s1763_s13 }
  0x52   : > { %s1767_s15 = spop %1240  ;;  %v616_v44 = vstv %s1765_s14 }
  0x53   : > { %s1769_s16 = spop %1242  ;;  %v637_v24 = vstv %s1767_s15 }
  0x54   : > { %s1771_s18 = spop %1244  ;;  %v640_v27 = vstv %s1769_s16  ;;  %v654_v46 = vmul.f32 %v637_v24, %v1637_v62  ;;  %s1859_s16 = scalar_lea.vmem %s1982_s0, %s1477_s17 }
  0x55   : > { %s1773_s19 = spop %1246  ;;  %v643_v29 = vstv %s1771_s18  ;;  %v655_v47 = vmul.f32 %v640_v27, %v1646_v9 }
  0x56   : > { %s1775_s21 = spop %1248  ;;  %v646_v35 = vstv %s1773_s19  ;;  %v656_v50 = vmul.f32 %v643_v29, %v1655_v17 }
  0x57   : > { %s1777_s22 = spop %1250  ;;  %v657_v51 = vmul.f32 %v646_v35, %v1664_v25  ;;  %v649_v60 = vstv %s1775_s21  ;;  %v476_v35 = vld [vmem:[%s1859_s16] sm:$0xf] }
  0x58   : > { %s1779_s27 = spop %1252  ;;  %v652_v61 = vstv %s1777_s22  ;;  %v658_v4 = vmul.f32 %v649_v60, %v1673_v30  ;;  %v478_v60 = vld [vmem:[%s1859_s16 + $0x8] sm:$0xf] }
  0x59   : > { %s1781_s20 = spop %1254  ;;  %v673_v52 = vstv %s1779_s27  ;;  %v659_v5 = vmul.f32 %v652_v61, %v1683_v36  ;;  %v479_v61 = vld [vmem:[%s1859_s16 + $0xc] sm:$0xf] }
  0x5a   : > { %s1783_s23 = spop %1256  ;;  %v676_v1 = vstv %s1781_s20  ;;  %v690_v3 = vmul.f32 %v673_v52, %v1535_v23 }
  0x5b   : > { %s1785_s24 = spop %1258  ;;  %v679_v54 = vstv %s1783_s23  ;;  %v691_v6 = vmul.f32 %v676_v1, %v1556_v32 }
  0x5c   : > { %s1787_s25 = spop %1260  ;;  %v682_v2 = vstv %s1785_s24  ;;  %v692_v8 = vmul.f32 %v679_v54, %v1532_v22 }
  0x5d   : > { %s1789_s26 = spop %1262  ;;  %v685_v63 = vstv %s1787_s25  ;;  %v693_v10 = vmul.f32 %v682_v2, %v1553_v31 }
  0x5e   : > { %s1791_s1 = spop %1264  ;;  %v688_v7 = vstv %s1789_s26  ;;  %v694_v32 = vmul.f32 %v685_v63, %v1573_v41 }
  0x5f   : > { %s1793_s2 = spop %1266  ;;  %v695_v31 = vmul.f32 %v688_v7, %v1570_v40  ;;  %v739_v18 = vstv %s1791_s1 }
  0x60   : > { %s1795_s3 = spop %1268  ;;  %v742_v21 = vstv %s1793_s2 }
  0x61   : > { %s1797_s4 = spop %1270  ;;  %v745_v40 = vstv %s1795_s3 }
  0x62   : > { %2012 = sst [smem:[#allocation5_spill]] %s1797_s4  ;;  %s1799_s5 = spop %1272 }
  0x63   : > { %2013 = sst [smem:[#allocation6_spill]] %s1799_s5  ;;  %s1801_s6 = spop %1274 }
  0x64   : > { %s1803_s7 = spop %1276  ;;  %s2015_s19 = sld [smem:[#allocation5_spill]] }
  0x65   : > { %s1805_s30 = spop %1278  ;;  %s2016_s22 = sld [smem:[#allocation6_spill]] }
  0x66   : > { %s1807_s28 = spop %1280 }
  0x67   : > { %s1809_s29 = spop %1282 }
  0x68   : > { %s1811_s8 = spop %1284 }
  0x69   : > { %2014 = sst [smem:[#allocation7_spill]] %s1811_s8  ;;  %s1813_s4 = spop %1286 }
  0x6a   : > { %s1817_s5 = spop %1288 }
  0x6b   : > { %s1825_s8 = spop %1290 }
  0x6c   : > { %s1831_s15 = spop %1292 }
  0x6d   : > { %s1841_s9 = spop %1294 }
  0x6e   : > { %s1847_s10 = spop %1296 }
  0x6f   : > { %s1861_s18 = spop %1298 }
  0x70   : > { %s1869_s21 = spop %1300 }
  0x71   : > { %s1879_s1 = spop %1302 }
  0x72   : > { %s1885_s2 = spop %1304 }
  0x92   : > { %v574_v57 = vpop.permute.xlu1 %573 }
  0x93   : > { %v570_v58 = vpop.permute.xlu0 %569  ;;  %v590_v62 = vsel %vm587_vm1, 0.0, %v574_v57 }
  0x94   : > { %v588_v9 = vsel %vm587_vm1, 0.0, %v570_v58  ;;  %v620_v17 = vmul.f32 %v604_v39, %v590_v62  ;;  %v748_v39 = vstv %s2015_s19  ;;  %v751_v62 = vstv %s2016_s22 }
  0x95   : > { %v618_v25 = vmul.f32 %v596_v37, %v588_v9  ;;  %v477_v37 = vld [vmem:[%s1859_s16 + $0x4] sm:$0xf]  ;;  %v754_v9 = vstv %s1801_s6 }
  0x96   : > { %v662_v23 = vadd.f32 %v656_v50, %v620_v17  ;;  %v576_v15 = vpop.permute.xlu1 %575  ;;  %v778_v50 = vstv %s1805_s30 }
  0x97   : > { %v660_v22 = vadd.f32 %v654_v46, %v618_v25  ;;  %v572_v30 = vpop.permute.xlu0 %571  ;;  %v591_v36 = vsel %vm587_vm1, 0.0, %v576_v15  ;;  %v775_v46 = vstv %s1803_s7  ;;  %s2017_s7 = sld [smem:[#allocation7_spill]]  ;;  %v793_v25 = vmul.f32 %v778_v50, %v477_v37  ;;  %v481_v37 = vld [vmem:[%s1859_s16 + $0x14] sm:$0xf] }
  0x98   : > { %v589_v16 = vsel %vm587_vm1, 0.0, %v572_v30  ;;  %v1871_v27 = vadd.f32 %v692_v8, %v662_v23  ;;  %v621_v29 = vmul.f32 %v608_v42, %v591_v36  ;;  %v781_v42 = vstv %s1807_s28  ;;  %s1895_s28 = spop %1306 }
  0x99   : > { %v696_v24 = vadd.f32 %v690_v3, %v660_v22  ;;  %v619_v41 = vmul.f32 %v600_v38, %v589_v16  ;;  %v784_v38 = vstv %s1809_s29  ;;  %v792_v17 = vmul.f32 %v775_v46, %v476_v35  ;;  %s1899_s29 = spop %1308  ;;  %v480_v35 = vld [vmem:[%s1859_s16 + $0x10] sm:$0xf] }
  0x9a   : > { %v663_v52 = vadd.f32 %v657_v51, %v621_v29  ;;  %v580_v57 = vpop.permute.xlu1 %579  ;;  %v794_v3 = vmul.f32 %v781_v42, %v478_v60  ;;  %v795_v8 = vmul.f32 %v784_v38, %v479_v61  ;;  %v790_v16 = vstv %s1813_s4 }
  0x9b   : > { %v661_v54 = vadd.f32 %v655_v47, %v619_v41  ;;  %v578_v58 = vpop.permute.xlu0 %577  ;;  %v593_v1 = vsel %vm587_vm1, 0.0, %v580_v57  ;;  %v826_v61 = vstv %s1861_s18 }
  0x9c   : > { %v592_v2 = vsel %vm587_vm1, 0.0, %v578_v58  ;;  %v699_v63 = vadd.f32 %v693_v10, %v663_v52  ;;  %v623_v51 = vmul.f32 %v616_v44, %v593_v1  ;;  %v811_v10 = vstv %s1817_s5  ;;  %s1907_s5 = spop %1310 }
  0x9d   : > { %v622_v47 = vmul.f32 %v612_v43, %v592_v2  ;;  %v697_v7 = vadd.f32 %v691_v6, %v661_v54  ;;  %v814_v44 = vstv %s1825_s8  ;;  %v787_v36 = vstv %s2017_s7  ;;  %s1915_s4 = spop %1312 }
  0x9e   : > { %v665_v23 = vadd.f32 %v659_v5, %v623_v51  ;;  %v711_v15 = vpop.permute.xlu1 %710  ;;  %v828_v46 = vmul.f32 %v811_v10, %v1607_v48  ;;  %v829_v50 = vmul.f32 %v814_v44, %v1602_v45  ;;  %v817_v52 = vstv %s1831_s15  ;;  %s1921_s8 = spop %1314 }
  0x9f   : > { %v664_v22 = vadd.f32 %v658_v4, %v622_v47  ;;  %v709_v30 = vpop.permute.xlu0 %708  ;;  %v727_v43 = vsel %vm587_vm1, 0.0, %v711_v15  ;;  %v820_v54 = vstv %s1841_s9  ;;  %s1928_s3 = spop %1316  ;;  %v910_v15 = vstv %s1921_s8  ;;  %s2018_s9 = sld [smem:[#allocation15_spill]] }
  0xa0   : > { %v726_v6 = vsel %vm587_vm1, 0.0, %v709_v30  ;;  %v701_v5 = vadd.f32 %v695_v31, %v665_v23  ;;  %v757_v41 = vmul.f32 %v742_v21, %v727_v43  ;;  %v796_v31 = vmul.f32 %v787_v36, %v480_v35  ;;  %s1319_s30 = spop %1318 }
  0xa1   : > { %v700_v29 = vadd.f32 %v694_v32, %v664_v22  ;;  %v756_v4 = vmul.f32 %v739_v18, %v726_v6  ;;  %v823_v32 = vstv %s1847_s10  ;;  %v797_v18 = vmul.f32 %v790_v16, %v481_v37  ;;  %s1321_s6 = spop %1320 }
  0xa2   : > { %v763_v57 = vadd.f32 %v757_v41, %v697_v7  ;;  %v715_v60 = vpop.permute.xlu1 %714  ;;  %v831_v51 = vmul.f32 %v820_v54, %v1620_v55  ;;  %v832_v47 = vmul.f32 %v823_v32, %v1679_v34  ;;  %v833_v7 = vmul.f32 %v826_v61, %v1676_v33  ;;  %s1323_s13 = spop %1322 }
  0xa3   : > { %v762_v58 = vadd.f32 %v756_v4, %v696_v24  ;;  %v713_v42 = vpop.permute.xlu0 %712  ;;  %v729_v21 = vsel %vm587_vm1, 0.0, %v715_v60  ;;  %v830_v24 = vmul.f32 %v817_v52, %v1623_v56  ;;  %v907_v34 = vstv %s1915_s4  ;;  %s1325_s14 = spop %1324 }
  0xa4   : > { %v728_v38 = vsel %vm587_vm1, 0.0, %v713_v42  ;;  %v799_v1 = vadd.f32 %v793_v25, %v763_v57  ;;  %v759_v45 = vmul.f32 %v748_v39, %v729_v21  ;;  %v913_v43 = vstv %s1928_s3  ;;  %s1327_s27 = spop %1326 }
  0xa5   : > { %v798_v48 = vadd.f32 %v792_v17, %v762_v58  ;;  %v758_v2 = vmul.f32 %v745_v40, %v728_v38  ;;  %v916_v6 = vstv %s1319_s30  ;;  %v877_v57 = vstv %s1885_s2  ;;  %s1329_s20 = spop %1328  ;;  %s463_s10 = scalar_lea.vmem %s2018_s9, %s1477_s17 }
  0xa6   : > { %v835_v17 = vadd.f32 %v829_v50, %v799_v1  ;;  %v765_v39 = vadd.f32 %v759_v45, %v699_v63  ;;  %v719_v25 = vpop.permute.xlu1 %718  ;;  %v871_v63 = vstv %s1869_s21  ;;  %v880_v58 = vstv %s1895_s28  ;;  %s1331_s23 = spop %1330 }
  0xa7   : > { %v834_v23 = vadd.f32 %v828_v46, %v798_v48  ;;  %v764_v40 = vadd.f32 %v758_v2, %v1871_v27  ;;  %v717_v22 = vpop.permute.xlu0 %716  ;;  %v731_v55 = vsel %vm587_vm1, 0.0, %v719_v25  ;;  %v874_v27 = vstv %s1879_s1  ;;  %s1333_s24 = spop %1332 }
  0xa8   : > { %v730_v56 = vsel %vm587_vm1, 0.0, %v717_v22  ;;  %v801_v33 = vadd.f32 %v795_v8, %v765_v39  ;;  %v761_v10 = vmul.f32 %v754_v9, %v731_v55  ;;  %v924_v9 = vmul.f32 %v907_v34, %v1610_v49  ;;  %s1335_s25 = spop %1334 }
  0xa9   : > { %v800_v30 = vadd.f32 %v794_v3, %v764_v40  ;;  %v760_v44 = vmul.f32 %v751_v62, %v730_v56  ;;  %v925_v62 = vmul.f32 %v910_v15, %v1616_v53  ;;  %v886_v2 = vstv %s1907_s5 }
  0xaa   : > { %v837_v16 = vadd.f32 %v831_v51, %v801_v33  ;;  %v767_v41 = vadd.f32 %v761_v10, %v701_v5  ;;  %v843_v35 = vpop.permute.xlu1 %842  ;;  %v926_v5 = vmul.f32 %v913_v43, %v1628_v59  ;;  %v942_v33 = vstv %s1327_s27 }
  0xab   : > { %v836_v36 = vadd.f32 %v830_v24, %v800_v30  ;;  %v766_v4 = vadd.f32 %v760_v44, %v700_v29  ;;  %v841_v37 = vpop.permute.xlu0 %840  ;;  %v859_v3 = vsel %vm587_vm1, 0.0, %v843_v35  ;;  %v927_v29 = vmul.f32 %v916_v6, %v1641_v0 }
  0xac   : > { %v858_v8 = vsel %vm587_vm1, 0.0, %v841_v37  ;;  %v803_v50 = vadd.f32 %v797_v18, %v767_v41  ;;  %v889_v52 = vmul.f32 %v874_v27, %v859_v3  ;;  %v922_v18 = vstv %s1323_s13 }
  0xad   : > { %v802_v46 = vadd.f32 %v796_v31, %v766_v4  ;;  %v888_v54 = vmul.f32 %v871_v63, %v858_v8  ;;  %v919_v31 = vstv %s1321_s6  ;;  %v883_v0 = vstv %s1899_s29 }
  0xae   : > { %v839_v42 = vadd.f32 %v833_v7, %v803_v50  ;;  %v895_v32 = vadd.f32 %v889_v52, %v835_v17  ;;  %v847_v49 = vpop.permute.xlu1 %846  ;;  %v929_v17 = vmul.f32 %v922_v18, %v1659_v19  ;;  %v938_v30 = vstv %s1325_s14 }
  0xaf   : > { %v838_v60 = vadd.f32 %v832_v47, %v802_v46  ;;  %v894_v61 = vadd.f32 %v888_v54, %v834_v23  ;;  %v845_v53 = vpop.permute.xlu0 %844  ;;  %v861_v21 = vsel %vm587_vm1, 0.0, %v847_v49  ;;  %v928_v23 = vmul.f32 %v919_v31, %v1650_v14 }
  0xb0   : > { %v860_v38 = vsel %vm587_vm1, 0.0, %v845_v53  ;;  %v931_v1 = vadd.f32 %v925_v62, %v895_v32  ;;  %v891_v59 = vmul.f32 %v880_v58, %v861_v21  ;;  %v960_v19 = vmul.f32 %v938_v30, %v1514_v12 }
  0xb1   : > { %v930_v48 = vadd.f32 %v924_v9, %v894_v61  ;;  %v890_v45 = vmul.f32 %v877_v57, %v860_v38  ;;  %v961_v44 = vmul.f32 %v942_v33, %v1528_v20  ;;  %v946_v63 = vstv %s1329_s20 }
  0xb2   : > { %v897_v24 = vadd.f32 %v891_v59, %v837_v16  ;;  %v851_v47 = vpop.permute.xlu1 %850  ;;  %v950_v27 = vstv %s1331_s23  ;;  %v962_v43 = vmul.f32 %v946_v63, %v1511_v11  ;;  %v954_v41 = vstv %s1333_s24 }
  0xb3   : > { %v896_v51 = vadd.f32 %v890_v45, %v836_v36  ;;  %v849_v7 = vpop.permute.xlu0 %848  ;;  %v863_v39 = vsel %vm587_vm1, 0.0, %v851_v47  ;;  %v963_v6 = vmul.f32 %v950_v27, %v1517_v13  ;;  %v967_v36 = vadd.f32 %v961_v44, %v931_v1 }
  0xb4   : > { %v862_v40 = vsel %vm587_vm1, 0.0, %v849_v7  ;;  %v893_v25 = vmul.f32 %v886_v2, %v863_v39  ;;  %v933_v56 = vadd.f32 %v927_v29, %v897_v24  ;;  %v966_v16 = vadd.f32 %v960_v19, %v930_v48 }
  0xb5   : > { %v892_v22 = vmul.f32 %v883_v0, %v862_v40  ;;  %v932_v55 = vadd.f32 %v926_v5, %v896_v51  ;;  %v958_v4 = vstv %s1335_s25  ;;  %v964_v3 = vmul.f32 %v954_v41, %v1548_v28 }
  0xb6   : > { %v899_v34 = vadd.f32 %v893_v25, %v839_v42  ;;  %v965_v8 = vmul.f32 %v958_v4, %v1540_v26  ;;  %v969_v13 = vadd.f32 %v963_v6, %v933_v56 }
  0xb7   : > { %v898_v15 = vadd.f32 %v892_v22, %v838_v60  ;;  %v968_v11 = vadd.f32 %v962_v43, %v932_v55 }
  0xb8   : > { %v935_v14 = vadd.f32 %v929_v17, %v899_v34 }
  0xb9   : > { %v934_v10 = vadd.f32 %v928_v23, %v898_v15 }
  0xba   : > { %v971_v54 = vadd.f32 %v965_v8, %v935_v14 }
  0xbb   : > { %v970_v52 = vadd.f32 %v964_v3, %v934_v10 }
  0xbf   : > { %v1014_v12 = vpop.permute.xlu1 %1013 }
  0xc0   : > { %v1010_v35 = vpop.permute.xlu0 %1009  ;;  %v1033_v20 = vadd.f32 %v1014_v12, %v967_v36 }
  0xc1   : > { %v1032_v37 = vadd.f32 %v1010_v35, %v966_v16 }
  0xc2   : > { %1040 = vst.msk [vmem:[%s463_s10 + $0x4] sm:$0xf] %vm1038_vm2, %v1033_v20 }
  0xc3   : > { %1039 = vst.msk [vmem:[%s463_s10] sm:$0xf] %vm1038_vm2, %v1032_v37  ;;  %v1018_v9 = vpop.permute.xlu1 %1017 }
  0xc4   : > { %v1022_v62 = vpop.permute.xlu0 %1021  ;;  %v1034_v46 = vadd.f32 %v1018_v9, %v968_v11 }
  0xc5   : > { %v1035_v50 = vadd.f32 %v1022_v62, %v969_v13 }
  0xc6   : > { %1041 = vst.msk [vmem:[%s463_s10 + $0x8] sm:$0xf] %vm1038_vm2, %v1034_v46 }
  0xc7   : > { %1042 = vst.msk [vmem:[%s463_s10 + $0xc] sm:$0xf] %vm1038_vm2, %v1035_v50  ;;  %v1026_v57 = vpop.permute.xlu1 %1025 }
  0xc8   : > { %v1030_v28 = vpop.permute.xlu0 %1029  ;;  %v1036_v58 = vadd.f32 %v1026_v57, %v970_v52 }
  0xc9   : > { %v1037_v26 = vadd.f32 %v1030_v28, %v971_v54 }
  0xca   : > { %1043 = vst.msk [vmem:[%s463_s10 + $0x10] sm:$0xf] %vm1038_vm2, %v1036_v58 }
  0xcb   : > { %1044 = vst.msk [vmem:[%s463_s10 + $0x14] sm:$0xf] %vm1038_vm2, %v1037_v26 }
  0xcc PF: > { %s2019_s17 = sld [smem:[#allocation3_spill]] }
  0xcd   : > { %s2020_s27 = sld [smem:[#allocation2_spill]] }
  0xce   : > { %s2021_s28 = sld [smem:[#allocation4_spill]] }
  0xd2   : > { %s18_s29 = sadd.s32 1, %s2019_s17  }
  0xd3   : > { %p15_p5 = scmp.ge.s32.totalorder %s18_s29, 4  }
  0xd5   :  { %17 = sbr.rel (!%p15_p5) target bundleno = 9 (0x9), region = 99 }

// kernel: lightfuse_forward.5
= control target key start
LH: loop header
LB: loop body
LE: loop exit
PB: predicated region body
PF: predicated region fallthrough
CT: control target
= control target key end

     0   :  { %s1435_s27 = smov 0   ;;  %s1437_s28 = smov 0   ;;  %s1974_s0 = inlined_call_operand.vmem [shape: f32[2,6,8,8], index: 0, kind: input, shape index: {}]   ;;  %s1975_s1 = inlined_call_operand.vmem [shape: f32[2,6,8,8], index: 1, kind: input, shape index: {}]   ;;  %s1976_s2 = inlined_call_operand.vmem [shape: f32[2,6,8,8], index: 2, kind: input, shape index: {}]   ;;  %s1977_s3 = inlined_call_operand.vmem [shape: f32[2,6,8,8], index: 3, kind: input, shape index: {}]   ;;  %s1978_s4 = inlined_call_operand.vmem [shape: f32[2,6,1,8], index: 4, kind: input, shape index: {}, may-alias: {4,5}]   ;;  %s1979_s5 = inlined_call_operand.vmem [shape: f32[2,6,1,8], index: 5, kind: input, shape index: {}, may-alias: {4,5}]   ;;  %s1980_s6 = inlined_call_operand.vmem [shape: f32[6,9,1], index: 6, kind: input, shape index: {}]   ;;  %s1981_s7 = inlined_call_operand.vmem [shape: f32[6,1,1], index: 7, kind: input, shape index: {}]   ;;  %s1982_s8 = inlined_call_operand.vmem [shape: f32[2,6,8,8], index: 8, kind: output, shape index: {}]  }
   0x1   :  { %1986 = sst [smem:[#allocation8_spill]] %s1975_s1  ;;  %s1439_s29 = smov 0  }
   0x2   :  { %1987 = sst [smem:[#allocation9_spill]] %s1976_s2 }
   0x3   :  { %1988 = sst [smem:[#allocation10_spill]] %s1977_s3 }
   0x4   :  { %1989 = sst [smem:[#allocation11_spill]] %s1978_s4 }
   0x5   :  { %1990 = sst [smem:[#allocation12_spill]] %s1979_s5 }
   0x6   :  { %1991 = sst [smem:[#allocation13_spill]] %s1980_s6 }
   0x7   :  { %1992 = sst [smem:[#allocation14_spill]] %s1981_s7 }
   0x8   :  { %1993 = sst [smem:[#allocation15_spill]] %s1982_s8 }
   0x9 LB: > { %1994 = sst [smem:[#allocation2_spill]] %s1382_s28  ;;  %s30_s30 = sadd.s32 1, %s1382_s28  ;;  %s1386_s29 = sphi %s1439_s29, %s18_s29   ;;  %s1382_s28 = sphi %s1437_s28, %s2013_s28   ;;  %s1378_s27 = sphi %s1435_s27, %s2012_s27  }
   0xa   : > { %1995 = sst [smem:[#allocation3_spill]] %s1386_s29  ;;  %p1212_p0 = scmp.ge.s32.totalorder %s1386_s29, 1 }
   0xb   : > { %p32_p1 = scmp.ge.s32.totalorder %s30_s30, 2  ;;  %p344_p2 = scmp.lt.s32.totalorder %s1386_s29, 3 }
   0xd   : > { %s2015_s30 = smov (%p32_p1, %s30_s30), 0  ;;  %p345_p3 = pnand %p1212_p0, %p344_p2 }
   0xe   : > { %1996 = sst [smem:[#allocation4_spill]] %s2015_s30 }
   0xf   : > { %348 = sbr.rel (%p345_p3) target bundleno = 204 (0xcc), region = 52 }
  0x14   : > { %p416_p4 = scmp.lt.s32.totalorder %s1378_s27, 1  ;;  %v1388_v0 = vmov 0   ;;  %s1997_s6 = sld [smem:[#allocation13_spill]]  ;;  %vm532_vm0 = vcmask 1040384   ;;  %vm587_vm1 = vcmask 7168   ;;  %vm1038_vm2 = vcmask 64512  }
  0x15   : > { %1363 = vset.pattern.permute.xlu1 %v1388_v0  ;;  %1362 = vset.pattern.permute.xlu0 %v1388_v0  ;;  %s1998_s3 = sld [smem:[#allocation10_spill]]  ;;  %s1389_s11 = smov 1  }
  0x16   : > { %s2017_s27 = smov (!%p416_p4, %s1378_s27), 1  ;;  %s1999_s5 = sld [smem:[#allocation12_spill]] }
  0x17   : > { %s1472_s15 = smul.u32 48, %s2017_s27  ;;  %s2000_s1 = sld [smem:[#allocation8_spill]] }
  0x18   : > { %s1227_s20 = smul.u32 6, %s2017_s27  ;;  %s2001_s2 = sld [smem:[#allocation9_spill]] }
  0x19   : > { %s2002_s4 = sld [smem:[#allocation11_spill]] }
  0x1a   : > { %v1458_v1 = vld [vmem:[%s1997_s6] sm:$0xff]  ;;  %v1464_v2 = vld [vmem:[%s1997_s6 + $0x10] sm:$0xff]  ;;  %s2003_s7 = sld [smem:[#allocation14_spill]] }
  0x1b   : > { %1228 = vpush %v1458_v1  ;;  %v1469_v3 = vld [vmem:[%s1997_s6 + $0x30] sm:$0xff]  ;;  %v1478_v4 = vld [vmem:[%s1997_s6 + $0x20] sm:$0xff]  ;;  %v630_v7 = vrot.slane %v1458_v1, 1  ;;  %s447_s25 = scalar_lea.vmem %s1998_s3, %s1472_s15  ;;  %v631_v8 = vrot.slane %v1464_v2, 1  ;;  %v666_v29 = vrot.slane %v1458_v1, 2  ;;  %v667_v30 = vrot.slane %v1464_v2, 2 }
  0x1c   : > { %1230 = vpush %v1464_v2  ;;  %v1483_v5 = vld [vmem:[%s1997_s6 + $0x40] sm:$0xff]  ;;  %v1490_v6 = vld [vmem:[%s1997_s6 + $0x50] sm:$0xff]  ;;  %s1504_s10 = scalar_lea.vmem %s1999_s5, %s1227_s20  ;;  %v1510_v11 = vld [vmem:[%s447_s25 + $0x18] sm:$0xff]  ;;  %v632_v12 = vrot.slane %v1478_v4, 1  ;;  %v633_v13 = vrot.slane %v1469_v3, 1  ;;  %v668_v37 = vrot.slane %v1478_v4, 2 }
  0x1d   : > { %1232 = vpush %v1478_v4  ;;  %v1506_v9 = vld [vmem:[%s447_s25 + $0x10] sm:$0xff]  ;;  %v1508_v10 = vld [vmem:[%s447_s25] sm:$0xff]  ;;  %v634_v14 = vrot.slane %v1483_v5, 1  ;;  %v548_v20 = vrot.slane %v1510_v11, 7  ;;  %v1523_v21 = vld [vmem:[%s447_s25 + $0x8] sm:$0xff]  ;;  %v635_v28 = vrot.slane %v1490_v6, 1  ;;  %s1559_s14 = scalar_lea.vmem %s2000_s1, %s1472_s15 }
  0x1e   : > { %1234 = vpush %v1469_v3  ;;  %v510_v15 = vld [vmem:[%s1504_s10 + $0x2] sm:$0x1]  ;;  %v547_v16 = vrot.slane %v1506_v9, 7  ;;  %v508_v17 = vld [vmem:[%s1504_s10] sm:$0x1]  ;;  %v545_v18 = vrot.slane %v1508_v10, 7  ;;  %s1571_s18 = scalar_lea.vmem %s2001_s2, %s1472_s15 }
  0x1f   : > { %1236 = vpush %v1483_v5  ;;  %v511_v19 = vld [vmem:[%s1504_s10 + $0x3] sm:$0x1]  ;;  %v509_v22 = vld [vmem:[%s1504_s10 + $0x1] sm:$0x1]  ;;  %v546_v25 = vrot.slane %v1523_v21, 7  ;;  %v1533_v26 = vld [vmem:[%s447_s25 + $0x28] sm:$0xff]  ;;  %s1578_s22 = scalar_lea.vmem %s2002_s4, %s1227_s20 }
  0x20   : > { %1238 = vpush %v1490_v6  ;;  %v1527_v23 = vsel %vm532_vm0, %v510_v15, %v547_v16  ;;  %v1530_v24 = vsel %vm532_vm0, %v508_v17, %v545_v18  ;;  %v1535_v27 = vld [vmem:[%s447_s25 + $0x20] sm:$0xff]  ;;  %v1545_v31 = vsel %vm532_vm0, %v511_v19, %v548_v20  ;;  %v550_v33 = vrot.slane %v1533_v26, 7  ;;  %v1589_v44 = vld [vmem:[%s1559_s14 + $0x8] sm:$0xff]  ;;  %v1612_v55 = vld [vmem:[%s1571_s18 + $0x10] sm:$0xff] }
  0x21   : > { %1240 = vpush %v630_v7  ;;  %573 = vrot.lane.b32.xlu1 %v1527_v23, %s1389_s11  ;;  %569 = vrot.lane.b32.xlu0 %v1530_v24, %s1389_s11  ;;  %v1548_v32 = vsel %vm532_vm0, %v509_v22, %v546_v25  ;;  %v549_v34 = vrot.slane %v1535_v27, 7  ;;  %v513_v35 = vld [vmem:[%s1504_s10 + $0x5] sm:$0x1]  ;;  %v512_v36 = vld [vmem:[%s1504_s10 + $0x4] sm:$0x1]  ;;  %v669_v38 = vrot.slane %v1469_v3, 2 }
  0x22   : > { %1242 = vpush %v631_v8  ;;  %v670_v39 = vrot.slane %v1483_v5, 2  ;;  %v1581_v40 = vsel %vm532_vm0, %v513_v35, %v550_v33  ;;  %v671_v42 = vrot.slane %v1490_v6, 2  ;;  %v732_v43 = vrot.slane %v1458_v1, 3  ;;  %v1592_v45 = vld [vmem:[%s1559_s14] sm:$0xff]  ;;  %v1601_v50 = vld [vmem:[%s1571_s18 + $0x8] sm:$0xff]  ;;  %v1617_v58 = vld [vmem:[%s1571_s18 + $0x18] sm:$0xff] }
  0x23   : > { %1244 = vpush %v632_v12  ;;  %v1584_v41 = vsel %vm532_vm0, %v512_v36, %v549_v34  ;;  %v733_v46 = vrot.slane %v1464_v2, 3  ;;  %v734_v47 = vrot.slane %v1478_v4, 3  ;;  %v1597_v48 = vld [vmem:[%s1571_s18] sm:$0xff]  ;;  %v735_v51 = vrot.slane %v1469_v3, 3  ;;  %v1633_v8 = vld [vmem:[%s1571_s18 + $0x28] sm:$0xff]  ;;  %v1651_v19 = vld [vmem:[%s1559_s14 + $0x18] sm:$0xff] }
  0x24   : > { %1246 = vpush %v633_v13  ;;  %v501_v49 = vld [vmem:[%s1578_s22] sm:$0x1]  ;;  %v520_v52 = vrot.slane %v1597_v48, 7  ;;  %v502_v53 = vld [vmem:[%s1578_s22 + $0x1] sm:$0x1]  ;;  %v521_v54 = vrot.slane %v1601_v50, 7 }
  0x25   : > { %1248 = vpush %v634_v14  ;;  %575 = vrot.lane.b32.xlu1 %v1545_v31, %s1389_s11  ;;  %571 = vrot.lane.b32.xlu0 %v1548_v32, %s1389_s11  ;;  %v503_v56 = vld [vmem:[%s1578_s22 + $0x2] sm:$0x1]  ;;  %v522_v57 = vrot.slane %v1612_v55, 7  ;;  %v504_v59 = vld [vmem:[%s1578_s22 + $0x3] sm:$0x1]  ;;  %v736_v60 = vrot.slane %v1483_v5, 3 }
  0x26   : > { %1250 = vpush %v635_v28  ;;  %v1622_v61 = vsel %vm532_vm0, %v501_v49, %v520_v52  ;;  %v1625_v62 = vsel %vm532_vm0, %v502_v53, %v521_v54  ;;  %v523_v63 = vrot.slane %v1617_v58, 7  ;;  %v1629_v0 = vld [vmem:[%s1571_s18 + $0x20] sm:$0xff]  ;;  %v737_v12 = vrot.slane %v1490_v6, 3  ;;  %v1654_v20 = vld [vmem:[%s1559_s14 + $0x10] sm:$0xff]  ;;  %v1671_v34 = vld [vmem:[%s1559_s14 + $0x28] sm:$0xff] }
  0x27   : > { %1252 = vpush %v666_v29  ;;  %v505_v7 = vld [vmem:[%s1578_s22 + $0x4] sm:$0x1]  ;;  %v1637_v13 = vsel %vm532_vm0, %v503_v56, %v522_v57  ;;  %v524_v14 = vrot.slane %v1629_v0, 7  ;;  %v506_v15 = vld [vmem:[%s1578_s22 + $0x5] sm:$0x1]  ;;  %v525_v16 = vrot.slane %v1633_v8, 7 }
  0x28   : > { %1254 = vpush %v667_v30  ;;  %v768_v17 = vrot.slane %v1458_v1, 4  ;;  %v1648_v18 = vsel %vm532_vm0, %v504_v59, %v523_v63  ;;  %v769_v22 = vrot.slane %v1464_v2, 4  ;;  %v770_v29 = vrot.slane %v1478_v4, 4  ;;  %v1674_v35 = vld [vmem:[%s1559_s14 + $0x20] sm:$0xff] }
  0x29   : > { %1256 = vpush %v668_v37  ;;  %579 = vrot.lane.b32.xlu1 %v1581_v40, %s1389_s11  ;;  %577 = vrot.lane.b32.xlu0 %v1584_v41, %s1389_s11  ;;  %v1658_v25 = vsel %vm532_vm0, %v505_v7, %v524_v14  ;;  %v1661_v28 = vsel %vm532_vm0, %v506_v15, %v525_v16  ;;  %v771_v30 = vrot.slane %v1469_v3, 4  ;;  %v772_v33 = vrot.slane %v1483_v5, 4  ;;  %v471_v14 = vld [vmem:[%s1997_s6 + $0x38] sm:$0x1]  ;;  %v1222_v15 = vld [vmem:[%s2003_s7 + $0x4] ss:$0 sm:$0xff] }
  0x2a   : > { %1258 = vpush %v669_v38  ;;  %v773_v36 = vrot.slane %v1490_v6, 4  ;;  %v804_v37 = vrot.slane %v1458_v1, 5  ;;  %v805_v38 = vrot.slane %v1464_v2, 5  ;;  %v865_v49 = vrot.slane %v1464_v2, 6  ;;  %v1223_v16 = vld [vmem:[%s2003_s7 + $0x5] ss:$0 sm:$0xff] }
  0x2b   : > { %1260 = vpush %v670_v39  ;;  %v806_v39 = vrot.slane %v1478_v4, 5  ;;  %v867_v52 = vrot.slane %v1469_v3, 6  ;;  %v868_v53 = vrot.slane %v1483_v5, 6  ;;  %v869_v54 = vrot.slane %v1490_v6, 6 }
  0x2c   : > { %1262 = vpush %v671_v42  ;;  %v807_v42 = vrot.slane %v1469_v3, 5  ;;  %v900_v56 = vrot.slane %v1458_v1, 7  ;;  %v901_v57 = vrot.slane %v1464_v2, 7  ;;  %v902_v59 = vrot.slane %v1478_v4, 7 }
  0x2d   : > { %1264 = vpush %v732_v43  ;;  %710 = vrot.lane.b32.xlu1 %v1589_v44, %s1389_s11  ;;  %708 = vrot.lane.b32.xlu0 %v1592_v45, %s1389_s11  ;;  %v808_v43 = vrot.slane %v1483_v5, 5  ;;  %v903_v2 = vrot.slane %v1469_v3, 7  ;;  %v904_v63 = vrot.slane %v1483_v5, 7  ;;  %v905_v7 = vrot.slane %v1490_v6, 7  ;;  %v465_v3 = vld [vmem:[%s1997_s6 + $0x8] sm:$0x1] }
  0x2e   : > { %1266 = vpush %v733_v46  ;;  %v809_v46 = vrot.slane %v1490_v6, 5  ;;  %v467_v5 = vld [vmem:[%s1997_s6 + $0x18] sm:$0x1]  ;;  %v469_v6 = vld [vmem:[%s1997_s6 + $0x28] sm:$0x1] }
  0x2f   : > { %1268 = vpush %v734_v47  ;;  %v864_v47 = vrot.slane %v1458_v1, 6  ;;  %v1218_v1 = vld [vmem:[%s2003_s7] ss:$0 sm:$0xff] }
  0x30   : > { %1270 = vpush %v735_v51  ;;  %v866_v51 = vrot.slane %v1478_v4, 6  ;;  %v1220_v4 = vld [vmem:[%s2003_s7 + $0x2] ss:$0 sm:$0xff] }
  0x31   : > { %1272 = vpush %v736_v60  ;;  %714 = vrot.lane.b32.xlu1 %v1651_v19, %s1389_s11  ;;  %712 = vrot.lane.b32.xlu0 %v1654_v20, %s1389_s11  ;;  %v1219_v60 = vld [vmem:[%s2003_s7 + $0x1] ss:$0 sm:$0xff] }
  0x32   : > { %1274 = vpush %v737_v12  ;;  %v1221_v12 = vld [vmem:[%s2003_s7 + $0x3] ss:$0 sm:$0xff] }
  0x33   : > { %1276 = vpush %v768_v17  ;;  %v473_v17 = vld [vmem:[%s1997_s6 + $0x48] sm:$0x1] }
  0x34   : > { %1278 = vpush %v769_v22  ;;  %v475_v22 = vld [vmem:[%s1997_s6 + $0x58] sm:$0x1] }
  0x35   : > { %1280 = vpush %v770_v29  ;;  %718 = vrot.lane.b32.xlu1 %v1671_v34, %s1389_s11  ;;  %716 = vrot.lane.b32.xlu0 %v1674_v35, %s1389_s11 }
  0x36   : > { %1282 = vpush %v771_v30 }
  0x37   : > { %1284 = vpush %v772_v33 }
  0x38   : > { %1286 = vpush %v773_v36 }
  0x39   : > { %1288 = vpush %v804_v37  ;;  %842 = vrot.lane.b32.xlu1 %v1523_v21, %s1389_s11  ;;  %840 = vrot.lane.b32.xlu0 %v1508_v10, %s1389_s11 }
  0x3a   : > { %1290 = vpush %v805_v38 }
  0x3b   : > { %1292 = vpush %v806_v39 }
  0x3c   : > { %1294 = vpush %v807_v42 }
  0x3d   : > { %1296 = vpush %v808_v43  ;;  %846 = vrot.lane.b32.xlu1 %v1510_v11, %s1389_s11  ;;  %844 = vrot.lane.b32.xlu0 %v1506_v9, %s1389_s11 }
  0x3e   : > { %1298 = vpush %v809_v46 }
  0x3f   : > { %1300 = vpush %v864_v47 }
  0x40   : > { %1302 = vpush %v865_v49 }
  0x41   : > { %1304 = vpush %v866_v51  ;;  %850 = vrot.lane.b32.xlu1 %v1533_v26, %s1389_s11  ;;  %848 = vrot.lane.b32.xlu0 %v1535_v27, %s1389_s11 }
  0x42   : > { %1306 = vpush %v867_v52 }
  0x43   : > { %1308 = vpush %v868_v53 }
  0x44   : > { %1310 = vpush %v869_v54 }
  0x45   : > { %1312 = vpush %v900_v56  ;;  %1013 = vperm.xlu1 %1363, %v1219_v60   ;;  %1009 = vperm.xlu0 %1362, %v1218_v1  }
  0x46   : > { %1314 = vpush %v901_v57 }
  0x47   : > { %1316 = vpush %v902_v59 }
  0x48   : > { %1318 = vpush %v903_v2 }
  0x49   : > { %1320 = vpush %v904_v63  ;;  %1017 = vperm.xlu1 %1363, %v1220_v4   ;;  %1021 = vperm.xlu0 %1362, %v1221_v12  }
  0x4a   : > { %1322 = vpush %v905_v7 }
  0x4b   : > { %1324 = vpush %v465_v3 }
  0x4c   : > { %1326 = vpush %v467_v5  ;;  %s1747_s9 = spop %1228 }
  0x4d   : > { %1328 = vpush %v469_v6  ;;  %1025 = vperm.xlu1 %1363, %v1222_v15   ;;  %1029 = vperm.xlu0 %1362, %v1223_v16   ;;  %s1749_s10 = spop %1230  ;;  %v596_v37 = vstv %s1747_s9 }
  0x4e   : > { %1330 = vpush %v471_v14  ;;  %s1751_s11 = spop %1232  ;;  %v600_v38 = vstv %s1749_s10 }
  0x4f   : > { %1332 = vpush %v473_v17  ;;  %s1753_s12 = spop %1234  ;;  %v604_v39 = vstv %s1751_s11 }
  0x50   : > { %1334 = vpush %v475_v22  ;;  %s1755_s13 = spop %1236  ;;  %v608_v42 = vstv %s1753_s12 }
  0x51   : > { %s1757_s14 = spop %1238  ;;  %v612_v43 = vstv %s1755_s13 }
  0x52   : > { %s1759_s16 = spop %1240  ;;  %v616_v46 = vstv %s1757_s14 }
  0x53   : > { %s1761_s17 = spop %1242  ;;  %v637_v29 = vstv %s1759_s16 }
  0x54   : > { %s1763_s18 = spop %1244  ;;  %v640_v30 = vstv %s1761_s17  ;;  %v654_v47 = vmul.f32 %v637_v29, %v1622_v61  ;;  %s1851_s17 = scalar_lea.vmem %s1974_s0, %s1472_s15 }
  0x55   : > { %s1765_s19 = spop %1246  ;;  %v643_v33 = vstv %s1763_s18  ;;  %v655_v49 = vmul.f32 %v640_v30, %v1625_v62 }
  0x56   : > { %s1767_s21 = spop %1248  ;;  %v646_v36 = vstv %s1765_s19  ;;  %v656_v51 = vmul.f32 %v643_v33, %v1637_v13 }
  0x57   : > { %s1769_s22 = spop %1250  ;;  %v657_v52 = vmul.f32 %v646_v36, %v1648_v18  ;;  %v649_v59 = vstv %s1767_s21  ;;  %v476_v36 = vld [vmem:[%s1851_s17] sm:$0xff] }
  0x58   : > { %s1771_s27 = spop %1252  ;;  %v652_v60 = vstv %s1769_s22  ;;  %v658_v3 = vmul.f32 %v649_v59, %v1658_v25  ;;  %v478_v59 = vld [vmem:[%s1851_s17 + $0x10] sm:$0xff] }
  0x59   : > { %s1773_s20 = spop %1254  ;;  %v673_v53 = vstv %s1771_s27  ;;  %v659_v5 = vmul.f32 %v652_v60, %v1661_v28  ;;  %v479_v60 = vld [vmem:[%s1851_s17 + $0x18] sm:$0xff] }
  0x5a   : > { %s1775_s23 = spop %1256  ;;  %v676_v1 = vstv %s1773_s20  ;;  %v690_v4 = vmul.f32 %v673_v53, %v1530_v24 }
  0x5b   : > { %s1777_s24 = spop %1258  ;;  %v679_v54 = vstv %s1775_s23  ;;  %v691_v6 = vmul.f32 %v676_v1, %v1548_v32 }
  0x5c   : > { %s1779_s25 = spop %1260  ;;  %v682_v2 = vstv %s1777_s24  ;;  %v692_v12 = vmul.f32 %v679_v54, %v1527_v23 }
  0x5d   : > { %s1781_s26 = spop %1262  ;;  %v685_v63 = vstv %s1779_s25  ;;  %v693_v14 = vmul.f32 %v682_v2, %v1545_v31 }
  0x5e   : > { %s1783_s1 = spop %1264  ;;  %v688_v7 = vstv %s1781_s26  ;;  %v694_v32 = vmul.f32 %v685_v63, %v1584_v41 }
  0x5f   : > { %s1785_s2 = spop %1266  ;;  %v695_v31 = vmul.f32 %v688_v7, %v1581_v40  ;;  %v739_v17 = vstv %s1783_s1 }
  0x60   : > { %s1787_s3 = spop %1268  ;;  %v742_v22 = vstv %s1785_s2 }
  0x61   : > { %s1789_s4 = spop %1270  ;;  %v745_v40 = vstv %s1787_s3 }
  0x62   : > { %2004 = sst [smem:[#allocation5_spill]] %s1789_s4  ;;  %s1791_s5 = spop %1272 }
  0x63   : > { %2005 = sst [smem:[#allocation6_spill]] %s1791_s5  ;;  %s1793_s6 = spop %1274 }
  0x64   : > { %s1795_s7 = spop %1276  ;;  %s2007_s19 = sld [smem:[#allocation5_spill]] }
  0x65   : > { %s1797_s30 = spop %1278  ;;  %s2008_s22 = sld [smem:[#allocation6_spill]] }
  0x66   : > { %s1799_s28 = spop %1280 }
  0x67   : > { %s1801_s29 = spop %1282 }
  0x68   : > { %s1803_s8 = spop %1284 }
  0x69   : > { %2006 = sst [smem:[#allocation7_spill]] %s1803_s8  ;;  %s1805_s4 = spop %1286 }
  0x6a   : > { %s1809_s5 = spop %1288 }
  0x6b   : > { %s1817_s8 = spop %1290 }
  0x6c   : > { %s1823_s16 = spop %1292 }
  0x6d   : > { %s1833_s9 = spop %1294 }
  0x6e   : > { %s1839_s10 = spop %1296 }
  0x6f   : > { %s1853_s18 = spop %1298 }
  0x70   : > { %s1861_s21 = spop %1300 }
  0x71   : > { %s1871_s1 = spop %1302 }
  0x72   : > { %s1877_s2 = spop %1304 }
  0x93   : > { %v574_v56 = vpop.permute.xlu1 %573  ;;  %v570_v57 = vpop.permute.xlu0 %569 }
  0x94   : > { %v590_v61 = vsel %vm587_vm1, 0.0, %v574_v56  ;;  %v588_v62 = vsel %vm587_vm1, 0.0, %v570_v57 }
  0x95   : > { %v620_v13 = vmul.f32 %v604_v39, %v590_v61  ;;  %v618_v18 = vmul.f32 %v596_v37, %v588_v62  ;;  %v477_v37 = vld [vmem:[%s1851_s17 + $0x8] sm:$0xff]  ;;  %v748_v39 = vstv %s2007_s19  ;;  %v751_v61 = vstv %s2008_s22 }
  0x96   : > { %v754_v62 = vstv %s1793_s6 }
  0x97   : > { %v662_v24 = vadd.f32 %v656_v51, %v620_v13  ;;  %v660_v23 = vadd.f32 %v654_v47, %v618_v18  ;;  %v576_v15 = vpop.permute.xlu1 %575  ;;  %v572_v25 = vpop.permute.xlu0 %571  ;;  %v775_v47 = vstv %s1795_s7  ;;  %v778_v51 = vstv %s1797_s30  ;;  %s2009_s7 = sld [smem:[#allocation7_spill]] }
  0x98   : > { %v591_v28 = vsel %vm587_vm1, 0.0, %v576_v15  ;;  %v589_v16 = vsel %vm587_vm1, 0.0, %v572_v25  ;;  %v792_v13 = vmul.f32 %v775_v47, %v476_v36  ;;  %v793_v18 = vmul.f32 %v778_v51, %v477_v37  ;;  %v480_v36 = vld [vmem:[%s1851_s17 + $0x20] sm:$0xff]  ;;  %v481_v37 = vld [vmem:[%s1851_s17 + $0x28] sm:$0xff] }
  0x99   : > { %v696_v29 = vadd.f32 %v690_v4, %v660_v23  ;;  %v1863_v30 = vadd.f32 %v692_v12, %v662_v24  ;;  %v621_v33 = vmul.f32 %v608_v42, %v591_v28  ;;  %v619_v41 = vmul.f32 %v600_v38, %v589_v16 }
  0x9a   : > { %v781_v42 = vstv %s1799_s28  ;;  %v784_v38 = vstv %s1801_s29  ;;  %s1887_s28 = spop %1306  ;;  %v790_v16 = vstv %s1805_s4 }
  0x9b   : > { %v663_v53 = vadd.f32 %v657_v52, %v621_v33  ;;  %v661_v54 = vadd.f32 %v655_v49, %v619_v41  ;;  %v580_v56 = vpop.permute.xlu1 %579  ;;  %v578_v57 = vpop.permute.xlu0 %577  ;;  %v794_v4 = vmul.f32 %v781_v42, %v478_v59  ;;  %v795_v12 = vmul.f32 %v784_v38, %v479_v60  ;;  %s1891_s29 = spop %1308 }
  0x9c   : > { %v593_v1 = vsel %vm587_vm1, 0.0, %v580_v56  ;;  %v592_v2 = vsel %vm587_vm1, 0.0, %v578_v57  ;;  %v826_v60 = vstv %s1853_s18 }
  0x9d   : > { %v699_v63 = vadd.f32 %v693_v14, %v663_v53  ;;  %v623_v52 = vmul.f32 %v616_v46, %v593_v1  ;;  %v622_v49 = vmul.f32 %v612_v43, %v592_v2  ;;  %v697_v7 = vadd.f32 %v691_v6, %v661_v54 }
  0x9e   : > { %v811_v14 = vstv %s1809_s5  ;;  %v814_v46 = vstv %s1817_s8  ;;  %v787_v28 = vstv %s2009_s7  ;;  %s1899_s5 = spop %1310  ;;  %v817_v53 = vstv %s1823_s16 }
  0x9f   : > { %v665_v24 = vadd.f32 %v659_v5, %v623_v52  ;;  %v664_v23 = vadd.f32 %v658_v3, %v622_v49  ;;  %v711_v15 = vpop.permute.xlu1 %710  ;;  %v709_v25 = vpop.permute.xlu0 %708  ;;  %v828_v47 = vmul.f32 %v811_v14, %v1592_v45  ;;  %v829_v51 = vmul.f32 %v814_v46, %v1589_v44  ;;  %s1907_s4 = spop %1312 }
  0xa0   : > { %v727_v43 = vsel %vm587_vm1, 0.0, %v711_v15  ;;  %v726_v6 = vsel %vm587_vm1, 0.0, %v709_v25  ;;  %v820_v54 = vstv %s1833_s9  ;;  %s1913_s8 = spop %1314  ;;  %s2010_s9 = sld [smem:[#allocation15_spill]] }
  0xa1   : > { %v700_v33 = vadd.f32 %v694_v32, %v664_v23  ;;  %v701_v5 = vadd.f32 %v695_v31, %v665_v24  ;;  %v757_v41 = vmul.f32 %v742_v22, %v727_v43  ;;  %v756_v3 = vmul.f32 %v739_v17, %v726_v6  ;;  %s1920_s3 = spop %1316 }
  0xa2   : > { %v823_v32 = vstv %s1839_s10  ;;  %v796_v31 = vmul.f32 %v787_v28, %v480_v36  ;;  %v797_v17 = vmul.f32 %v790_v16, %v481_v37  ;;  %v831_v52 = vmul.f32 %v820_v54, %v1651_v19  ;;  %s1319_s30 = spop %1318 }
  0xa3   : > { %v763_v56 = vadd.f32 %v757_v41, %v697_v7  ;;  %v762_v57 = vadd.f32 %v756_v3, %v696_v29  ;;  %v715_v59 = vpop.permute.xlu1 %714  ;;  %v713_v42 = vpop.permute.xlu0 %712  ;;  %v830_v29 = vmul.f32 %v817_v53, %v1654_v20  ;;  %v832_v49 = vmul.f32 %v823_v32, %v1674_v35  ;;  %s1321_s6 = spop %1320 }
  0xa4   : > { %v729_v22 = vsel %vm587_vm1, 0.0, %v715_v59  ;;  %v728_v38 = vsel %vm587_vm1, 0.0, %v713_v42  ;;  %v833_v7 = vmul.f32 %v826_v60, %v1671_v34  ;;  %v907_v35 = vstv %s1907_s4  ;;  %s1323_s13 = spop %1322 }
  0xa5   : > { %v798_v45 = vadd.f32 %v792_v13, %v762_v57  ;;  %v799_v1 = vadd.f32 %v793_v18, %v763_v56  ;;  %v759_v44 = vmul.f32 %v748_v39, %v729_v22  ;;  %v758_v2 = vmul.f32 %v745_v40, %v728_v38  ;;  %s1325_s14 = spop %1324 }
  0xa6   : > { %v910_v15 = vstv %s1913_s8  ;;  %v913_v43 = vstv %s1920_s3  ;;  %v916_v6 = vstv %s1319_s30  ;;  %v877_v56 = vstv %s1877_s2  ;;  %s1327_s27 = spop %1326  ;;  %s463_s10 = scalar_lea.vmem %s2010_s9, %s1472_s15 }
  0xa7   : > { %v834_v24 = vadd.f32 %v828_v47, %v798_v45  ;;  %v835_v13 = vadd.f32 %v829_v51, %v799_v1  ;;  %v765_v39 = vadd.f32 %v759_v44, %v699_v63  ;;  %v764_v40 = vadd.f32 %v758_v2, %v1863_v30  ;;  %v719_v18 = vpop.permute.xlu1 %718  ;;  %v717_v23 = vpop.permute.xlu0 %716  ;;  %s1329_s20 = spop %1328 }
  0xa8   : > { %v731_v19 = vsel %vm587_vm1, 0.0, %v719_v18  ;;  %v730_v20 = vsel %vm587_vm1, 0.0, %v717_v23  ;;  %v871_v63 = vstv %s1861_s21  ;;  %v874_v30 = vstv %s1871_s1  ;;  %s1331_s23 = spop %1330 }
  0xa9   : > { %v800_v25 = vadd.f32 %v794_v4, %v764_v40  ;;  %v801_v34 = vadd.f32 %v795_v12, %v765_v39  ;;  %v761_v14 = vmul.f32 %v754_v62, %v731_v19  ;;  %v760_v46 = vmul.f32 %v751_v61, %v730_v20  ;;  %s1333_s24 = spop %1332 }
  0xaa   : > { %v924_v62 = vmul.f32 %v907_v35, %v1597_v48  ;;  %v925_v61 = vmul.f32 %v910_v15, %v1601_v50  ;;  %v880_v57 = vstv %s1887_s28  ;;  %v886_v2 = vstv %s1899_s5  ;;  %s1335_s25 = spop %1334 }
  0xab   : > { %v836_v28 = vadd.f32 %v830_v29, %v800_v25  ;;  %v837_v16 = vadd.f32 %v831_v52, %v801_v34  ;;  %v767_v41 = vadd.f32 %v761_v14, %v701_v5  ;;  %v766_v3 = vadd.f32 %v760_v46, %v700_v33  ;;  %v843_v36 = vpop.permute.xlu1 %842  ;;  %v841_v37 = vpop.permute.xlu0 %840 }
  0xac   : > { %v859_v4 = vsel %vm587_vm1, 0.0, %v843_v36  ;;  %v858_v12 = vsel %vm587_vm1, 0.0, %v841_v37  ;;  %v926_v5 = vmul.f32 %v913_v43, %v1612_v55  ;;  %v927_v33 = vmul.f32 %v916_v6, %v1617_v58 }
  0xad   : > { %v802_v47 = vadd.f32 %v796_v31, %v766_v3  ;;  %v803_v51 = vadd.f32 %v797_v17, %v767_v41  ;;  %v889_v53 = vmul.f32 %v874_v30, %v859_v4  ;;  %v888_v54 = vmul.f32 %v871_v63, %v858_v12 }
  0xae   : > { %v919_v31 = vstv %s1321_s6  ;;  %v922_v17 = vstv %s1323_s13  ;;  %v883_v58 = vstv %s1891_s29  ;;  %v938_v25 = vstv %s1325_s14 }
  0xaf   : > { %v838_v59 = vadd.f32 %v832_v49, %v802_v47  ;;  %v839_v42 = vadd.f32 %v833_v7, %v803_v51  ;;  %v895_v32 = vadd.f32 %v889_v53, %v835_v13  ;;  %v894_v60 = vadd.f32 %v888_v54, %v834_v24  ;;  %v847_v48 = vpop.permute.xlu1 %846  ;;  %v845_v50 = vpop.permute.xlu0 %844 }
  0xb0   : > { %v861_v22 = vsel %vm587_vm1, 0.0, %v847_v48  ;;  %v860_v38 = vsel %vm587_vm1, 0.0, %v845_v50  ;;  %v928_v24 = vmul.f32 %v919_v31, %v1629_v0  ;;  %v929_v13 = vmul.f32 %v922_v17, %v1633_v8 }
  0xb1   : > { %v930_v45 = vadd.f32 %v924_v62, %v894_v60  ;;  %v931_v1 = vadd.f32 %v925_v61, %v895_v32  ;;  %v891_v55 = vmul.f32 %v880_v57, %v861_v22  ;;  %v890_v44 = vmul.f32 %v877_v56, %v860_v38 }
  0xb2   : > { %v942_v34 = vstv %s1327_s27  ;;  %v960_v8 = vmul.f32 %v938_v25, %v1508_v10  ;;  %v946_v63 = vstv %s1329_s20  ;;  %v950_v30 = vstv %s1331_s23 }
  0xb3   : > { %v897_v29 = vadd.f32 %v891_v55, %v837_v16  ;;  %v896_v52 = vadd.f32 %v890_v44, %v836_v28  ;;  %v851_v49 = vpop.permute.xlu1 %850  ;;  %v849_v7 = vpop.permute.xlu0 %848  ;;  %v961_v46 = vmul.f32 %v942_v34, %v1523_v21  ;;  %v962_v43 = vmul.f32 %v946_v63, %v1506_v9 }
  0xb4   : > { %v863_v39 = vsel %vm587_vm1, 0.0, %v851_v49  ;;  %v862_v40 = vsel %vm587_vm1, 0.0, %v849_v7  ;;  %v963_v6 = vmul.f32 %v950_v30, %v1510_v11  ;;  %v966_v16 = vadd.f32 %v960_v8, %v930_v45 }
  0xb5   : > { %v893_v18 = vmul.f32 %v886_v2, %v863_v39  ;;  %v892_v23 = vmul.f32 %v883_v58, %v862_v40  ;;  %v932_v19 = vadd.f32 %v926_v5, %v896_v52  ;;  %v933_v20 = vadd.f32 %v927_v33, %v897_v29 }
  0xb6   : > { %v967_v28 = vadd.f32 %v961_v46, %v931_v1  ;;  %v954_v41 = vstv %s1333_s24  ;;  %v958_v3 = vstv %s1335_s25 }
  0xb7   : > { %v899_v35 = vadd.f32 %v893_v18, %v839_v42  ;;  %v898_v15 = vadd.f32 %v892_v23, %v838_v59  ;;  %v964_v4 = vmul.f32 %v954_v41, %v1535_v27  ;;  %v965_v12 = vmul.f32 %v958_v3, %v1533_v26 }
  0xb8   : > { %v968_v9 = vadd.f32 %v962_v43, %v932_v19  ;;  %v969_v11 = vadd.f32 %v963_v6, %v933_v20 }
  0xb9   : > { %v934_v14 = vadd.f32 %v928_v24, %v898_v15  ;;  %v935_v0 = vadd.f32 %v929_v13, %v899_v35 }
  0xbb   : > { %v970_v53 = vadd.f32 %v964_v4, %v934_v14  ;;  %v971_v54 = vadd.f32 %v965_v12, %v935_v0 }
  0xc0   : > { %v1014_v10 = vpop.permute.xlu1 %1013  ;;  %v1010_v36 = vpop.permute.xlu0 %1009 }
  0xc1   : > { %v1033_v21 = vadd.f32 %v1014_v10, %v967_v28  ;;  %v1032_v37 = vadd.f32 %v1010_v36, %v966_v16 }
  0xc3   : > { %1040 = vst.msk [vmem:[%s463_s10 + $0x8] sm:$0xff] %vm1038_vm2, %v1033_v21  ;;  %1039 = vst.msk [vmem:[%s463_s10] sm:$0xff] %vm1038_vm2, %v1032_v37 }
  0xc4   : > { %v1018_v62 = vpop.permute.xlu1 %1017  ;;  %v1022_v61 = vpop.permute.xlu0 %1021 }
  0xc5   : > { %v1034_v47 = vadd.f32 %v1018_v62, %v968_v9  ;;  %v1035_v51 = vadd.f32 %v1022_v61, %v969_v11 }
  0xc7   : > { %1041 = vst.msk [vmem:[%s463_s10 + $0x10] sm:$0xff] %vm1038_vm2, %v1034_v47  ;;  %1042 = vst.msk [vmem:[%s463_s10 + $0x18] sm:$0xff] %vm1038_vm2, %v1035_v51 }
  0xc8   : > { %v1026_v56 = vpop.permute.xlu1 %1025  ;;  %v1030_v27 = vpop.permute.xlu0 %1029 }
  0xc9   : > { %v1036_v57 = vadd.f32 %v1026_v56, %v970_v53  ;;  %v1037_v26 = vadd.f32 %v1030_v27, %v971_v54 }
  0xcb   : > { %1043 = vst.msk [vmem:[%s463_s10 + $0x20] sm:$0xff] %vm1038_vm2, %v1036_v57  ;;  %1044 = vst.msk [vmem:[%s463_s10 + $0x28] sm:$0xff] %vm1038_vm2, %v1037_v26 }
  0xcc PF: > { %s2011_s15 = sld [smem:[#allocation3_spill]] }
  0xcd   : > { %s2012_s27 = sld [smem:[#allocation2_spill]] }
  0xce   : > { %s2013_s28 = sld [smem:[#allocation4_spill]] }
  0xd2   : > { %s18_s29 = sadd.s32 1, %s2011_s15  }
  0xd3   : > { %p15_p5 = scmp.ge.s32.totalorder %s18_s29, 4  }
  0xd5   :  { %17 = sbr.rel (!%p15_p5) target bundleno = 9 (0x9), region = 99 }

// kernel: lightfuse_forward.8
= control target key start
LH: loop header
LB: loop body
LE: loop exit
PB: predicated region body
PF: predicated region fallthrough
CT: control target
= control target key end

     0   :  { %s355_s12 = smov 0   ;;  %s382_s0 = inlined_call_operand.vmem [shape: f32[2,6,4], index: 0, kind: input, shape index: {}]   ;;  %s383_s1 = inlined_call_operand.vmem [shape: f32[3,6], index: 1, kind: input, shape index: {}]   ;;  %s384_s2 = inlined_call_operand.vmem [shape: f32[3,1], index: 2, kind: input, shape index: {}]   ;;  %s385_s3 = inlined_call_operand.vmem [shape: f32[2,3,4], index: 3, kind: output, shape index: {}]  }
   0x1 LB: > { %s291_s13 = sadd.s32 4294967295, %s327_s12   ;;  %p295_p0 = scmp.ge.s32.totalorder %s327_s12, 1  ;;  %s327_s12 = sphi %s355_s12, %s13_s12  }
   0x2   : > { %p136_p1 = scmp.lt.s32.totalorder %s327_s12, 3 }
   0x4   : > { %p137_p2 = pnand %p295_p0, %p136_p1 }
   0x5   : > { %p158_p3 = scmp.lt.s32.totalorder (!%p137_p2), %s291_s13, 1 }
   0x6   : > { %140 = sbr.rel (%p137_p2) target bundleno = 157 (0x9d), region = 32 }
   0xb   : > { %v167_v0 = vld [vmem:[%s383_s1] sm:$0x7]  ;;  %v329_v1 = vmov 1   ;;  %v330_v2 = vmov 0   ;;  %v331_v4 = vmov 2   ;;  %v332_v5 = vmov 3  }
   0xc   : > { %315 = vset.pattern.permute.xlu1 %v329_v1  ;;  %314 = vset.pattern.permute.xlu0 %v330_v2  ;;  %v168_v3 = vld [vmem:[%s384_s2] sm:$0x7]  ;;  %v333_v6 = vmov 4   ;;  %v334_v7 = vmov 5   ;;  %s387_s13 = smov (!%p158_p3, %s291_s13), 1  ;;  %v180_v8 = vlaneseq  ;;  %vm236_vm0 = vcmask 26624  }
   0xd   : > { %187 = vperm.xlu1 %315, %v167_v0   ;;  %177 = vperm.xlu0 %314, %v167_v0   ;;  %s296_s18 = sshll.u32 %s387_s13, 3  ;;  %s297_s22 = sshll.u32 %s387_s13, 2 }
   0xe   : > { %v181_v9 = vshrl.u32 %v180_v8, 7  ;;  %s161_s21 = scalar_lea.vmem %s382_s0, %s296_s18  ;;  %s165_s25 = scalar_lea.vmem %s385_s3, %s297_s22 }
   0xf   : > { %v166_v11 = vld [vmem:[%s161_s21] sm:$0x3f] }
  0x10   : > { %v182_v10 = vsub.s32 0, %v181_v9  ;;  %v192_v12 = vsub.s32 1, %v181_v9  ;;  %v202_v14 = vsub.s32 2, %v181_v9  ;;  %v212_v20 = vsub.s32 3, %v181_v9 }
  0x11   : > { %316 = vset.pattern.permute.xlu1 %v331_v4  ;;  %171 = vperm.xlu0 %314, %v168_v3   ;;  %v222_v22 = vsub.s32 4, %v181_v9  ;;  %v232_v30 = vsub.s32 5, %v181_v9 }
  0x12   : > { %197 = vperm.xlu1 %316, %v167_v0   ;;  %v183_v13 = vrot.slane %v166_v11, %v182_v10  ;;  %v193_v17 = vrot.slane %v166_v11, %v192_v12  ;;  %v203_v19 = vrot.slane %v166_v11, %v202_v14  ;;  %v213_v27 = vrot.slane %v166_v11, %v212_v20 }
  0x13   : > { %v223_v29 = vrot.slane %v166_v11, %v222_v22  ;;  %v233_v37 = vrot.slane %v166_v11, %v232_v30 }
  0x15   : > { %317 = vset.pattern.permute.xlu0 %v332_v5 }
  0x16   : > { %318 = vset.pattern.permute.xlu1 %v333_v6  ;;  %207 = vperm.xlu0 %317, %v167_v0  }
  0x17   : > { %217 = vperm.xlu1 %318, %v167_v0  }
  0x1a   : > { %320 = vset.pattern.permute.xlu0 %v334_v7 }
  0x1b   : > { %319 = vset.pattern.permute.xlu1 %v334_v7 }
  0x1c   : > { %227 = vperm.xlu1 %319, %v167_v0  }
  0x88   : > { %v188_v15 = vpop.permute.xlu1 %187  ;;  %v178_v16 = vpop.permute.xlu0 %177 }
  0x89   : > { %v184_v18 = vmul.f32 %v183_v13, %v178_v16  ;;  %v194_v23 = vmul.f32 %v193_v17, %v188_v15 }
  0x8c   : > { %v172_v21 = vpop.permute.xlu0 %171 }
  0x8d   : > { %v185_v24 = vadd.f32 %v184_v18, %v172_v21  ;;  %v198_v25 = vpop.permute.xlu1 %197 }
  0x8e   : > { %v204_v26 = vmul.f32 %v203_v19, %v198_v25 }
  0x8f   : > { %v195_v28 = vadd.f32 %v194_v23, %v185_v24 }
  0x91   : > { %v205_v31 = vadd.f32 %v204_v26, %v195_v28  ;;  %v208_v32 = vpop.permute.xlu0 %207 }
  0x92   : > { %v214_v33 = vmul.f32 %v213_v27, %v208_v32  ;;  %v218_v34 = vpop.permute.xlu1 %217 }
  0x93   : > { %v224_v36 = vmul.f32 %v223_v29, %v218_v34 }
  0x94   : > { %v215_v35 = vadd.f32 %v214_v33, %v205_v31 }
  0x96   : > { %v225_v39 = vadd.f32 %v224_v36, %v215_v35 }
  0x97   : > { %v228_v38 = vpop.permute.xlu1 %227 }
  0x98   : > { %v234_v40 = vmul.f32 %v233_v37, %v228_v38 }
  0x9a   : > { %v235_v41 = vadd.f32 %v234_v40, %v225_v39 }
  0x9c   : > { %237 = vst.msk [vmem:[%s165_s25] sm:$0x7] %vm236_vm0, %v235_v41 }
  0x9d PF: > { %s13_s12 = sadd.s32 1, %s327_s12  }
  0x9e   : > { %p10_p4 = scmp.ge.s32.totalorder %s13_s12, 4  }
  0xa0   :  { %12 = sbr.rel (!%p10_p4) target bundleno = 1 (0x1), region = 62 }

// kernel: lightfuse_forward.7
= control target key start
LH: loop header
LB: loop body
LE: loop exit
PB: predicated region body
PF: predicated region fallthrough
CT: control target
= control target key end

     0   :  { %s1435_s27 = smov 0   ;;  %s1437_s28 = smov 0   ;;  %s1982_s0 = inlined_call_operand.vmem [shape: f32[2,6,2,2], index: 0, kind: input, shape index: {}]   ;;  %s1983_s1 = inlined_call_operand.vmem [shape: f32[2,6,2,2], index: 1, kind: input, shape index: {}]   ;;  %s1984_s2 = inlined_call_operand.vmem [shape: f32[2,6,2,2], index: 2, kind: input, shape index: {}]   ;;  %s1985_s3 = inlined_call_operand.vmem [shape: f32[2,6,2,2], index: 3, kind: input, shape index: {}]   ;;  %s1986_s4 = inlined_call_operand.vmem [shape: f32[2,6,1,2], index: 4, kind: input, shape index: {}, may-alias: {4,5}]   ;;  %s1987_s5 = inlined_call_operand.vmem [shape: f32[2,6,1,2], index: 5, kind: input, shape index: {}, may-alias: {4,5}]   ;;  %s1988_s6 = inlined_call_operand.vmem [shape: f32[6,9,1], index: 6, kind: input, shape index: {}]   ;;  %s1989_s7 = inlined_call_operand.vmem [shape: f32[6,1,1], index: 7, kind: input, shape index: {}]   ;;  %s1990_s8 = inlined_call_operand.vmem [shape: f32[2,6,2,2], index: 8, kind: output, shape index: {}]  }
   0x1   :  { %1994 = sst [smem:[#allocation8_spill]] %s1983_s1  ;;  %s1439_s29 = smov 0  }
   0x2   :  { %1995 = sst [smem:[#allocation9_spill]] %s1984_s2 }
   0x3   :  { %1996 = sst [smem:[#allocation10_spill]] %s1985_s3 }
   0x4   :  { %1997 = sst [smem:[#allocation11_spill]] %s1986_s4 }
   0x5   :  { %1998 = sst [smem:[#allocation12_spill]] %s1987_s5 }
   0x6   :  { %1999 = sst [smem:[#allocation13_spill]] %s1988_s6 }
   0x7   :  { %2000 = sst [smem:[#allocation14_spill]] %s1989_s7 }
   0x8   :  { %2001 = sst [smem:[#allocation15_spill]] %s1990_s8 }
   0x9 LB: > { %2002 = sst [smem:[#allocation2_spill]] %s1382_s28  ;;  %s30_s30 = sadd.s32 1, %s1382_s28  ;;  %s1386_s29 = sphi %s1439_s29, %s18_s29   ;;  %s1382_s28 = sphi %s1437_s28, %s2021_s28   ;;  %s1378_s27 = sphi %s1435_s27, %s2020_s27  }
   0xa   : > { %2003 = sst [smem:[#allocation3_spill]] %s1386_s29  ;;  %p1212_p0 = scmp.ge.s32.totalorder %s1386_s29, 1 }
   0xb   : > { %p32_p1 = scmp.ge.s32.totalorder %s30_s30, 2  ;;  %p344_p2 = scmp.lt.s32.totalorder %s1386_s29, 3 }
   0xd   : > { %s2023_s30 = smov (%p32_p1, %s30_s30), 0  ;;  %p345_p3 = pnand %p1212_p0, %p344_p2 }
   0xe   : > { %2004 = sst [smem:[#allocation4_spill]] %s2023_s30 }
   0xf   : > { %348 = sbr.rel (%p345_p3) target bundleno = 204 (0xcc), region = 52 }
  0x14   : > { %p416_p4 = scmp.lt.s32.totalorder %s1378_s27, 1  ;;  %v1388_v0 = vmov 0   ;;  %s2005_s6 = sld [smem:[#allocation13_spill]]  ;;  %vm532_vm0 = vcmask 1040384   ;;  %vm587_vm1 = vcmask 7168   ;;  %vm1038_vm2 = vcmask 9216  }
  0x15   : > { %1363 = vset.pattern.permute.xlu1 %v1388_v0  ;;  %1362 = vset.pattern.permute.xlu0 %v1388_v0  ;;  %s2006_s3 = sld [smem:[#allocation10_spill]]  ;;  %s1389_s11 = smov 1  }
  0x16   : > { %s2025_s27 = smov (!%p416_p4, %s1378_s27), 1  ;;  %s2007_s5 = sld [smem:[#allocation12_spill]] }
  0x17   : > { %s1477_s17 = smul.u32 12, %s2025_s27  ;;  %s2008_s1 = sld [smem:[#allocation8_spill]] }
  0x18   : > { %s1227_s20 = smul.u32 6, %s2025_s27  ;;  %s2009_s2 = sld [smem:[#allocation9_spill]] }
  0x19   : > { %s2010_s4 = sld [smem:[#allocation11_spill]] }
  0x1a   : > { %v1458_v1 = vld [vmem:[%s2005_s6] sm:$0xff]  ;;  %v1464_v2 = vld [vmem:[%s2005_s6 + $0x10] sm:$0xff]  ;;  %s2011_s7 = sld [smem:[#allocation14_spill]] }
  0x1b   : > { %1228 = vpush %v1458_v1  ;;  %v1469_v3 = vld [vmem:[%s2005_s6 + $0x20] sm:$0xff]  ;;  %v1474_v4 = vld [vmem:[%s2005_s6 + $0x30] sm:$0xff]  ;;  %v630_v7 = vrot.slane %v1458_v1, 1  ;;  %s1497_s25 = scalar_lea.vmem %s2006_s3, %s1477_s17  ;;  %v631_v8 = vrot.slane %v1464_v2, 1  ;;  %v666_v29 = vrot.slane %v1458_v1, 2  ;;  %v667_v30 = vrot.slane %v1464_v2, 2 }
  0x1c   : > { %1230 = vpush %v1464_v2  ;;  %v1483_v5 = vld [vmem:[%s2005_s6 + $0x40] sm:$0xff]  ;;  %v1490_v6 = vld [vmem:[%s2005_s6 + $0x50] sm:$0xff]  ;;  %v632_v9 = vrot.slane %v1469_v3, 1  ;;  %v633_v10 = vrot.slane %v1474_v4, 1  ;;  %s1508_s10 = scalar_lea.vmem %s2007_s5, %s1227_s20  ;;  %v1540_v26 = vld [vmem:[%s1497_s25 + $0xa] sm:$0x3] }
  0x1d   : > { %1232 = vpush %v1469_v3  ;;  %v1511_v11 = vld [vmem:[%s1497_s25 + $0x4] sm:$0x3]  ;;  %v1514_v12 = vld [vmem:[%s1497_s25] sm:$0x3]  ;;  %v1517_v13 = vld [vmem:[%s1497_s25 + $0x6] sm:$0x3]  ;;  %s1579_s14 = scalar_lea.vmem %s2008_s1, %s1477_s17 }
  0x1e   : > { %1234 = vpush %v1474_v4  ;;  %v510_v14 = vld [vmem:[%s1508_s10 + $0x2] sm:$0x1]  ;;  %v547_v15 = vrot.slane %v1511_v11, 7  ;;  %v508_v16 = vld [vmem:[%s1508_s10] sm:$0x1]  ;;  %v545_v17 = vrot.slane %v1514_v12, 7  ;;  %s1587_s18 = scalar_lea.vmem %s2009_s2, %s1477_s17 }
  0x1f   : > { %1236 = vpush %v1483_v5  ;;  %v511_v18 = vld [vmem:[%s1508_s10 + $0x3] sm:$0x1]  ;;  %v548_v19 = vrot.slane %v1517_v13, 7  ;;  %v634_v21 = vrot.slane %v1483_v5, 1  ;;  %v509_v24 = vld [vmem:[%s1508_s10 + $0x1] sm:$0x1]  ;;  %s1594_s22 = scalar_lea.vmem %s2010_s4, %s1227_s20 }
  0x20   : > { %1238 = vpush %v1490_v6  ;;  %v1528_v20 = vld [vmem:[%s1497_s25 + $0x2] sm:$0x3]  ;;  %v1532_v22 = vsel %vm532_vm0, %v510_v14, %v547_v15  ;;  %v1535_v23 = vsel %vm532_vm0, %v508_v16, %v545_v17  ;;  %v635_v27 = vrot.slane %v1490_v6, 1  ;;  %v1548_v28 = vld [vmem:[%s1497_s25 + $0x8] sm:$0x3]  ;;  %v550_v33 = vrot.slane %v1540_v26, 7 }
  0x21   : > { %1240 = vpush %v630_v7  ;;  %v546_v25 = vrot.slane %v1528_v20, 7  ;;  %573 = vrot.lane.b32.xlu1 %v1532_v22, %s1389_s11  ;;  %569 = vrot.lane.b32.xlu0 %v1535_v23, %s1389_s11  ;;  %v1553_v31 = vsel %vm532_vm0, %v511_v18, %v548_v19  ;;  %v549_v34 = vrot.slane %v1548_v28, 7  ;;  %v513_v35 = vld [vmem:[%s1508_s10 + $0x5] sm:$0x1]  ;;  %v512_v36 = vld [vmem:[%s1508_s10 + $0x4] sm:$0x1] }
  0x22   : > { %1242 = vpush %v631_v8  ;;  %v668_v37 = vrot.slane %v1469_v3, 2  ;;  %v669_v38 = vrot.slane %v1474_v4, 2  ;;  %v670_v39 = vrot.slane %v1483_v5, 2  ;;  %v1570_v40 = vsel %vm532_vm0, %v513_v35, %v550_v33  ;;  %v1602_v45 = vld [vmem:[%s1579_s14 + $0x2] sm:$0x3] }
  0x23   : > { %1244 = vpush %v632_v9  ;;  %v1556_v32 = vsel %vm532_vm0, %v509_v24, %v546_v25  ;;  %v1573_v41 = vsel %vm532_vm0, %v512_v36, %v549_v34  ;;  %v671_v42 = vrot.slane %v1490_v6, 2  ;;  %v732_v43 = vrot.slane %v1458_v1, 3  ;;  %v1607_v48 = vld [vmem:[%s1579_s14] sm:$0x3]  ;;  %v1616_v53 = vld [vmem:[%s1587_s18 + $0x2] sm:$0x3] }
  0x24   : > { %1246 = vpush %v633_v10  ;;  %v733_v44 = vrot.slane %v1464_v2, 3  ;;  %v734_v46 = vrot.slane %v1469_v3, 3  ;;  %v735_v47 = vrot.slane %v1474_v4, 3  ;;  %v1610_v49 = vld [vmem:[%s1587_s18] sm:$0x3]  ;;  %v736_v51 = vrot.slane %v1483_v5, 3 }
  0x25   : > { %1248 = vpush %v634_v21  ;;  %575 = vrot.lane.b32.xlu1 %v1553_v31, %s1389_s11  ;;  %571 = vrot.lane.b32.xlu0 %v1556_v32, %s1389_s11  ;;  %v501_v50 = vld [vmem:[%s1594_s22] sm:$0x1]  ;;  %v520_v52 = vrot.slane %v1610_v49, 7  ;;  %v502_v54 = vld [vmem:[%s1594_s22 + $0x1] sm:$0x1]  ;;  %v737_v57 = vrot.slane %v1490_v6, 3 }
  0x26   : > { %1250 = vpush %v635_v27  ;;  %v1620_v55 = vld [vmem:[%s1579_s14 + $0x6] sm:$0x3]  ;;  %v1623_v56 = vld [vmem:[%s1579_s14 + $0x4] sm:$0x3]  ;;  %v521_v58 = vrot.slane %v1616_v53, 7  ;;  %v768_v61 = vrot.slane %v1458_v1, 4 }
  0x27   : > { %1252 = vpush %v666_v29  ;;  %v1628_v59 = vld [vmem:[%s1587_s18 + $0x4] sm:$0x3]  ;;  %v503_v60 = vld [vmem:[%s1594_s22 + $0x2] sm:$0x1]  ;;  %v1637_v62 = vsel %vm532_vm0, %v501_v50, %v520_v52  ;;  %v1641_v0 = vld [vmem:[%s1587_s18 + $0x6] sm:$0x3] }
  0x28   : > { %1254 = vpush %v667_v30  ;;  %v522_v63 = vrot.slane %v1628_v59, 7  ;;  %v504_v7 = vld [vmem:[%s1594_s22 + $0x3] sm:$0x1]  ;;  %v769_v8 = vrot.slane %v1464_v2, 4  ;;  %v1646_v9 = vsel %vm532_vm0, %v502_v54, %v521_v58  ;;  %v523_v10 = vrot.slane %v1641_v0, 7 }
  0x29   : > { %1256 = vpush %v668_v37  ;;  %579 = vrot.lane.b32.xlu1 %v1570_v40, %s1389_s11  ;;  %577 = vrot.lane.b32.xlu0 %v1573_v41, %s1389_s11  ;;  %v1650_v14 = vld [vmem:[%s1587_s18 + $0x8] sm:$0x3]  ;;  %v505_v15 = vld [vmem:[%s1594_s22 + $0x4] sm:$0x1]  ;;  %v770_v16 = vrot.slane %v1469_v3, 4  ;;  %v771_v24 = vrot.slane %v1474_v4, 4 }
  0x2a   : > { %1258 = vpush %v669_v38  ;;  %v1655_v17 = vsel %vm532_vm0, %v503_v60, %v522_v63  ;;  %v524_v18 = vrot.slane %v1650_v14, 7  ;;  %v1659_v19 = vld [vmem:[%s1587_s18 + $0xa] sm:$0x3]  ;;  %v506_v21 = vld [vmem:[%s1594_s22 + $0x5] sm:$0x1]  ;;  %v1664_v25 = vsel %vm532_vm0, %v504_v7, %v523_v10  ;;  %v772_v29 = vrot.slane %v1483_v5, 4 }
  0x2b   : > { %1260 = vpush %v670_v39  ;;  %v525_v27 = vrot.slane %v1659_v19, 7  ;;  %v1676_v33 = vld [vmem:[%s1579_s14 + $0xa] sm:$0x3]  ;;  %v1679_v34 = vld [vmem:[%s1579_s14 + $0x8] sm:$0x3]  ;;  %v773_v35 = vrot.slane %v1490_v6, 4 }
  0x2c   : > { %1262 = vpush %v671_v42  ;;  %v1673_v30 = vsel %vm532_vm0, %v505_v15, %v524_v18  ;;  %v804_v37 = vrot.slane %v1458_v1, 5  ;;  %v805_v38 = vrot.slane %v1464_v2, 5  ;;  %v806_v39 = vrot.slane %v1469_v3, 5  ;;  %v471_v10 = vld [vmem:[%s2005_s6 + $0x38] sm:$0x1] }
  0x2d   : > { %1264 = vpush %v732_v43  ;;  %710 = vrot.lane.b32.xlu1 %v1602_v45, %s1389_s11  ;;  %708 = vrot.lane.b32.xlu0 %v1607_v48, %s1389_s11  ;;  %v1683_v36 = vsel %vm532_vm0, %v506_v21, %v525_v27  ;;  %v807_v42 = vrot.slane %v1474_v4, 5  ;;  %v808_v43 = vrot.slane %v1483_v5, 5  ;;  %v866_v50 = vrot.slane %v1469_v3, 6  ;;  %v1222_v15 = vld [vmem:[%s2011_s7 + $0x4] ss:$0 sm:$0xff] }
  0x2e   : > { %1266 = vpush %v733_v44  ;;  %v809_v44 = vrot.slane %v1490_v6, 5  ;;  %v868_v52 = vrot.slane %v1483_v5, 6  ;;  %v869_v54 = vrot.slane %v1490_v6, 6  ;;  %v901_v58 = vrot.slane %v1464_v2, 7  ;;  %v473_v18 = vld [vmem:[%s2005_s6 + $0x48] sm:$0x1] }
  0x2f   : > { %1268 = vpush %v734_v46  ;;  %v864_v46 = vrot.slane %v1458_v1, 6  ;;  %v902_v60 = vrot.slane %v1469_v3, 7  ;;  %v904_v63 = vrot.slane %v1483_v5, 7  ;;  %v905_v7 = vrot.slane %v1490_v6, 7  ;;  %v1220_v3 = vld [vmem:[%s2011_s7 + $0x2] ss:$0 sm:$0xff] }
  0x30   : > { %1270 = vpush %v735_v47  ;;  %v865_v47 = vrot.slane %v1464_v2, 6  ;;  %v903_v2 = vrot.slane %v1474_v4, 7  ;;  %v467_v5 = vld [vmem:[%s2005_s6 + $0x18] sm:$0x1]  ;;  %v469_v6 = vld [vmem:[%s2005_s6 + $0x28] sm:$0x1] }
  0x31   : > { %1272 = vpush %v736_v51  ;;  %714 = vrot.lane.b32.xlu1 %v1620_v55, %s1389_s11  ;;  %712 = vrot.lane.b32.xlu0 %v1623_v56, %s1389_s11  ;;  %v867_v51 = vrot.slane %v1474_v4, 6  ;;  %v465_v4 = vld [vmem:[%s2005_s6 + $0x8] sm:$0x1]  ;;  %v475_v21 = vld [vmem:[%s2005_s6 + $0x58] sm:$0x1] }
  0x32   : > { %1274 = vpush %v737_v57  ;;  %v900_v57 = vrot.slane %v1458_v1, 7  ;;  %v1218_v1 = vld [vmem:[%s2011_s7] ss:$0 sm:$0xff] }
  0x33   : > { %1276 = vpush %v768_v61  ;;  %v1219_v61 = vld [vmem:[%s2011_s7 + $0x1] ss:$0 sm:$0xff] }
  0x34   : > { %1278 = vpush %v769_v8  ;;  %v1221_v8 = vld [vmem:[%s2011_s7 + $0x3] ss:$0 sm:$0xff] }
  0x35   : > { %1280 = vpush %v770_v16  ;;  %718 = vrot.lane.b32.xlu1 %v1676_v33, %s1389_s11  ;;  %716 = vrot.lane.b32.xlu0 %v1679_v34, %s1389_s11  ;;  %v1223_v16 = vld [vmem:[%s2011_s7 + $0x5] ss:$0 sm:$0xff] }
  0x36   : > { %1282 = vpush %v771_v24 }
  0x37   : > { %1284 = vpush %v772_v29 }
  0x38   : > { %1286 = vpush %v773_v35 }
  0x39   : > { %1288 = vpush %v804_v37  ;;  %842 = vrot.lane.b32.xlu1 %v1528_v20, %s1389_s11  ;;  %840 = vrot.lane.b32.xlu0 %v1514_v12, %s1389_s11 }
  0x3a   : > { %1290 = vpush %v805_v38 }
  0x3b   : > { %1292 = vpush %v806_v39 }
  0x3c   : > { %1294 = vpush %v807_v42 }
  0x3d   : > { %1296 = vpush %v808_v43  ;;  %846 = vrot.lane.b32.xlu1 %v1517_v13, %s1389_s11  ;;  %844 = vrot.lane.b32.xlu0 %v1511_v11, %s1389_s11 }
  0x3e   : > { %1298 = vpush %v809_v44 }
  0x3f   : > { %1300 = vpush %v864_v46 }
  0x40   : > { %1302 = vpush %v865_v47 }
  0x41   : > { %1304 = vpush %v866_v50  ;;  %850 = vrot.lane.b32.xlu1 %v1540_v26, %s1389_s11  ;;  %848 = vrot.lane.b32.xlu0 %v1548_v28, %s1389_s11 }
  0x42   : > { %1306 = vpush %v867_v51 }
  0x43   : > { %1308 = vpush %v868_v52 }
  0x44   : > { %1310 = vpush %v869_v54 }
  0x45   : > { %1312 = vpush %v900_v57  ;;  %1013 = vperm.xlu1 %1363, %v1219_v61   ;;  %1009 = vperm.xlu0 %1362, %v1218_v1  }
  0x46   : > { %1314 = vpush %v901_v58 }
  0x47   : > { %1316 = vpush %v902_v60 }
  0x48   : > { %1318 = vpush %v903_v2 }
  0x49   : > { %1320 = vpush %v904_v63  ;;  %1017 = vperm.xlu1 %1363, %v1220_v3   ;;  %1021 = vperm.xlu0 %1362, %v1221_v8  }
  0x4a   : > { %1322 = vpush %v905_v7 }
  0x4b   : > { %1324 = vpush %v465_v4 }
  0x4c   : > { %1326 = vpush %v467_v5  ;;  %s1755_s9 = spop %1228 }
  0x4d   : > { %1328 = vpush %v469_v6  ;;  %1025 = vperm.xlu1 %1363, %v1222_v15   ;;  %1029 = vperm.xlu0 %1362, %v1223_v16   ;;  %s1757_s10 = spop %1230  ;;  %v596_v37 = vstv %s1755_s9 }
  0x4e   : > { %1330 = vpush %v471_v10  ;;  %s1759_s11 = spop %1232  ;;  %v600_v38 = vstv %s1757_s10 }
  0x4f   : > { %1332 = vpush %v473_v18  ;;  %s1761_s12 = spop %1234  ;;  %v604_v39 = vstv %s1759_s11 }
  0x50   : > { %1334 = vpush %v475_v21  ;;  %s1763_s13 = spop %1236  ;;  %v608_v42 = vstv %s1761_s12 }
  0x51   : > { %s1765_s14 = spop %1238  ;;  %v612_v43 = vstv %s1763_s13 }
  0x52   : > { %s1767_s15 = spop %1240  ;;  %v616_v44 = vstv %s1765_s14 }
  0x53   : > { %s1769_s16 = spop %1242  ;;  %v637_v24 = vstv %s1767_s15 }
  0x54   : > { %s1771_s18 = spop %1244  ;;  %v640_v27 = vstv %s1769_s16  ;;  %v654_v46 = vmul.f32 %v637_v24, %v1637_v62  ;;  %s1859_s16 = scalar_lea.vmem %s1982_s0, %s1477_s17 }
  0x55   : > { %s1773_s19 = spop %1246  ;;  %v643_v29 = vstv %s1771_s18  ;;  %v655_v47 = vmul.f32 %v640_v27, %v1646_v9 }
  0x56   : > { %s1775_s21 = spop %1248  ;;  %v646_v35 = vstv %s1773_s19  ;;  %v656_v50 = vmul.f32 %v643_v29, %v1655_v17 }
  0x57   : > { %s1777_s22 = spop %1250  ;;  %v657_v51 = vmul.f32 %v646_v35, %v1664_v25  ;;  %v649_v60 = vstv %s1775_s21  ;;  %v476_v35 = vld [vmem:[%s1859_s16] sm:$0x3] }
  0x58   : > { %s1779_s27 = spop %1252  ;;  %v652_v61 = vstv %s1777_s22  ;;  %v658_v4 = vmul.f32 %v649_v60, %v1673_v30  ;;  %v478_v60 = vld [vmem:[%s1859_s16 + $0x4] sm:$0x3] }
  0x59   : > { %s1781_s20 = spop %1254  ;;  %v673_v52 = vstv %s1779_s27  ;;  %v659_v5 = vmul.f32 %v652_v61, %v1683_v36  ;;  %v479_v61 = vld [vmem:[%s1859_s16 + $0x6] sm:$0x3] }
  0x5a   : > { %s1783_s23 = spop %1256  ;;  %v676_v1 = vstv %s1781_s20  ;;  %v690_v3 = vmul.f32 %v673_v52, %v1535_v23 }
  0x5b   : > { %s1785_s24 = spop %1258  ;;  %v679_v54 = vstv %s1783_s23  ;;  %v691_v6 = vmul.f32 %v676_v1, %v1556_v32 }
  0x5c   : > { %s1787_s25 = spop %1260  ;;  %v682_v2 = vstv %s1785_s24  ;;  %v692_v8 = vmul.f32 %v679_v54, %v1532_v22 }
  0x5d   : > { %s1789_s26 = spop %1262  ;;  %v685_v63 = vstv %s1787_s25  ;;  %v693_v10 = vmul.f32 %v682_v2, %v1553_v31 }
  0x5e   : > { %s1791_s1 = spop %1264  ;;  %v688_v7 = vstv %s1789_s26  ;;  %v694_v32 = vmul.f32 %v685_v63, %v1573_v41 }
  0x5f   : > { %s1793_s2 = spop %1266  ;;  %v695_v31 = vmul.f32 %v688_v7, %v1570_v40  ;;  %v739_v18 = vstv %s1791_s1 }
  0x60   : > { %s1795_s3 = spop %1268  ;;  %v742_v21 = vstv %s1793_s2 }
  0x61   : > { %s1797_s4 = spop %1270  ;;  %v745_v40 = vstv %s1795_s3 }
  0x62   : > { %2012 = sst [smem:[#allocation5_spill]] %s1797_s4  ;;  %s1799_s5 = spop %1272 }
  0x63   : > { %2013 = sst [smem:[#allocation6_spill]] %s1799_s5  ;;  %s1801_s6 = spop %1274 }
  0x64   : > { %s1803_s7 = spop %1276  ;;  %s2015_s19 = sld [smem:[#allocation5_spill]] }
  0x65   : > { %s1805_s30 = spop %1278  ;;  %s2016_s22 = sld [smem:[#allocation6_spill]] }
  0x66   : > { %s1807_s28 = spop %1280 }
  0x67   : > { %s1809_s29 = spop %1282 }
  0x68   : > { %s1811_s8 = spop %1284 }
  0x69   : > { %2014 = sst [smem:[#allocation7_spill]] %s1811_s8  ;;  %s1813_s4 = spop %1286 }
  0x6a   : > { %s1817_s5 = spop %1288 }
  0x6b   : > { %s1825_s8 = spop %1290 }
  0x6c   : > { %s1831_s15 = spop %1292 }
  0x6d   : > { %s1841_s9 = spop %1294 }
  0x6e   : > { %s1847_s10 = spop %1296 }
  0x6f   : > { %s1861_s18 = spop %1298 }
  0x70   : > { %s1869_s21 = spop %1300 }
  0x71   : > { %s1879_s1 = spop %1302 }
  0x72   : > { %s1885_s2 = spop %1304 }
  0x93   : > { %v574_v57 = vpop.permute.xlu1 %573  ;;  %v570_v58 = vpop.permute.xlu0 %569 }
  0x94   : > { %v590_v62 = vsel %vm587_vm1, 0.0, %v574_v57  ;;  %v588_v9 = vsel %vm587_vm1, 0.0, %v570_v58 }
  0x95   : > { %v620_v17 = vmul.f32 %v604_v39, %v590_v62  ;;  %v618_v25 = vmul.f32 %v596_v37, %v588_v9  ;;  %v477_v37 = vld [vmem:[%s1859_s16 + $0x2] sm:$0x3]  ;;  %v748_v39 = vstv %s2015_s19  ;;  %v751_v62 = vstv %s2016_s22 }
  0x96   : > { %v754_v9 = vstv %s1801_s6 }
  0x97   : > { %v662_v23 = vadd.f32 %v656_v50, %v620_v17  ;;  %v660_v22 = vadd.f32 %v654_v46, %v618_v25  ;;  %v576_v15 = vpop.permute.xlu1 %575  ;;  %v572_v30 = vpop.permute.xlu0 %571  ;;  %v775_v46 = vstv %s1803_s7  ;;  %v778_v50 = vstv %s1805_s30  ;;  %s2017_s7 = sld [smem:[#allocation7_spill]] }
  0x98   : > { %v591_v36 = vsel %vm587_vm1, 0.0, %v576_v15  ;;  %v589_v16 = vsel %vm587_vm1, 0.0, %v572_v30  ;;  %v792_v17 = vmul.f32 %v775_v46, %v476_v35  ;;  %v793_v25 = vmul.f32 %v778_v50, %v477_v37  ;;  %v480_v35 = vld [vmem:[%s1859_s16 + $0x8] sm:$0x3]  ;;  %v481_v37 = vld [vmem:[%s1859_s16 + $0xa] sm:$0x3] }
  0x99   : > { %v696_v24 = vadd.f32 %v690_v3, %v660_v22  ;;  %v1871_v27 = vadd.f32 %v692_v8, %v662_v23  ;;  %v621_v29 = vmul.f32 %v608_v42, %v591_v36  ;;  %v619_v41 = vmul.f32 %v600_v38, %v589_v16 }
  0x9a   : > { %v781_v42 = vstv %s1807_s28  ;;  %v784_v38 = vstv %s1809_s29  ;;  %s1895_s28 = spop %1306  ;;  %v790_v16 = vstv %s1813_s4 }
  0x9b   : > { %v663_v52 = vadd.f32 %v657_v51, %v621_v29  ;;  %v661_v54 = vadd.f32 %v655_v47, %v619_v41  ;;  %v580_v57 = vpop.permute.xlu1 %579  ;;  %v578_v58 = vpop.permute.xlu0 %577  ;;  %v794_v3 = vmul.f32 %v781_v42, %v478_v60  ;;  %v795_v8 = vmul.f32 %v784_v38, %v479_v61  ;;  %s1899_s29 = spop %1308 }
  0x9c   : > { %v593_v1 = vsel %vm587_vm1, 0.0, %v580_v57  ;;  %v592_v2 = vsel %vm587_vm1, 0.0, %v578_v58  ;;  %v826_v61 = vstv %s1861_s18 }
  0x9d   : > { %v699_v63 = vadd.f32 %v693_v10, %v663_v52  ;;  %v623_v51 = vmul.f32 %v616_v44, %v593_v1  ;;  %v622_v47 = vmul.f32 %v612_v43, %v592_v2  ;;  %v697_v7 = vadd.f32 %v691_v6, %v661_v54 }
  0x9e   : > { %v811_v10 = vstv %s1817_s5  ;;  %v814_v44 = vstv %s1825_s8  ;;  %v787_v36 = vstv %s2017_s7  ;;  %s1907_s5 = spop %1310  ;;  %v817_v52 = vstv %s1831_s15 }
  0x9f   : > { %v665_v23 = vadd.f32 %v659_v5, %v623_v51  ;;  %v664_v22 = vadd.f32 %v658_v4, %v622_v47  ;;  %v711_v15 = vpop.permute.xlu1 %710  ;;  %v709_v30 = vpop.permute.xlu0 %708  ;;  %v828_v46 = vmul.f32 %v811_v10, %v1607_v48  ;;  %v829_v50 = vmul.f32 %v814_v44, %v1602_v45  ;;  %s1915_s4 = spop %1312 }
  0xa0   : > { %v727_v43 = vsel %vm587_vm1, 0.0, %v711_v15  ;;  %v726_v6 = vsel %vm587_vm1, 0.0, %v709_v30  ;;  %v820_v54 = vstv %s1841_s9  ;;  %s1921_s8 = spop %1314  ;;  %s2018_s9 = sld [smem:[#allocation15_spill]] }
  0xa1   : > { %v700_v29 = vadd.f32 %v694_v32, %v664_v22  ;;  %v701_v5 = vadd.f32 %v695_v31, %v665_v23  ;;  %v757_v41 = vmul.f32 %v742_v21, %v727_v43  ;;  %v756_v4 = vmul.f32 %v739_v18, %v726_v6  ;;  %s1928_s3 = spop %1316 }
  0xa2   : > { %v823_v32 = vstv %s1847_s10  ;;  %v796_v31 = vmul.f32 %v787_v36, %v480_v35  ;;  %v797_v18 = vmul.f32 %v790_v16, %v481_v37  ;;  %v831_v51 = vmul.f32 %v820_v54, %v1620_v55  ;;  %s1319_s30 = spop %1318 }
  0xa3   : > { %v763_v57 = vadd.f32 %v757_v41, %v697_v7  ;;  %v762_v58 = vadd.f32 %v756_v4, %v696_v24  ;;  %v715_v60 = vpop.permute.xlu1 %714  ;;  %v713_v42 = vpop.permute.xlu0 %712  ;;  %v830_v24 = vmul.f32 %v817_v52, %v1623_v56  ;;  %v832_v47 = vmul.f32 %v823_v32, %v1679_v34  ;;  %s1321_s6 = spop %1320 }
  0xa4   : > { %v729_v21 = vsel %vm587_vm1, 0.0, %v715_v60  ;;  %v728_v38 = vsel %vm587_vm1, 0.0, %v713_v42  ;;  %v833_v7 = vmul.f32 %v826_v61, %v1676_v33  ;;  %v907_v34 = vstv %s1915_s4  ;;  %s1323_s13 = spop %1322 }
  0xa5   : > { %v798_v48 = vadd.f32 %v792_v17, %v762_v58  ;;  %v799_v1 = vadd.f32 %v793_v25, %v763_v57  ;;  %v759_v45 = vmul.f32 %v748_v39, %v729_v21  ;;  %v758_v2 = vmul.f32 %v745_v40, %v728_v38  ;;  %s1325_s14 = spop %1324 }
  0xa6   : > { %v910_v15 = vstv %s1921_s8  ;;  %v913_v43 = vstv %s1928_s3  ;;  %v916_v6 = vstv %s1319_s30  ;;  %v877_v57 = vstv %s1885_s2  ;;  %s1327_s27 = spop %1326  ;;  %s463_s10 = scalar_lea.vmem %s2018_s9, %s1477_s17 }
  0xa7   : > { %v834_v23 = vadd.f32 %v828_v46, %v798_v48  ;;  %v835_v17 = vadd.f32 %v829_v50, %v799_v1  ;;  %v765_v39 = vadd.f32 %v759_v45, %v699_v63  ;;  %v764_v40 = vadd.f32 %v758_v2, %v1871_v27  ;;  %v719_v25 = vpop.permute.xlu1 %718  ;;  %v717_v22 = vpop.permute.xlu0 %716  ;;  %s1329_s20 = spop %1328 }
  0xa8   : > { %v731_v55 = vsel %vm587_vm1, 0.0, %v719_v25  ;;  %v730_v56 = vsel %vm587_vm1, 0.0, %v717_v22  ;;  %v871_v63 = vstv %s1869_s21  ;;  %v874_v27 = vstv %s1879_s1  ;;  %s1331_s23 = spop %1330 }
  0xa9   : > { %v800_v30 = vadd.f32 %v794_v3, %v764_v40  ;;  %v801_v33 = vadd.f32 %v795_v8, %v765_v39  ;;  %v761_v10 = vmul.f32 %v754_v9, %v731_v55  ;;  %v760_v44 = vmul.f32 %v751_v62, %v730_v56  ;;  %s1333_s24 = spop %1332 }
  0xaa   : > { %v924_v9 = vmul.f32 %v907_v34, %v1610_v49  ;;  %v925_v62 = vmul.f32 %v910_v15, %v1616_v53  ;;  %v880_v58 = vstv %s1895_s28  ;;  %v886_v2 = vstv %s1907_s5  ;;  %s1335_s25 = spop %1334 }
  0xab   : > { %v836_v36 = vadd.f32 %v830_v24, %v800_v30  ;;  %v837_v16 = vadd.f32 %v831_v51, %v801_v33  ;;  %v767_v41 = vadd.f32 %v761_v10, %v701_v5  ;;  %v766_v4 = vadd.f32 %v760_v44, %v700_v29  ;;  %v843_v35 = vpop.permute.xlu1 %842  ;;  %v841_v37 = vpop.permute.xlu0 %840 }
  0xac   : > { %v859_v3 = vsel %vm587_vm1, 0.0, %v843_v35  ;;  %v858_v8 = vsel %vm587_vm1, 0.0, %v841_v37  ;;  %v926_v5 = vmul.f32 %v913_v43, %v1628_v59  ;;  %v927_v29 = vmul.f32 %v916_v6, %v1641_v0 }
  0xad   : > { %v802_v46 = vadd.f32 %v796_v31, %v766_v4  ;;  %v803_v50 = vadd.f32 %v797_v18, %v767_v41  ;;  %v889_v52 = vmul.f32 %v874_v27, %v859_v3  ;;  %v888_v54 = vmul.f32 %v871_v63, %v858_v8 }
  0xae   : > { %v919_v31 = vstv %s1321_s6  ;;  %v922_v18 = vstv %s1323_s13  ;;  %v883_v0 = vstv %s1899_s29  ;;  %v938_v30 = vstv %s1325_s14 }
  0xaf   : > { %v838_v60 = vadd.f32 %v832_v47, %v802_v46  ;;  %v839_v42 = vadd.f32 %v833_v7, %v803_v50  ;;  %v895_v32 = vadd.f32 %v889_v52, %v835_v17  ;;  %v894_v61 = vadd.f32 %v888_v54, %v834_v23  ;;  %v847_v49 = vpop.permute.xlu1 %846  ;;  %v845_v53 = vpop.permute.xlu0 %844 }
  0xb0   : > { %v861_v21 = vsel %vm587_vm1, 0.0, %v847_v49  ;;  %v860_v38 = vsel %vm587_vm1, 0.0, %v845_v53  ;;  %v928_v23 = vmul.f32 %v919_v31, %v1650_v14  ;;  %v929_v17 = vmul.f32 %v922_v18, %v1659_v19 }
  0xb1   : > { %v930_v48 = vadd.f32 %v924_v9, %v894_v61  ;;  %v931_v1 = vadd.f32 %v925_v62, %v895_v32  ;;  %v891_v59 = vmul.f32 %v880_v58, %v861_v21  ;;  %v890_v45 = vmul.f32 %v877_v57, %v860_v38 }
  0xb2   : > { %v942_v33 = vstv %s1327_s27  ;;  %v960_v19 = vmul.f32 %v938_v30, %v1514_v12  ;;  %v946_v63 = vstv %s1329_s20  ;;  %v950_v27 = vstv %s1331_s23 }
  0xb3   : > { %v897_v24 = vadd.f32 %v891_v59, %v837_v16  ;;  %v896_v51 = vadd.f32 %v890_v45, %v836_v36  ;;  %v851_v47 = vpop.permute.xlu1 %850  ;;  %v849_v7 = vpop.permute.xlu0 %848  ;;  %v961_v44 = vmul.f32 %v942_v33, %v1528_v20  ;;  %v962_v43 = vmul.f32 %v946_v63, %v1511_v11 }
  0xb4   : > { %v863_v39 = vsel %vm587_vm1, 0.0, %v851_v47  ;;  %v862_v40 = vsel %vm587_vm1, 0.0, %v849_v7  ;;  %v963_v6 = vmul.f32 %v950_v27, %v1517_v13  ;;  %v966_v16 = vadd.f32 %v960_v19, %v930_v48 }
  0xb5   : > { %v893_v25 = vmul.f32 %v886_v2, %v863_v39  ;;  %v892_v22 = vmul.f32 %v883_v0, %v862_v40  ;;  %v932_v55 = vadd.f32 %v926_v5, %v896_v51  ;;  %v933_v56 = vadd.f32 %v927_v29, %v897_v24 }
  0xb6   : > { %v967_v36 = vadd.f32 %v961_v44, %v931_v1  ;;  %v954_v41 = vstv %s1333_s24  ;;  %v958_v4 = vstv %s1335_s25 }
  0xb7   : > { %v899_v34 = vadd.f32 %v893_v25, %v839_v42  ;;  %v898_v15 = vadd.f32 %v892_v22, %v838_v60  ;;  %v964_v3 = vmul.f32 %v954_v41, %v1548_v28  ;;  %v965_v8 = vmul.f32 %v958_v4, %v1540_v26 }
  0xb8   : > { %v968_v11 = vadd.f32 %v962_v43, %v932_v55  ;;  %v969_v13 = vadd.f32 %v963_v6, %v933_v56 }
  0xb9   : > { %v934_v10 = vadd.f32 %v928_v23, %v898_v15  ;;  %v935_v14 = vadd.f32 %v929_v17, %v899_v34 }
  0xbb   : > { %v970_v52 = vadd.f32 %v964_v3, %v934_v10  ;;  %v971_v54 = vadd.f32 %v965_v8, %v935_v14 }
  0xc0   : > { %v1014_v12 = vpop.permute.xlu1 %1013  ;;  %v1010_v35 = vpop.permute.xlu0 %1009 }
  0xc1   : > { %v1033_v20 = vadd.f32 %v1014_v12, %v967_v36  ;;  %v1032_v37 = vadd.f32 %v1010_v35, %v966_v16 }
  0xc3   : > { %1040 = vst.msk [vmem:[%s463_s10 + $0x2] sm:$0x3] %vm1038_vm2, %v1033_v20  ;;  %1039 = vst.msk [vmem:[%s463_s10] sm:$0x3] %vm1038_vm2, %v1032_v37 }
  0xc4   : > { %v1018_v9 = vpop.permute.xlu1 %1017  ;;  %v1022_v62 = vpop.permute.xlu0 %1021 }
  0xc5   : > { %v1034_v46 = vadd.f32 %v1018_v9, %v968_v11  ;;  %v1035_v50 = vadd.f32 %v1022_v62, %v969_v13 }
  0xc7   : > { %1041 = vst.msk [vmem:[%s463_s10 + $0x4] sm:$0x3] %vm1038_vm2, %v1034_v46  ;;  %1042 = vst.msk [vmem:[%s463_s10 + $0x6] sm:$0x3] %vm1038_vm2, %v1035_v50 }
  0xc8   : > { %v1026_v57 = vpop.permute.xlu1 %1025  ;;  %v1030_v28 = vpop.permute.xlu0 %1029 }
  0xc9   : > { %v1036_v58 = vadd.f32 %v1026_v57, %v970_v52  ;;  %v1037_v26 = vadd.f32 %v1030_v28, %v971_v54 }
  0xcb   : > { %1043 = vst.msk [vmem:[%s463_s10 + $0x8] sm:$0x3] %vm1038_vm2, %v1036_v58  ;;  %1044 = vst.msk [vmem:[%s463_s10 + $0xa] sm:$0x3] %vm1038_vm2, %v1037_v26 }
  0xcc PF: > { %s2019_s17 = sld [smem:[#allocation3_spill]] }
  0xcd   : > { %s2020_s27 = sld [smem:[#allocation2_spill]] }
  0xce   : > { %s2021_s28 = sld [smem:[#allocation4_spill]] }
  0xd2   : > { %s18_s29 = sadd.s32 1, %s2019_s17  }
  0xd3   : > { %p15_p5 = scmp.ge.s32.totalorder %s18_s29, 4  }
  0xd5   :  { %17 = sbr.rel (!%p15_p5) target bundleno = 9 (0x9), region = 99 }

// kernel: lightfuse_forward.9
= control target key start
LH: loop header
LB: loop body
LE: loop exit
PB: predicated region body
PF: predicated region fallthrough
CT: control target
= control target key end

     0   :  { %s1443_s16 = smov 0   ;;  %s1445_s17 = smov 0   ;;  %s1679_s0 = inlined_call_operand.vmem [shape: f32[2,3,256], index: 0, kind: input, shape index: {}]   ;;  %s1680_s1 = inlined_call_operand.vmem [shape: f32[2,3,256], index: 1, kind: input, shape index: {}]   ;;  %s1681_s2 = inlined_call_operand.vmem [shape: f32[2,3,2,2], index: 2, kind: input, shape index: {}]   ;;  %s1682_s3 = inlined_call_operand.vmem [shape: f32[2,16], index: 3, kind: input, shape index: {}]   ;;  %s1683_s4 = inlined_call_operand.vmem [shape: f32[32,3], index: 4, kind: input, shape index: {}]   ;;  %s1684_s5 = inlined_call_operand.vmem [shape: f32[32,3], index: 5, kind: input, shape index: {}]   ;;  %s1685_s6 = inlined_call_operand.vmem [shape: f32[32,1], index: 6, kind: input, shape index: {}]   ;;  %s1686_s7 = inlined_call_operand.vmem [shape: f32[32,32], index: 7, kind: input, shape index: {}]   ;;  %s1687_s8 = inlined_call_operand.vmem [shape: f32[32,1], index: 8, kind: input, shape index: {}]   ;;  %s1688_s9 = inlined_call_operand.vmem [shape: f32[3,32], index: 9, kind: input, shape index: {}]   ;;  %s1689_s10 = inlined_call_operand.vmem [shape: f32[3,1], index: 10, kind: input, shape index: {}]   ;;  %s1690_s11 = inlined_call_operand.vmem [shape: f32[2,3,256], index: 11, kind: output, shape index: {}]  }
   0x1   :  { %s1447_s18 = smov 0  }
   0x2 LB: > { %s33_s19 = sadd.s32 1, %s1367_s17  ;;  %p1266_p0 = scmp.ge.s32.totalorder %s1371_s18, 1  ;;  %s1371_s18 = sphi %s1447_s18, %s21_s18   ;;  %s1367_s17 = sphi %s1445_s17, %s1692_s17   ;;  %s1363_s16 = sphi %s1443_s16, %s1691_s16  }
   0x3   : > { %p35_p1 = scmp.ge.s32.totalorder %s33_s19, 2  ;;  %p390_p2 = scmp.lt.s32.totalorder %s1371_s18, 3 }
   0x5   : > { %s1694_s19 = smov (%p35_p1, %s33_s19), 0  ;;  %p391_p3 = pnand %p1266_p0, %p390_p2 }
   0x6   : > { %p456_p4 = scmp.lt.s32.totalorder (!%p391_p3), %s1363_s16, 1  ;;  %s1376_s3 = smov (!%p391_p3), 16  }
   0x7   : > { %394 = sbr.rel (%p391_p3) target bundleno = 707 (0x2c3), region = 64  ;;  %s1378_s15 = smov (!%p391_p3), 48  }
   0x8   : > { %s1380_s21 = smov (!%p391_p3), 80   ;;  %s1381_s22 = smov (!%p391_p3), 96  }
   0x9   : > { %s1382_s23 = smov (!%p391_p3), 112  }
   0xc   : > { %v502_v0 = vld [vmem:[%s1685_s6 + $0x8] sm:$0xff]  ;;  %v504_v1 = vld [vmem:[%s1685_s6 + $0x18] sm:$0xff]  ;;  %v1373_v2 = vmov 0   ;;  %s1696_s16 = smov (!%p456_p4, %s1363_s16), 1  ;;  %v501_v3 = vld [vmem:[%s1685_s6] sm:$0xff]  ;;  %v1374_v5 = vmov 0.0  }
   0xd   : > { %1336 = vset.pattern.permute.xlu1 %v1373_v2  ;;  %1335 = vset.pattern.permute.xlu0 %v1373_v2  ;;  %v503_v4 = vld [vmem:[%s1685_s6 + $0x10] sm:$0xff]  ;;  %s1478_s28 = sshll.u32 %s1696_s16, 3  ;;  %vm532_vm0 = vcmask 1042432   ;;  %v512_v10 = vld [vmem:[%s1687_s8 + $0x18] sm:$0xff]  ;;  %vm519_vm1 = vcmask 23552   ;;  %s1300_s25 = smul.u32 6, %s1696_s16 }
   0xe   : > { %740 = vperm.xlu1 %1336, %v502_v0   ;;  %750 = vperm.xlu0 %1335, %v504_v1   ;;  %s473_s12 = scalar_lea.vmem %s1680_s1, %s1478_s28  ;;  %s463_s14 = scalar_lea.vmem %s1679_s0, %s1478_s28  ;;  %v511_v8 = vld [vmem:[%s1687_s8 + $0x10] sm:$0xff]  ;;  %v509_v13 = vld [vmem:[%s1687_s8] sm:$0xff]  ;;  %v510_v15 = vld [vmem:[%s1687_s8 + $0x8] sm:$0xff]  ;;  %v1375_v20 = vmov 1   ;;  %vm1005_vm2 = vcmask 1041409   ;;  %vm1008_vm3 = vcmask 1042434  }
   0xf   : > { %613 = vmatprep.mubr.f32.mxu1 %v1374_v5  ;;  %601 = vmatprep.mubr.f32.mxu0 %v1374_v5  ;;  %v1484_v6 = vld [vmem:[%s473_s12] sm:$0x77]  ;;  %v499_v11 = vld [vmem:[%s1684_s5 + $0x10] sm:$0xff]  ;;  %v500_v16 = vld [vmem:[%s1684_s5 + $0x18] sm:$0xff]  ;;  %s1531_s20 = scalar_lea.vmem %s1681_s2, %s1300_s25  ;;  %vm1016_vm4 = vcmask 64512   ;;  %vm789_vm5 = vcmask 261120  }
  0x10   : > { %v1492_v7 = vcombine.high %v1484_v6, %v1484_v6  ;;  %v515_v9 = vld [vmem:[%s463_s14] sm:$0x77]  ;;  %v498_v17 = vld [vmem:[%s1684_s5 + $0x8] sm:$0xff]  ;;  %v1054_v21 = vld [vmem:[%s1531_s20 + $0x3] sm:$0x1]  ;;  %s1377_s14 = smov 32  }
  0x11   : > { %v627_v12 = vcombine.high %v515_v9, %v515_v9  ;;  %v497_v14 = vld [vmem:[%s1684_s5] sm:$0xff]  ;;  %v494_v22 = vld [vmem:[%s1683_s4 + $0x8] sm:$0xff]  ;;  %v495_v24 = vld [vmem:[%s1683_s4 + $0x10] sm:$0xff]  ;;  %vm1040_vm6 = vcmask 130048   ;;  %vm1043_vm7 = vcmask 392192   ;;  %vm1045_vm8 = vcmask 523264  }
  0x12   : > { %735 = vperm.xlu1 %1336, %v501_v3   ;;  %745 = vperm.xlu0 %1335, %v503_v4   ;;  %v981_v18 = vld [vmem:[%s1531_s20 + $0x2] sm:$0x1]  ;;  %v982_v23 = vld [vmem:[%s1531_s20 + $0x4] sm:$0x1]  ;;  %v1055_v25 = vld [vmem:[%s1531_s20 + $0x5] sm:$0x1] }
  0x13   : > { %1298 = vmatprep.subr.msk.mxu1 %vm532_vm0, %v1492_v7  ;;  %1274 = vmatprep.subr.msk.mxu0 %vm532_vm0, %v1492_v7  ;;  %v493_v19 = vld [vmem:[%s1683_s4] sm:$0xff]  ;;  %v496_v26 = vld [vmem:[%s1683_s4 + $0x18] sm:$0xff]  ;;  %vm1047_vm9 = vcmask 654336   ;;  %vm1049_vm10 = vcmask 785408   ;;  %vm1051_vm11 = vcmask 916480  }
  0x14   : > { %1299 = vmatpush1.msk.msra.mxu1 %vm532_vm0, %v1484_v6  ;;  %1275 = vmatpush1.msk.msra.mxu0 %vm532_vm0, %v1484_v6  ;;  %v980_v27 = vld [vmem:[%s1531_s20] sm:$0x1]  ;;  %v1053_v28 = vld [vmem:[%s1531_s20 + $0x1] sm:$0x1]  ;;  %s1379_s20 = smov 64  }
  0x15   : > { %1278 = vmatmul.mubr.msk.f32.vlgmr.msra.gmra.mxu1 %vm519_vm1, %v499_v11  ;;  %1280 = vmatprep.subr.msk.mxu1 %vm532_vm0, %v627_v12  ;;  %v514_v29 = vld [vmem:[%s1689_s10] sm:$0x7] }
  0x16   : > { %781 = vperm.xlu1 %1336, %v511_v8   ;;  %786 = vperm.xlu0 %1335, %v512_v10  }
  0x17   : > { %619 = vmatprep.mubr.f32.mxu1 %v1374_v5  ;;  %1281 = vmatpush1.msk.msra.mxu1 %vm532_vm0, %v515_v9 }
  0x18   : > { %1276 = vmatmul.mubr.msk.f32.vlgmr.msra.gmra.mxu0 %vm519_vm1, %v497_v14 }
  0x19   : > { %1279 = vmatmul.mubr.msk.f32.gmra.mxu1 %vm519_vm1, %v500_v16  ;;  %607 = vmatprep.mubr.f32.mxu0 %v1374_v5 }
  0x1a   : > { %771 = vperm.xlu1 %1336, %v509_v13   ;;  %776 = vperm.xlu0 %1335, %v510_v15  }
  0x1b   : > { %708 = vmatprep.mubr.f32.mxu1 %v1374_v5 }
  0x1c   : > { %1277 = vmatmul.mubr.msk.f32.gmra.mxu0 %vm519_vm1, %v498_v17 }
  0x1d   : > { %1282 = vmatmul.mubr.msk.f32.vlgmr.msra.gmra.mxu1 %vm519_vm1, %v493_v19  ;;  %866 = vmatprep.mubr.f32.mxu0 %v1374_v5 }
  0x1e   : > { %1337 = vset.pattern.permute.xlu1 %v1375_v20  ;;  %989 = vperm.xlu0 %1335, %v981_v18  }
  0x1f   : > { %999 = vperm.xlu1 %1337, %v981_v18   ;;  %714 = vmatprep.mubr.f32.mxu1 %v1374_v5 }
  0x21   : > { %1283 = vmatmul.mubr.msk.f32.gmra.mxu1 %vm519_vm1, %v494_v22 }
  0x22   : > { %1062 = vperm.xlu0 %1335, %v1054_v21   ;;  %720 = vmatprep.mubr.f32.mxu1 %v1374_v5 }
  0x23   : > { %1072 = vperm.xlu1 %1337, %v1054_v21  }
  0x25   : > { %1284 = vmatmul.mubr.msk.f32.gmra.mxu1 %vm519_vm1, %v495_v24 }
  0x26   : > { %993 = vperm.xlu0 %1335, %v982_v23   ;;  %726 = vmatprep.mubr.f32.mxu1 %v1374_v5 }
  0x27   : > { %1002 = vperm.xlu1 %1337, %v982_v23  }
  0x29   : > { %1285 = vmatmul.mubr.msk.f32.gmra.mxu1 %vm519_vm1, %v496_v26 }
  0x2a   : > { %1066 = vperm.xlu0 %1335, %v1055_v25   ;;  %971 = vmatprep.mubr.f32.mxu1 %v1374_v5 }
  0x2b   : > { %1075 = vperm.xlu1 %1337, %v1055_v25  }
  0x2e   : > { %985 = vperm.xlu0 %1335, %v980_v27  }
  0x2f   : > { %996 = vperm.xlu1 %1337, %v980_v27  }
  0x32   : > { %1058 = vperm.xlu0 %1335, %v1053_v28  }
  0x33   : > { %1069 = vperm.xlu1 %1337, %v1053_v28  }
  0x36   : > { %901 = vperm.xlu0 %1335, %v514_v29  }
  0x3a   : > { %1338 = vset.pattern.permute.xlu0 %v1375_v20 }
  0x89   : > { %v1571_v30 = vpop.permute.xlu0 %750  ;;  %v1573_v31 = vpop.permute.xlu1 %740 }
  0x8d   : > { %v1575_v32 = vpop.permute.xlu0 %745  ;;  %v1577_v33 = vpop.permute.xlu1 %735 }
  0x91   : > { %v1579_v34 = vpop.permute.xlu1 %781  ;;  %v1581_v35 = vpop.permute.xlu0 %786 }
  0x95   : > { %v1583_v36 = vpop.permute.xlu1 %771  ;;  %v1585_v37 = vpop.permute.xlu0 %776 }
  0x99   : > { %v990_v39 = vpop.permute.xlu0 %989 }
  0x9a   : > { %v1000_v38 = vpop.permute.xlu1 %999  ;;  %v1004_v47 = vrot.slane %v990_v39, 7 }
  0x9b   : > { %v1011_v46 = vrot.slane %v1000_v38, 7 }
  0x9d   : > { %v1063_v41 = vpop.permute.xlu0 %1062 }
  0x9e   : > { %v1073_v40 = vpop.permute.xlu1 %1072  ;;  %v1077_v53 = vrot.slane %v1063_v41, 7 }
  0x9f   : > { %v1082_v52 = vrot.slane %v1073_v40, 7 }
  0xa1   : > { %v994_v43 = vpop.permute.xlu0 %993 }
  0xa2   : > { %v1003_v42 = vpop.permute.xlu1 %1002  ;;  %v1007_v49 = vrot.slane %v994_v43, 6 }
  0xa3   : > { %v1013_v48 = vrot.slane %v1003_v42, 6 }
  0xa5   : > { %v1067_v45 = vpop.permute.xlu0 %1066 }
  0xa6   : > { %v1076_v44 = vpop.permute.xlu1 %1075  ;;  %v1079_v57 = vrot.slane %v1067_v45, 6 }
  0xa7   : > { %v1084_v56 = vrot.slane %v1076_v44, 6 }
  0xa9   : > { %v986_v51 = vpop.permute.xlu0 %985 }
  0xaa   : > { %v997_v50 = vpop.permute.xlu1 %996  ;;  %v1006_v55 = vsel %vm1005_vm2, %v1004_v47, %v986_v51 }
  0xab   : > { %v1012_v54 = vsel %vm1005_vm2, %v1011_v46, %v997_v50  ;;  %v1009_v59 = vsel %vm1008_vm3, %v1007_v49, %v1006_v55 }
  0xac   : > { %v1014_v58 = vsel %vm1008_vm3, %v1013_v48, %v1012_v54  ;;  %v508_v54 = vld [vmem:[%s1686_s7 + $0x18] sm:$0xff] }
  0xad   : > { %v1592_v60 = vsel %vm1016_vm4, %v1009_v59, %v1014_v58  ;;  %v1059_v62 = vpop.permute.xlu0 %1058 }
  0xae   : > { %v1070_v61 = vpop.permute.xlu1 %1069  ;;  %1019 = vrot.lane.b32.xlu1 %v1592_v60, %s1376_s3  ;;  %v1078_v0 = vsel %vm1005_vm2, %v1077_v53, %v1059_v62  ;;  %v507_v53 = vld [vmem:[%s1686_s7 + $0x10] sm:$0xff] }
  0xaf   : > { %v1083_v63 = vsel %vm1005_vm2, %v1082_v52, %v1070_v61  ;;  %v1080_v2 = vsel %vm1008_vm3, %v1079_v57, %v1078_v0 }
  0xb0   : > { %v1085_v1 = vsel %vm1008_vm3, %v1084_v56, %v1083_v63 }
  0xb1   : > { %v1600_v3 = vsel %vm1016_vm4, %v1080_v2, %v1085_v1 }
  0xb2   : > { %1022 = vrot.lane.b32.xlu1 %v1592_v60, %s1377_s14  ;;  %1089 = vrot.lane.b32.xlu0 %v1600_v3, %s1376_s3 }
  0xb6   : > { %1025 = vrot.lane.b32.xlu1 %v1592_v60, %s1378_s15  ;;  %1092 = vrot.lane.b32.xlu0 %v1600_v3, %s1377_s14 }
  0xba   : > { %1028 = vrot.lane.b32.xlu1 %v1592_v60, %s1379_s20  ;;  %1095 = vrot.lane.b32.xlu0 %v1600_v3, %s1378_s15 }
  0xbe   : > { %1031 = vrot.lane.b32.xlu1 %v1592_v60, %s1380_s21  ;;  %1098 = vrot.lane.b32.xlu0 %v1600_v3, %s1379_s20  ;;  %s491_s20 = scalar_lea.vmem %s1690_s11, %s1478_s28 }
  0xc2   : > { %1034 = vrot.lane.b32.xlu1 %v1592_v60, %s1381_s22  ;;  %1101 = vrot.lane.b32.xlu0 %v1600_v3, %s1380_s21 }
  0xc6   : > { %1037 = vrot.lane.b32.xlu1 %v1592_v60, %s1382_s23  ;;  %1104 = vrot.lane.b32.xlu0 %v1600_v3, %s1381_s22 }
  0xca   : > { %1107 = vrot.lane.b32.xlu0 %v1600_v3, %s1382_s23 }
  0xd5   : > { %v615_v4 = vpop.f32.mrf.mxu1 }
  0xd7   : > { %v617_v8 = vpop.f32.mrf.mxu1 }
  0xd8   : > { %v603_v11 = vpop.f32.mrf.mxu0 }
  0xd9   : > { %v621_v9 = vpop.f32.mrf.mxu1 }
  0xda   : > { %v605_v14 = vpop.f32.mrf.mxu0 }
  0xdb   : > { %v623_v10 = vpop.f32.mrf.mxu1 }
  0xdc   : > { %v609_v17 = vpop.f32.mrf.mxu0 }
  0xdd   : > { %v710_v12 = vpop.f32.mrf.mxu1 }
  0xde   : > { %v611_v20 = vpop.f32.mrf.mxu0  ;;  %v711_v41 = vadd.f32 %v710_v12, %v603_v11 }
  0xdf   : > { %v712_v13 = vpop.f32.mrf.mxu1 }
  0xe0   : > { %v713_v38 = vadd.f32 %v712_v13, %v605_v14  ;;  %v753_v49 = vadd.f32 %v1577_v33, %v711_v41 }
  0xe1   : > { %v716_v15 = vpop.f32.mrf.mxu1 }
  0xe2   : > { %v717_v28 = vadd.f32 %v716_v15, %v609_v17  ;;  %v754_v47 = vadd.f32 %v1577_v33, %v713_v38  ;;  %v506_v33 = vld [vmem:[%s1686_s7 + $0x8] sm:$0xff]  ;;  %v902_v17 = vpop.permute.xlu0 %901 }
  0xe3   : > { %v718_v16 = vpop.f32.mrf.mxu1 }
  0xe4   : > { %v719_v26 = vadd.f32 %v718_v16, %v611_v20  ;;  %v755_v45 = vadd.f32 %v1573_v31, %v717_v28  ;;  %v762_v52 = vmax.f32 %v754_v47, 0.0 }
  0xe5   : > { %v722_v18 = vpop.f32.mrf.mxu1 }
  0xe6   : > { %v723_v24 = vadd.f32 %v722_v18, %v615_v4  ;;  %v756_v43 = vadd.f32 %v1573_v31, %v719_v26  ;;  %v505_v31 = vld [vmem:[%s1686_s7] sm:$0xff] }
  0xe7   : > { %v724_v19 = vpop.f32.mrf.mxu1 }
  0xe8   : > { %v725_v22 = vadd.f32 %v724_v19, %v617_v8  ;;  %v757_v42 = vadd.f32 %v1575_v32, %v723_v24  ;;  %v764_v51 = vmax.f32 %v756_v43, 0.0 }
  0xe9   : > { %v728_v21 = vpop.f32.mrf.mxu1 }
  0xea   : > { %v729_v23 = vadd.f32 %v728_v21, %v621_v9  ;;  %v758_v39 = vadd.f32 %v1575_v32, %v725_v22  ;;  %v765_v50 = vmax.f32 %v757_v42, 0.0  ;;  %v761_v32 = vmax.f32 %v753_v49, 0.0 }
  0xeb   : > { %v730_v25 = vpop.f32.mrf.mxu1 }
  0xec   : > { %v731_v27 = vadd.f32 %v730_v25, %v623_v10  ;;  %v759_v29 = vadd.f32 %v1571_v30, %v729_v23  ;;  %v766_v48 = vmax.f32 %v758_v39, 0.0 }
  0xee   : > { %v760_v40 = vadd.f32 %v1571_v30, %v731_v27  ;;  %v767_v46 = vmax.f32 %v759_v29, 0.0  ;;  %v763_v30 = vmax.f32 %v755_v45, 0.0 }
  0xf0   : > { %v768_v44 = vmax.f32 %v760_v40, 0.0 }
  0xf2   : > { %826 = vmatprep.subr.mxu0 %v768_v44 }
  0xf3   : > { %827 = vmatpush1.msra.mxu0 %v767_v46 }
  0xf4   : > { %828 = vmatprep.subr.mxu0 %v766_v48 }
  0xf5   : > { %829 = vmatpush1.msra.mxu0 %v765_v50 }
  0xf6   : > { %830 = vmatprep.subr.mxu0 %v764_v51 }
  0xf7   : > { %831 = vmatpush1.msra.mxu0 %v763_v30 }
  0xf8   : > { %832 = vmatprep.subr.mxu0 %v762_v52 }
  0xf9   : > { %833 = vmatpush1.msra.mxu0 %v761_v32 }
  0xfa   : > { %1286 = vmatmul.mubr.msk.f32.vlgmr.msra.gmra.mxu0 %vm789_vm5, %v505_v31 }
  0xfb   : > { %872 = vmatprep.mubr.f32.mxu0 %v1374_v5 }
  0xfe   : > { %1287 = vmatmul.mubr.msk.f32.gmra.mxu0 %vm789_vm5, %v506_v33 }
  0xff   : > { %878 = vmatprep.mubr.f32.mxu0 %v1374_v5 }
 0x102   : > { %1288 = vmatmul.mubr.msk.f32.gmra.mxu0 %vm789_vm5, %v507_v53 }
 0x103   : > { %884 = vmatprep.mubr.f32.mxu0 %v1374_v5 }
 0x106   : > { %1289 = vmatmul.mubr.msk.f32.gmra.mxu0 %vm789_vm5, %v508_v54 }
 0x124   : > { %v1090_v18 = vpop.permute.xlu0 %1089 }
 0x125   : > { %v1110_v39 = vsel %vm1040_vm6, %v1600_v3, %v1090_v18 }
 0x128   : > { %v1093_v20 = vpop.permute.xlu0 %1092 }
 0x129   : > { %v1111_v42 = vsel %vm789_vm5, %v1110_v39, %v1093_v20 }
 0x12c   : > { %v1096_v22 = vpop.permute.xlu0 %1095 }
 0x12d   : > { %v1112_v46 = vsel %vm1043_vm7, %v1111_v42, %v1096_v22 }
 0x130   : > { %v1099_v24 = vpop.permute.xlu0 %1098 }
 0x134   : > { %v1102_v26 = vpop.permute.xlu0 %1101 }
 0x138   : > { %v1105_v28 = vpop.permute.xlu0 %1104 }
 0x13c   : > { %v1108_v50 = vpop.permute.xlu0 %1107 }
 0x1ba   : > { %v868_v55 = vpop.f32.mrf.mxu0 }
 0x1bb   : > { %v869_v13 = vadd.f32 %v868_v55, %v1583_v36 }
 0x1bc   : > { %v870_v56 = vpop.f32.mrf.mxu0 }
 0x1bd   : > { %v871_v11 = vadd.f32 %v870_v56, %v1583_v36  ;;  %v1020_v36 = vpop.permute.xlu1 %1019 }
 0x1be   : > { %v874_v57 = vpop.f32.mrf.mxu0  ;;  %v1041_v29 = vsel %vm1040_vm6, %v1592_v60, %v1020_v36  ;;  %v1113_v60 = vsel %vm1045_vm8, %v1112_v46, %v1099_v24 }
 0x1bf   : > { %v875_v9 = vadd.f32 %v874_v57, %v1585_v37  ;;  %v1114_v3 = vsel %vm1047_vm9, %v1113_v60, %v1102_v26 }
 0x1c0   : > { %v876_v58 = vpop.f32.mrf.mxu0  ;;  %v1115_v32 = vsel %vm1049_vm10, %v1114_v3, %v1105_v28 }
 0x1c1   : > { %v877_v4 = vadd.f32 %v876_v58, %v1585_v37  ;;  %v893_v16 = vmax.f32 %v875_v9, 0.0  ;;  %v513_v37 = vld [vmem:[%s1688_s9] sm:$0x7]  ;;  %v1023_v19 = vpop.permute.xlu1 %1022  ;;  %v1116_v53 = vsel %vm1051_vm11, %v1115_v32, %v1108_v50 }
 0x1c2   : > { %v880_v59 = vpop.f32.mrf.mxu0  ;;  %v1042_v38 = vsel %vm789_vm5, %v1041_v29, %v1023_v19 }
 0x1c3   : > { %v881_v2 = vadd.f32 %v880_v59, %v1579_v34  ;;  %v894_v15 = vmax.f32 %v877_v4, 0.0 }
 0x1c4   : > { %v882_v61 = vpop.f32.mrf.mxu0 }
 0x1c5   : > { %v883_v1 = vadd.f32 %v882_v61, %v1579_v34  ;;  %v895_v14 = vmax.f32 %v881_v2, 0.0  ;;  %v891_v34 = vmax.f32 %v869_v13, 0.0  ;;  %v1026_v21 = vpop.permute.xlu1 %1025 }
 0x1c6   : > { %v886_v62 = vpop.f32.mrf.mxu0  ;;  %v1044_v40 = vsel %vm1043_vm7, %v1042_v38, %v1026_v21 }
 0x1c7   : > { %v887_v63 = vadd.f32 %v886_v62, %v1581_v35  ;;  %v896_v12 = vmax.f32 %v883_v1, 0.0 }
 0x1c8   : > { %v888_v0 = vpop.f32.mrf.mxu0 }
 0x1c9   : > { %v889_v5 = vadd.f32 %v888_v0, %v1581_v35  ;;  %v897_v10 = vmax.f32 %v887_v63, 0.0  ;;  %v892_v35 = vmax.f32 %v871_v11, 0.0  ;;  %v1029_v23 = vpop.permute.xlu1 %1028 }
 0x1ca   : > { %v1046_v43 = vsel %vm1045_vm8, %v1044_v40, %v1029_v23 }
 0x1cb   : > { %v898_v8 = vmax.f32 %v889_v5, 0.0 }
 0x1cd   : > { %931 = vmatprep.subr.mxu1 %v898_v8  ;;  %v1032_v25 = vpop.permute.xlu1 %1031 }
 0x1ce   : > { %932 = vmatpush1.msra.mxu1 %v897_v10  ;;  %v1048_v47 = vsel %vm1047_vm9, %v1046_v43, %v1032_v25 }
 0x1cf   : > { %933 = vmatprep.subr.mxu1 %v896_v12 }
 0x1d0   : > { %934 = vmatpush1.msra.mxu1 %v895_v14 }
 0x1d1   : > { %935 = vmatprep.subr.mxu1 %v894_v15  ;;  %v1035_v27 = vpop.permute.xlu1 %1034 }
 0x1d2   : > { %936 = vmatpush1.msra.mxu1 %v893_v16  ;;  %v1050_v49 = vsel %vm1049_vm10, %v1048_v47, %v1035_v27 }
 0x1d3   : > { %937 = vmatprep.subr.mxu1 %v892_v35 }
 0x1d4   : > { %938 = vmatpush1.msra.mxu1 %v891_v34 }
 0x1d5   : > { %1290 = vmatmul.mubr.msk.f32.vlgmr.msra.gmra.mxu1 %vm789_vm5, %v513_v37  ;;  %v1038_v44 = vpop.permute.xlu1 %1037 }
 0x1d6   : > { %v1052_v52 = vsel %vm1051_vm11, %v1050_v49, %v1038_v44 }
 0x295   : > { %v973_v41 = vpop.f32.mrf.mxu1 }
 0x296   : > { %v974_v45 = vadd.f32 %v973_v41, %v902_v17 }
 0x297   : > { %v975_v48 = vpop.f32.mrf.mxu1 }
 0x298   : > { %v978_v51 = vmax.f32 %v974_v45, 0.0  ;;  %v976_v30 = vadd.f32 %v975_v48, %v902_v17 }
 0x29a   : > { %v1117_v31 = vadd.f32 %v1052_v52, %v978_v51  ;;  %v979_v33 = vmax.f32 %v976_v30, 0.0 }
 0x29c   : > { %v1120_v54 = vadd.f32 %v1117_v31, %v1484_v6  ;;  %v1118_v55 = vadd.f32 %v1116_v53, %v979_v33 }
 0x29e   : > { %v1291_v56 = vmul.f32 -1.442695, %v1120_v54  ;;  %v1121_v57 = vadd.f32 %v1118_v55, %v1492_v7 }
 0x2a0   : > { %1341 = vpow2.f32 %v1291_v56  ;;  %v1292_v58 = vmul.f32 -1.442695, %v1121_v57 }
 0x2a2   : > { %1343 = vpow2.f32 %v1292_v58 }
 0x2ad   : > { %v1342_v59 = vpop.eup %1341 }
 0x2ae   : > { %v1128_v61 = vadd.f32 1.0, %v1342_v59 }
 0x2af   : > { %v1344_v62 = vpop.eup %1343 }
 0x2b0   : > { %v1129_v63 = vadd.f32 1.0, %v1344_v62  ;;  %1345 = vrcp.f32 %v1128_v61 }
 0x2b2   : > { %1347 = vrcp.f32 %v1129_v63 }
 0x2bd   : > { %v1346_v0 = vpop.eup %1345 }
 0x2bf   : > { %v1348_v1 = vpop.eup %1347 }
 0x2c0   : > { %v1136_v6 = vcombine.low %v1346_v0, %v1348_v1 }
 0x2c2   : > { %1138 = vst [vmem:[%s491_s20] sm:$0x77] %v1136_v6 }
 0x2c3 PF: > { %s21_s18 = sadd.s32 1, %s1371_s18   ;;  %s1691_s16 = smov %s1367_s17 }
 0x2c4   : > { %p18_p5 = scmp.ge.s32.totalorder %s21_s18, 4   ;;  %s1692_s17 = smov %s1694_s19 }
 0x2c6   :  { %20 = sbr.rel (!%p18_p5) target bundleno = 2 (0x2), region = 100 }

</bundles_post_ra>
